<compile_context>
chip_gen: v7x
topology: tpu7x:2x2x1
jax: 0.10.0
libtpu: 0.0.40
codegen_flags: <defaults>
</compile_context>

<pallas_src>
import functools

import jax
import jax.numpy as jnp
from jax.experimental import pallas as pl
from jax.experimental.pallas import tpu as pltpu


# ------------------------------ Pallas kernel --------------------------------
def _window_attn_kernel(x_ref, wqkv_ref, bqkv_ref, rpb_ref, *rest,
                        num_heads, head_dim, use_mask):
    """One grid step = BW windows: qkv, all-head attention, softmax, proj."""
    if use_mask:
        mask_ref, wproj_ref, bproj_ref, o_ref = rest
    else:
        wproj_ref, bproj_ref, o_ref = rest

    BW, N, C = x_ref.shape
    M = BW * N

    # Fused qkv projection: one (M, C) @ (C, 3C) bf16 MXU matmul, f32 acc.
    # (attention scale is already folded into the q-columns of Wqkv/bqkv)
    x2d = x_ref[...].reshape(M, C)                                   # bf16
    qkv = jnp.dot(x2d, wqkv_ref[...], preferred_element_type=jnp.float32)
    qkv = (qkv + bqkv_ref[...]).reshape(BW, N, 3 * C)                # f32

    if use_mask:
        mask = mask_ref[...].astype(jnp.float32)                     # (BW, N, N)

    outs = []
    for h in range(num_heads):                     # static unroll (small H)
        lo = h * head_dim
        q = qkv[:, :, lo:lo + head_dim].astype(jnp.bfloat16)              # (BW,N,hd)
        k = qkv[:, :, C + lo:C + lo + head_dim].astype(jnp.bfloat16)
        v = qkv[:, :, 2 * C + lo:2 * C + lo + head_dim].astype(jnp.bfloat16)

        # scores: batched bf16 MXU matmul with f32 accumulation
        s = jnp.einsum('bqd,bkd->bqk', q, k,
                       preferred_element_type=jnp.float32)                # (BW,N,N)
        s = s + rpb_ref[h].astype(jnp.float32)        # resident rel-pos bias
        if use_mask:
            s = s + mask                              # shifted-window mask

        # numerically-stable softmax in f32; reciprocal on the EUP.
        m = jnp.max(s, axis=-1, keepdims=True)
        e = jnp.exp(s - m)
        p = e * pl.reciprocal(jnp.sum(e, axis=-1, keepdims=True), approx=True)

        outs.append(jnp.einsum('bqk,bkd->bqd', p.astype(jnp.bfloat16), v,
                               preferred_element_type=jnp.float32))       # (BW,N,hd)

    # Head merge, then a single (M, C) @ (C, C) projection matmul (K = C).
    merged = jnp.concatenate(outs, axis=-1).reshape(M, C).astype(jnp.bfloat16)
    out = jnp.dot(merged, wproj_ref[...], preferred_element_type=jnp.float32)
    out = out + bproj_ref[...]
    o_ref[...] = out.reshape(BW, N, C).astype(o_ref.dtype)


# ------------------------------ wrapper ---------------------------------------
def _choose_bw(B_, N, nW):
    """Windows per grid step: divisor of B_, mask-layout compatible, grid>=2."""
    cands = [bw for bw in range(1, B_ + 1)
             if B_ % bw == 0 and bw * N <= 2048
             and (nW is None or nW % bw == 0 or bw % nW == 0)]
    good = [bw for bw in cands if B_ // bw >= 2] or cands   # keep both v7x TCs busy
    big = [bw for bw in good if bw * N >= 256]               # M big enough for MXU
    return min(big) if big else max(good)


def window_attention_pallas(x, prep, mask=None):
    """x: (B_, N, C). mask: optional (nW, N, N) with B_ % nW == 0 and windows
    laid out b = outer*nW + w (same layout the PyTorch reference assumes)."""
    B_, N, C = x.shape
    H = prep["num_heads"]
    hd = C // H

    use_mask = mask is not None
    nW = mask.shape[0] if use_mask else None
    if use_mask:
        assert B_ % nW == 0, "window layout must be b = outer*nW + w"

    BW = _choose_bw(B_, N, nW)
    grid = (B_ // BW,)

    in_arrays = [x.astype(jnp.bfloat16), prep["wqkv"], prep["bqkv"], prep["rpb"]]
    in_specs = [
        pl.BlockSpec((BW, N, C), lambda g: (g, 0, 0)),          # x windows
        pl.BlockSpec((C, 3 * C), lambda g: (0, 0)),             # Wqkv (resident)
        pl.BlockSpec((1, 3 * C), lambda g: (0, 0)),             # bqkv (resident)
        pl.BlockSpec((H, N, N), lambda g: (0, 0, 0)),           # rpb  (resident)
    ]
    if use_mask:
        if BW % nW == 0 and BW > nW:
            # mask repeats inside a step -> pre-tile once, constant index map
            mask_a = jnp.tile(mask, (BW // nW, 1, 1)).astype(jnp.bfloat16)
            n_blk = 1
        else:
            assert nW % BW == 0
            mask_a = mask.astype(jnp.bfloat16)
            n_blk = nW // BW
        if n_blk == 1:
            mask_map = lambda g: (0, 0, 0)
        else:
            mask_map = lambda g: (g % n_blk, 0, 0)
        in_arrays.append(mask_a)
        in_specs.append(pl.BlockSpec((BW, N, N), mask_map))
    in_arrays += [prep["wproj"], prep["bproj"]]
    in_specs += [
        pl.BlockSpec((C, C), lambda g: (0, 0)),                 # Wproj (resident)
        pl.BlockSpec((1, C), lambda g: (0, 0)),                 # bproj (resident)
    ]

    kernel = functools.partial(_window_attn_kernel,
                               num_heads=H, head_dim=hd, use_mask=use_mask)

    return pl.pallas_call(
        kernel,
        out_shape=jax.ShapeDtypeStruct((B_, N, C), jnp.float32),
        grid=grid,
        in_specs=in_specs,
        out_specs=pl.BlockSpec((BW, N, C), lambda g: (g, 0, 0)),
        compiler_params=pltpu.CompilerParams(
            dimension_semantics=("parallel",),
            vmem_limit_bytes=48 * 1024 * 1024),    # fits v7x's 64 MiB physical VMEM
    )(*in_arrays)


# ------------------------------ parameters ------------------------------------
def make_relative_position_index(Wh, Ww):
    coords = jnp.stack(jnp.meshgrid(jnp.arange(Wh), jnp.arange(Ww),
                                    indexing="ij"))      # (2, Wh, Ww)
    flat = coords.reshape(2, -1)                         # (2, N)
    rel = flat[:, :, None] - flat[:, None, :]            # (2, N, N)
    rel = rel.transpose(1, 2, 0)
    rel = rel.at[:, :, 0].add(Wh - 1)
    rel = rel.at[:, :, 1].add(Ww - 1)
    rel = rel.at[:, :, 0].multiply(2 * Ww - 1)
    return rel.sum(-1)                                   # (N, N) int32


def init_params(key, dim, window_size, num_heads, qkv_bias=True):
    Wh, Ww = window_size
    k1, k2, k3, k4, k5 = jax.random.split(key, 5)
    return dict(
        num_heads=num_heads,
        window_size=window_size,
        rpb_table=0.02 * jax.random.normal(
            k1, ((2 * Wh - 1) * (2 * Ww - 1), num_heads), jnp.float32),
        rel_index=make_relative_position_index(Wh, Ww),
        # weights stored in (in, out) layout (== torch Linear weight.T)
        wqkv=jax.random.normal(k2, (dim, 3 * dim), jnp.float32) / jnp.sqrt(dim),
        bqkv=(0.02 * jax.random.normal(k3, (3 * dim,), jnp.float32)
              if qkv_bias else jnp.zeros((3 * dim,), jnp.float32)),
        wproj=jax.random.normal(k4, (dim, dim), jnp.float32) / jnp.sqrt(dim),
        bproj=0.02 * jax.random.normal(k5, (dim,), jnp.float32),
    )


def prepare_params(p):
    """One-time parameter prep: rel-pos-bias gather, scale folding, bf16 casts."""
    H = p["num_heads"]
    Wh, Ww = p["window_size"]
    N = Wh * Ww
    C = p["wqkv"].shape[0]
    hd = C // H
    scale = float(hd) ** -0.5

    # fold the attention scale into the q-columns of the qkv projection
    col_scale = jnp.concatenate([jnp.full((C,), scale, jnp.float32),
                                 jnp.ones((2 * C,), jnp.float32)])
    wqkv = (p["wqkv"] * col_scale[None, :]).astype(jnp.bfloat16)
    bqkv = (p["bqkv"] * col_scale).reshape(1, 3 * C).astype(jnp.float32)

    # one-time relative-position-bias gather (static index table)
    rpb = jnp.take(p["rpb_table"], p["rel_index"].reshape(-1), axis=0)
    rpb = rpb.reshape(N, N, H).transpose(2, 0, 1).astype(jnp.bfloat16)   # (H,N,N)

    return dict(num_heads=H, rpb=rpb, wqkv=wqkv, bqkv=bqkv,
                wproj=p["wproj"].astype(jnp.bfloat16),
                bproj=p["bproj"].reshape(1, C).astype(jnp.float32))


# --------------------------- pure-JAX reference --------------------------------
def window_attention_ref(x, p, mask=None):
    B_, N, C = x.shape
    H = p["num_heads"]
    hd = C // H
    scale = hd ** -0.5
    qkv = (x @ p["wqkv"] + p["bqkv"]).reshape(B_, N, 3, H, hd)
    qkv = qkv.transpose(2, 0, 3, 1, 4)                   # (3, B_, H, N, hd)
    q, k, v = qkv[0] * scale, qkv[1], qkv[2]
    attn = q @ jnp.swapaxes(k, -2, -1)                   # (B_, H, N, N)
    rpb = jnp.take(p["rpb_table"], p["rel_index"].reshape(-1), axis=0)
    rpb = rpb.reshape(N, N, H).transpose(2, 0, 1)
    attn = attn + rpb[None]
    if mask is not None:
        nW = mask.shape[0]
        attn = attn.reshape(B_ // nW, nW, H, N, N) + mask[None, :, None]
        attn = attn.reshape(B_, H, N, N)
    attn = jax.nn.softmax(attn, axis=-1)
    out = (attn @ v).transpose(0, 2, 1, 3).reshape(B_, N, C)
    return out @ p["wproj"] + p["bproj"]


# ---------------------------------- main ----------------------------------------
if __name__ == "__main__":
    dim, num_heads = 32, 4
    window_size = (8, 8)
    N = window_size[0] * window_size[1]                  # 64 tokens per window
    B_ = 4                                               # number of windows

    key = jax.random.PRNGKey(0)
    kx, kp = jax.random.split(key)
    x = jax.random.normal(kx, (B_, N, dim), jnp.float32)
    params = init_params(kp, dim, window_size, num_heads)
    prep = prepare_params(params)                        # one-time param prep

    # --- no-mask path (default forward) ---
    out = jax.block_until_ready(window_attention_pallas(x, prep))
    ref = jax.block_until_ready(window_attention_ref(x, params))
    assert out.shape == (B_, N, dim)
    err = float(jnp.max(jnp.abs(out - ref)))
    assert err < 5e-2, f"no-mask mismatch vs reference: {err}"

    # --- shifted-window mask path ---
    nW = 2
    group = jnp.repeat(jnp.arange(2), N // 2)
    blocked = jnp.where(group[:, None] == group[None, :], 0.0, -100.0)
    mask = jnp.stack([jnp.zeros((N, N), jnp.float32),
                      blocked.astype(jnp.float32)])      # (nW, N, N)
    out_m = jax.block_until_ready(window_attention_pallas(x, prep, mask=mask))
    ref_m = jax.block_until_ready(window_attention_ref(x, params, mask=mask))
    err_m = float(jnp.max(jnp.abs(out_m - ref_m)))
    assert err_m < 5e-2, f"masked mismatch vs reference: {err_m}"

    print("KERNEL_OK")
</pallas_src>

<mosaic_0001>
module attributes {stable_mosaic.version = 11 : i64} {
  func.func @_window_attn_kernel(%arg0: i32, %arg1: memref<2x64x32xbf16, #tpu.memory_space<vmem>>, %arg2: memref<32x96xbf16, #tpu.memory_space<vmem>>, %arg3: memref<1x96xf32, #tpu.memory_space<vmem>>, %arg4: memref<4x64x64xbf16, #tpu.memory_space<vmem>>, %arg5: memref<32x32xbf16, #tpu.memory_space<vmem>>, %arg6: memref<1x32xf32, #tpu.memory_space<vmem>>, %arg7: memref<2x64x32xf32, #tpu.memory_space<vmem>>) attributes {dimension_semantics = [#tpu.dimension_semantics<parallel>], iteration_bounds = array<i64: 2>, scalar_prefetch = 0 : i64, scratch_operands = 0 : i64, tpu.core_type = #tpu.core_type<tc>, window_params = [{transform_indices = @transform_0, window_bounds = array<i64: 2, 64, 32>}, {pipeline_mode = #tpu.pipeline_mode<synchronous>, transform_indices = @transform_1, window_bounds = array<i64: 32, 96>}, {pipeline_mode = #tpu.pipeline_mode<synchronous>, transform_indices = @transform_2, window_bounds = array<i64: 1, 96>}, {pipeline_mode = #tpu.pipeline_mode<synchronous>, transform_indices = @transform_3, window_bounds = array<i64: 4, 64, 64>}, {pipeline_mode = #tpu.pipeline_mode<synchronous>, transform_indices = @transform_4, window_bounds = array<i64: 32, 32>}, {pipeline_mode = #tpu.pipeline_mode<synchronous>, transform_indices = @transform_5, window_bounds = array<i64: 1, 32>}, {transform_indices = @transform_6, window_bounds = array<i64: 2, 64, 32>}]} {
    %c0 = arith.constant 0 : index
    %c0_0 = arith.constant 0 : index
    %c0_1 = arith.constant 0 : index
    %0 = vector.load %arg1[%c0, %c0_0, %c0_1] : memref<2x64x32xbf16, #tpu.memory_space<vmem>>, vector<2x64x32xbf16>
    %1 = vector.shape_cast %0 : vector<2x64x32xbf16> to vector<128x32xbf16>
    %c0_2 = arith.constant 0 : index
    %c0_3 = arith.constant 0 : index
    %2 = vector.load %arg2[%c0_2, %c0_3] : memref<32x96xbf16, #tpu.memory_space<vmem>>, vector<32x96xbf16>
    %cst = arith.constant dense<0.000000e+00> : vector<128x96xf32>
    %3 = tpu.matmul %1, %2, %cst {dimension_numbers = #tpu.dot_dimension_numbers<[1], [0], [0], [1], [0, 0, 1, 1], [], []>} : vector<128x32xbf16>, vector<32x96xbf16>, vector<128x96xf32> -> vector<128x96xf32>
    %c0_4 = arith.constant 0 : index
    %c0_5 = arith.constant 0 : index
    %4 = vector.load %arg3[%c0_4, %c0_5] : memref<1x96xf32, #tpu.memory_space<vmem>>, vector<1x96xf32>
    %5 = vector.broadcast %4 : vector<1x96xf32> to vector<128x96xf32>
    %6 = arith.addf %3, %5 : vector<128x96xf32>
    %7 = vector.shape_cast %6 : vector<128x96xf32> to vector<2x64x96xf32>
    %8 = vector.extract_strided_slice %7 {offsets = [0, 0, 0], sizes = [2, 64, 8], strides = [1, 1, 1]} : vector<2x64x96xf32> to vector<2x64x8xf32>
    %9 = arith.truncf %8 : vector<2x64x8xf32> to vector<2x64x8xbf16>
    %10 = vector.extract_strided_slice %7 {offsets = [0, 0, 32], sizes = [2, 64, 8], strides = [1, 1, 1]} : vector<2x64x96xf32> to vector<2x64x8xf32>
    %11 = arith.truncf %10 : vector<2x64x8xf32> to vector<2x64x8xbf16>
    %12 = vector.extract_strided_slice %7 {offsets = [0, 0, 64], sizes = [2, 64, 8], strides = [1, 1, 1]} : vector<2x64x96xf32> to vector<2x64x8xf32>
    %13 = arith.truncf %12 : vector<2x64x8xf32> to vector<2x64x8xbf16>
    "tpu.trace_start"() <{level = 10 : i32, message = "bqd,bkd->bqk"}> : () -> ()
    %cst_6 = arith.constant dense<0.000000e+00> : vector<2x64x64xf32>
    %14 = tpu.matmul %9, %11, %cst_6 {dimension_numbers = #tpu.dot_dimension_numbers<[2], [2], [1], [1], [0, 0, 0, 1, 1, 1], [0], [0]>} : vector<2x64x8xbf16>, vector<2x64x8xbf16>, vector<2x64x64xf32> -> vector<2x64x64xf32>
    "tpu.trace_stop"() : () -> ()
    %c0_7 = arith.constant 0 : index
    %c0_8 = arith.constant 0 : index
    %c0_9 = arith.constant 0 : index
    %15 = vector.load %arg4[%c0_7, %c0_8, %c0_9] : memref<4x64x64xbf16, #tpu.memory_space<vmem>>, vector<1x64x64xbf16>
    %16 = vector.shape_cast %15 : vector<1x64x64xbf16> to vector<64x64xbf16>
    %17 = arith.extf %16 : vector<64x64xbf16> to vector<64x64xf32>
    %18 = vector.shape_cast %17 : vector<64x64xf32> to vector<1x64x64xf32>
    %19 = vector.broadcast %18 : vector<1x64x64xf32> to vector<2x64x64xf32>
    %20 = arith.addf %14, %19 : vector<2x64x64xf32>
    %cst_10 = arith.constant dense<0xFF800000> : vector<2x64xf32>
    %21 = vector.multi_reduction <maximumf>, %20, %cst_10 [2] : vector<2x64x64xf32> to vector<2x64xf32>
    %22 = vector.shape_cast %21 : vector<2x64xf32> to vector<2x64x1xf32>
    %23 = vector.broadcast %22 : vector<2x64x1xf32> to vector<2x64x64xf32>
    %24 = arith.subf %20, %23 : vector<2x64x64xf32>
    %25 = math.exp %24 : vector<2x64x64xf32>
    %cst_11 = arith.constant dense<0.000000e+00> : vector<2x64xf32>
    %26 = vector.multi_reduction <add>, %25, %cst_11 [2] : vector<2x64x64xf32> to vector<2x64xf32>
    %27 = vector.shape_cast %26 : vector<2x64xf32> to vector<2x64x1xf32>
    %28 = tpu.reciprocal %27 {approx = true} : vector<2x64x1xf32> -> vector<2x64x1xf32>
    %29 = vector.broadcast %28 : vector<2x64x1xf32> to vector<2x64x64xf32>
    %30 = arith.mulf %25, %29 : vector<2x64x64xf32>
    %31 = arith.truncf %30 : vector<2x64x64xf32> to vector<2x64x64xbf16>
    "tpu.trace_start"() <{level = 10 : i32, message = "bqk,bkd->bqd"}> : () -> ()
    %cst_12 = arith.constant dense<0.000000e+00> : vector<2x64x8xf32>
    %32 = tpu.matmul %31, %13, %cst_12 {dimension_numbers = #tpu.dot_dimension_numbers<[2], [1], [1], [2], [0, 0, 0, 1, 1, 2], [0], [0]>} : vector<2x64x64xbf16>, vector<2x64x8xbf16>, vector<2x64x8xf32> -> vector<2x64x8xf32>
    "tpu.trace_stop"() : () -> ()
    %33 = vector.extract_strided_slice %7 {offsets = [0, 0, 8], sizes = [2, 64, 8], strides = [1, 1, 1]} : vector<2x64x96xf32> to vector<2x64x8xf32>
    %34 = arith.truncf %33 : vector<2x64x8xf32> to vector<2x64x8xbf16>
    %35 = vector.extract_strided_slice %7 {offsets = [0, 0, 40], sizes = [2, 64, 8], strides = [1, 1, 1]} : vector<2x64x96xf32> to vector<2x64x8xf32>
    %36 = arith.truncf %35 : vector<2x64x8xf32> to vector<2x64x8xbf16>
    %37 = vector.extract_strided_slice %7 {offsets = [0, 0, 72], sizes = [2, 64, 8], strides = [1, 1, 1]} : vector<2x64x96xf32> to vector<2x64x8xf32>
    %38 = arith.truncf %37 : vector<2x64x8xf32> to vector<2x64x8xbf16>
    "tpu.trace_start"() <{level = 10 : i32, message = "bqd,bkd->bqk"}> : () -> ()
    %cst_13 = arith.constant dense<0.000000e+00> : vector<2x64x64xf32>
    %39 = tpu.matmul %34, %36, %cst_13 {dimension_numbers = #tpu.dot_dimension_numbers<[2], [2], [1], [1], [0, 0, 0, 1, 1, 1], [0], [0]>} : vector<2x64x8xbf16>, vector<2x64x8xbf16>, vector<2x64x64xf32> -> vector<2x64x64xf32>
    "tpu.trace_stop"() : () -> ()
    %c1 = arith.constant 1 : index
    %c0_14 = arith.constant 0 : index
    %c0_15 = arith.constant 0 : index
    %40 = vector.load %arg4[%c1, %c0_14, %c0_15] : memref<4x64x64xbf16, #tpu.memory_space<vmem>>, vector<1x64x64xbf16>
    %41 = vector.shape_cast %40 : vector<1x64x64xbf16> to vector<64x64xbf16>
    %42 = arith.extf %41 : vector<64x64xbf16> to vector<64x64xf32>
    %43 = vector.shape_cast %42 : vector<64x64xf32> to vector<1x64x64xf32>
    %44 = vector.broadcast %43 : vector<1x64x64xf32> to vector<2x64x64xf32>
    %45 = arith.addf %39, %44 : vector<2x64x64xf32>
    %cst_16 = arith.constant dense<0xFF800000> : vector<2x64xf32>
    %46 = vector.multi_reduction <maximumf>, %45, %cst_16 [2] : vector<2x64x64xf32> to vector<2x64xf32>
    %47 = vector.shape_cast %46 : vector<2x64xf32> to vector<2x64x1xf32>
    %48 = vector.broadcast %47 : vector<2x64x1xf32> to vector<2x64x64xf32>
    %49 = arith.subf %45, %48 : vector<2x64x64xf32>
    %50 = math.exp %49 : vector<2x64x64xf32>
    %cst_17 = arith.constant dense<0.000000e+00> : vector<2x64xf32>
    %51 = vector.multi_reduction <add>, %50, %cst_17 [2] : vector<2x64x64xf32> to vector<2x64xf32>
    %52 = vector.shape_cast %51 : vector<2x64xf32> to vector<2x64x1xf32>
    %53 = tpu.reciprocal %52 {approx = true} : vector<2x64x1xf32> -> vector<2x64x1xf32>
    %54 = vector.broadcast %53 : vector<2x64x1xf32> to vector<2x64x64xf32>
    %55 = arith.mulf %50, %54 : vector<2x64x64xf32>
    %56 = arith.truncf %55 : vector<2x64x64xf32> to vector<2x64x64xbf16>
    "tpu.trace_start"() <{level = 10 : i32, message = "bqk,bkd->bqd"}> : () -> ()
    %cst_18 = arith.constant dense<0.000000e+00> : vector<2x64x8xf32>
    %57 = tpu.matmul %56, %38, %cst_18 {dimension_numbers = #tpu.dot_dimension_numbers<[2], [1], [1], [2], [0, 0, 0, 1, 1, 2], [0], [0]>} : vector<2x64x64xbf16>, vector<2x64x8xbf16>, vector<2x64x8xf32> -> vector<2x64x8xf32>
    "tpu.trace_stop"() : () -> ()
    %58 = vector.extract_strided_slice %7 {offsets = [0, 0, 16], sizes = [2, 64, 8], strides = [1, 1, 1]} : vector<2x64x96xf32> to vector<2x64x8xf32>
    %59 = arith.truncf %58 : vector<2x64x8xf32> to vector<2x64x8xbf16>
    %60 = vector.extract_strided_slice %7 {offsets = [0, 0, 48], sizes = [2, 64, 8], strides = [1, 1, 1]} : vector<2x64x96xf32> to vector<2x64x8xf32>
    %61 = arith.truncf %60 : vector<2x64x8xf32> to vector<2x64x8xbf16>
    %62 = vector.extract_strided_slice %7 {offsets = [0, 0, 80], sizes = [2, 64, 8], strides = [1, 1, 1]} : vector<2x64x96xf32> to vector<2x64x8xf32>
    %63 = arith.truncf %62 : vector<2x64x8xf32> to vector<2x64x8xbf16>
    "tpu.trace_start"() <{level = 10 : i32, message = "bqd,bkd->bqk"}> : () -> ()
    %cst_19 = arith.constant dense<0.000000e+00> : vector<2x64x64xf32>
    %64 = tpu.matmul %59, %61, %cst_19 {dimension_numbers = #tpu.dot_dimension_numbers<[2], [2], [1], [1], [0, 0, 0, 1, 1, 1], [0], [0]>} : vector<2x64x8xbf16>, vector<2x64x8xbf16>, vector<2x64x64xf32> -> vector<2x64x64xf32>
    "tpu.trace_stop"() : () -> ()
    %c2 = arith.constant 2 : index
    %c0_20 = arith.constant 0 : index
    %c0_21 = arith.constant 0 : index
    %65 = vector.load %arg4[%c2, %c0_20, %c0_21] : memref<4x64x64xbf16, #tpu.memory_space<vmem>>, vector<1x64x64xbf16>
    %66 = vector.shape_cast %65 : vector<1x64x64xbf16> to vector<64x64xbf16>
    %67 = arith.extf %66 : vector<64x64xbf16> to vector<64x64xf32>
    %68 = vector.shape_cast %67 : vector<64x64xf32> to vector<1x64x64xf32>
    %69 = vector.broadcast %68 : vector<1x64x64xf32> to vector<2x64x64xf32>
    %70 = arith.addf %64, %69 : vector<2x64x64xf32>
    %cst_22 = arith.constant dense<0xFF800000> : vector<2x64xf32>
    %71 = vector.multi_reduction <maximumf>, %70, %cst_22 [2] : vector<2x64x64xf32> to vector<2x64xf32>
    %72 = vector.shape_cast %71 : vector<2x64xf32> to vector<2x64x1xf32>
    %73 = vector.broadcast %72 : vector<2x64x1xf32> to vector<2x64x64xf32>
    %74 = arith.subf %70, %73 : vector<2x64x64xf32>
    %75 = math.exp %74 : vector<2x64x64xf32>
    %cst_23 = arith.constant dense<0.000000e+00> : vector<2x64xf32>
    %76 = vector.multi_reduction <add>, %75, %cst_23 [2] : vector<2x64x64xf32> to vector<2x64xf32>
    %77 = vector.shape_cast %76 : vector<2x64xf32> to vector<2x64x1xf32>
    %78 = tpu.reciprocal %77 {approx = true} : vector<2x64x1xf32> -> vector<2x64x1xf32>
    %79 = vector.broadcast %78 : vector<2x64x1xf32> to vector<2x64x64xf32>
    %80 = arith.mulf %75, %79 : vector<2x64x64xf32>
    %81 = arith.truncf %80 : vector<2x64x64xf32> to vector<2x64x64xbf16>
    "tpu.trace_start"() <{level = 10 : i32, message = "bqk,bkd->bqd"}> : () -> ()
    %cst_24 = arith.constant dense<0.000000e+00> : vector<2x64x8xf32>
    %82 = tpu.matmul %81, %63, %cst_24 {dimension_numbers = #tpu.dot_dimension_numbers<[2], [1], [1], [2], [0, 0, 0, 1, 1, 2], [0], [0]>} : vector<2x64x64xbf16>, vector<2x64x8xbf16>, vector<2x64x8xf32> -> vector<2x64x8xf32>
    "tpu.trace_stop"() : () -> ()
    %83 = vector.extract_strided_slice %7 {offsets = [0, 0, 24], sizes = [2, 64, 8], strides = [1, 1, 1]} : vector<2x64x96xf32> to vector<2x64x8xf32>
    %84 = arith.truncf %83 : vector<2x64x8xf32> to vector<2x64x8xbf16>
    %85 = vector.extract_strided_slice %7 {offsets = [0, 0, 56], sizes = [2, 64, 8], strides = [1, 1, 1]} : vector<2x64x96xf32> to vector<2x64x8xf32>
    %86 = arith.truncf %85 : vector<2x64x8xf32> to vector<2x64x8xbf16>
    %87 = vector.extract_strided_slice %7 {offsets = [0, 0, 88], sizes = [2, 64, 8], strides = [1, 1, 1]} : vector<2x64x96xf32> to vector<2x64x8xf32>
    %88 = arith.truncf %87 : vector<2x64x8xf32> to vector<2x64x8xbf16>
    "tpu.trace_start"() <{level = 10 : i32, message = "bqd,bkd->bqk"}> : () -> ()
    %cst_25 = arith.constant dense<0.000000e+00> : vector<2x64x64xf32>
    %89 = tpu.matmul %84, %86, %cst_25 {dimension_numbers = #tpu.dot_dimension_numbers<[2], [2], [1], [1], [0, 0, 0, 1, 1, 1], [0], [0]>} : vector<2x64x8xbf16>, vector<2x64x8xbf16>, vector<2x64x64xf32> -> vector<2x64x64xf32>
    "tpu.trace_stop"() : () -> ()
    %c3 = arith.constant 3 : index
    %c0_26 = arith.constant 0 : index
    %c0_27 = arith.constant 0 : index
    %90 = vector.load %arg4[%c3, %c0_26, %c0_27] : memref<4x64x64xbf16, #tpu.memory_space<vmem>>, vector<1x64x64xbf16>
    %91 = vector.shape_cast %90 : vector<1x64x64xbf16> to vector<64x64xbf16>
    %92 = arith.extf %91 : vector<64x64xbf16> to vector<64x64xf32>
    %93 = vector.shape_cast %92 : vector<64x64xf32> to vector<1x64x64xf32>
    %94 = vector.broadcast %93 : vector<1x64x64xf32> to vector<2x64x64xf32>
    %95 = arith.addf %89, %94 : vector<2x64x64xf32>
    %cst_28 = arith.constant dense<0xFF800000> : vector<2x64xf32>
    %96 = vector.multi_reduction <maximumf>, %95, %cst_28 [2] : vector<2x64x64xf32> to vector<2x64xf32>
    %97 = vector.shape_cast %96 : vector<2x64xf32> to vector<2x64x1xf32>
    %98 = vector.broadcast %97 : vector<2x64x1xf32> to vector<2x64x64xf32>
    %99 = arith.subf %95, %98 : vector<2x64x64xf32>
    %100 = math.exp %99 : vector<2x64x64xf32>
    %cst_29 = arith.constant dense<0.000000e+00> : vector<2x64xf32>
    %101 = vector.multi_reduction <add>, %100, %cst_29 [2] : vector<2x64x64xf32> to vector<2x64xf32>
    %102 = vector.shape_cast %101 : vector<2x64xf32> to vector<2x64x1xf32>
    %103 = tpu.reciprocal %102 {approx = true} : vector<2x64x1xf32> -> vector<2x64x1xf32>
    %104 = vector.broadcast %103 : vector<2x64x1xf32> to vector<2x64x64xf32>
    %105 = arith.mulf %100, %104 : vector<2x64x64xf32>
    %106 = arith.truncf %105 : vector<2x64x64xf32> to vector<2x64x64xbf16>
    "tpu.trace_start"() <{level = 10 : i32, message = "bqk,bkd->bqd"}> : () -> ()
    %cst_30 = arith.constant dense<0.000000e+00> : vector<2x64x8xf32>
    %107 = tpu.matmul %106, %88, %cst_30 {dimension_numbers = #tpu.dot_dimension_numbers<[2], [1], [1], [2], [0, 0, 0, 1, 1, 2], [0], [0]>} : vector<2x64x64xbf16>, vector<2x64x8xbf16>, vector<2x64x8xf32> -> vector<2x64x8xf32>
    "tpu.trace_stop"() : () -> ()
    %108 = tpu.concatenate %32, %57, %82, %107 in 2 : vector<2x64x8xf32>, vector<2x64x8xf32>, vector<2x64x8xf32>, vector<2x64x8xf32> -> vector<2x64x32xf32>
    %109 = vector.shape_cast %108 : vector<2x64x32xf32> to vector<128x32xf32>
    %110 = arith.truncf %109 : vector<128x32xf32> to vector<128x32xbf16>
    %c0_31 = arith.constant 0 : index
    %c0_32 = arith.constant 0 : index
    %111 = vector.load %arg5[%c0_31, %c0_32] : memref<32x32xbf16, #tpu.memory_space<vmem>>, vector<32x32xbf16>
    %cst_33 = arith.constant dense<0.000000e+00> : vector<128x32xf32>
    %112 = tpu.matmul %110, %111, %cst_33 {dimension_numbers = #tpu.dot_dimension_numbers<[1], [0], [0], [1], [0, 0, 1, 1], [], []>} : vector<128x32xbf16>, vector<32x32xbf16>, vector<128x32xf32> -> vector<128x32xf32>
    %c0_34 = arith.constant 0 : index
    %c0_35 = arith.constant 0 : index
    %113 = vector.load %arg6[%c0_34, %c0_35] : memref<1x32xf32, #tpu.memory_space<vmem>>, vector<1x32xf32>
    %114 = vector.broadcast %113 : vector<1x32xf32> to vector<128x32xf32>
    %115 = arith.addf %112, %114 : vector<128x32xf32>
    %116 = vector.shape_cast %115 : vector<128x32xf32> to vector<2x64x32xf32>
    %c0_36 = arith.constant 0 : index
    %c0_37 = arith.constant 0 : index
    %c0_38 = arith.constant 0 : index
    %117 = vector.load %arg7[%c0_36, %c0_37, %c0_38] : memref<2x64x32xf32, #tpu.memory_space<vmem>>, vector<2x64x32xf32>
    tpu.vector_store %arg7[%c0_36, %c0_37, %c0_38], %116 {strides = array<i32>} : memref<2x64x32xf32, #tpu.memory_space<vmem>>, vector<2x64x32xf32>,
    return
  }
  func.func @transform_0(%arg0: i32) -> (i32, i32, i32) {
    %c0_i32 = arith.constant 0 : i32
    %c0_i32_0 = arith.constant 0 : i32
    %c0_i32_1 = arith.constant 0 : i32
    return %arg0, %c0_i32, %c0_i32_0 : i32, i32, i32
  }
  func.func @transform_1(%arg0: i32) -> (i32, i32) {
    %c0_i32 = arith.constant 0 : i32
    %c0_i32_0 = arith.constant 0 : i32
    %c0_i32_1 = arith.constant 0 : i32
    return %c0_i32, %c0_i32_0 : i32, i32
  }
  func.func @transform_2(%arg0: i32) -> (i32, i32) {
    %c0_i32 = arith.constant 0 : i32
    %c0_i32_0 = arith.constant 0 : i32
    %c0_i32_1 = arith.constant 0 : i32
    return %c0_i32, %c0_i32_0 : i32, i32
  }
  func.func @transform_3(%arg0: i32) -> (i32, i32, i32) {
    %c0_i32 = arith.constant 0 : i32
    %c0_i32_0 = arith.constant 0 : i32
    %c0_i32_1 = arith.constant 0 : i32
    %c0_i32_2 = arith.constant 0 : i32
    return %c0_i32, %c0_i32_0, %c0_i32_1 : i32, i32, i32
  }
  func.func @transform_4(%arg0: i32) -> (i32, i32) {
    %c0_i32 = arith.constant 0 : i32
    %c0_i32_0 = arith.constant 0 : i32
    %c0_i32_1 = arith.constant 0 : i32
    return %c0_i32, %c0_i32_0 : i32, i32
  }
  func.func @transform_5(%arg0: i32) -> (i32, i32) {
    %c0_i32 = arith.constant 0 : i32
    %c0_i32_0 = arith.constant 0 : i32
    %c0_i32_1 = arith.constant 0 : i32
    return %c0_i32, %c0_i32_0 : i32, i32
  }
  func.func @transform_6(%arg0: i32) -> (i32, i32, i32) {
    %c0_i32 = arith.constant 0 : i32
    %c0_i32_0 = arith.constant 0 : i32
    %c0_i32_1 = arith.constant 0 : i32
    return %arg0, %c0_i32, %c0_i32_0 : i32, i32, i32
  }
}

</mosaic_0001>

<bundles_post_ra>
// kernel: tpu_custom_call.1
= control target key start
LH: loop header
LB: loop body
LE: loop exit
PB: predicated region body
PF: predicated region fallthrough
CT: control target
= control target key end

     0   :  { %s4442_s21 = smov 0   ;;  %s5884_s0 = inlined_call_operand.vmem [shape: bf16[4,64,32], index: 0, kind: input, shape index: {}]   ;;  %s5885_s1 = inlined_call_operand.vmem [shape: bf16[32,96], index: 1, kind: input, shape index: {}]   ;;  %s5886_s2 = inlined_call_operand.vmem [shape: f32[1,96], index: 2, kind: input, shape index: {}]   ;;  %s5887_s3 = inlined_call_operand.vmem [shape: bf16[4,64,64], index: 3, kind: input, shape index: {}]   ;;  %s5888_s4 = inlined_call_operand.vmem [shape: bf16[32,32], index: 4, kind: input, shape index: {}]   ;;  %s5889_s5 = inlined_call_operand.vmem [shape: f32[1,32], index: 5, kind: input, shape index: {}]   ;;  %s5890_s6 = inlined_call_operand.vmem [shape: f32[4,64,32], index: 6, kind: output, shape index: {}]  }
   0x1 LB: > { %s3287_s22 = sadd.s32 4294967295, %s4391_s21   ;;  %p3291_p0 = scmp.ge.s32.totalorder %s4391_s21, 1  ;;  %s4391_s21 = sphi %s4442_s21, %s16_s21  }
   0x2   : > { %p214_p1 = scmp.lt.s32.totalorder %s4391_s21, 3 }
   0x4   : > { %p215_p2 = pnand %p3291_p0, %p214_p1 }
   0x6   : > { %218 = sbr.rel (%p215_p2) target bundleno = 3834 (0xefa), region = 44 }
   0xd   : > { %v4117_v0 = vld [vmem:[%s5885_s1] sm:$0xff]   ;;  %s3292_s25 = sshll.u32 %s3287_s22, 1  ;;  %v4118_v1 = vld [vmem:[%s5885_s1 + $0x8] sm:$0xff]   ;;  %vm340_vm0 = vcmask 261120   ;;  %vm498_vm1 = vcmask 64512   ;;  %s4393_s10 = smov 96  }
   0xe   : > { %p247_p3 = scmp.lt.s32.totalorder %s3292_s25, 3  ;;  %3647 = vmatprep.subr.bf16.mxu0 %v4117_v0  ;;  %v3298_v11 = vld [vmem:[%s5886_s2] ss:$0 sm:$0xff]  ;;  %s4394_s11 = smov 64   ;;  %vm689_vm2 = vcmask 523264   ;;  %vm3027_vm3 = vcmask 130048  }
   0xf   : > { %3648 = vmatpush3.bf16.msra.mxu0 %v4117_v0  ;;  %s4395_s12 = smov 88   ;;  %s4396_s22 = smov 120   ;;  %vm3044_vm4 = vcmask 195584  }
  0x10   : > { %s5980_s25 = smov (!%p247_p3, %s3292_s25), 3  ;;  %3649 = vmatprep.subr.bf16.mxu0 %v4118_v1  ;;  %s4397_s8 = smov 56  }
  0x11   : > { %s3418_s28 = sshll.u32 %s5980_s25, 5  ;;  %s4398_s9 = smov 80  }
  0x12   : > { %s251_s7 = scalar_lea.vmem %s5884_s0, %s3418_s28  ;;  %s4400_s19 = smov 48  }
  0x13   : > { %3650 = vmatpush3.bf16.msra.mxu0 %v4118_v1  ;;  %v4119_v2 = vld [vmem:[%s251_s7] sm:$0xff]   ;;  %v4120_v3 = vld [vmem:[%s251_s7 + $0x8] sm:$0xff]   ;;  %v4121_v4 = vld [vmem:[%s251_s7 + $0x10] sm:$0xff]   ;;  %s4401_s20 = smov 72   ;;  %s4406_s15 = smov 24  }
  0x14   : > { %3651 = vmatprep.mubr.msk.bf16.mxu0 %vm340_vm0, %v4119_v2  ;;  %v4122_v5 = vld [vmem:[%s251_s7 + $0x18] sm:$0xff]   ;;  %v4123_v6 = vld [vmem:[%s251_s7 + $0x20] sm:$0xff]   ;;  %v4124_v7 = vld [vmem:[%s251_s7 + $0x28] sm:$0xff]   ;;  %s3419_s16 = sshll.u32 %s5980_s25, 6 }
  0x15   : > { %v4125_v8 = vld [vmem:[%s251_s7 + $0x30] sm:$0xff]   ;;  %v4126_v9 = vld [vmem:[%s251_s7 + $0x38] sm:$0xff]  }
  0x16   : > { %3652 = vmatmul.mubr.msk.bf16.vlgmr.msra.gmra.mrb[0].mxu0 %vm340_vm0, %v4120_v3 }
  0x17   : > { %3655 = vmatprep.mubr.msk.bf16.mxu0 %vm340_vm0, %v4121_v4 }
  0x1e   : > { %3656 = vmatmul.mubr.msk.bf16.gmra.mrb[4].mxu0 %vm340_vm0, %v4122_v5 }
  0x1f   : > { %3659 = vmatprep.mubr.msk.bf16.mxu0 %vm340_vm0, %v4123_v6 }
  0x26   : > { %3660 = vmatmul.mubr.msk.bf16.gmra.mrb[8].mxu0 %vm340_vm0, %v4124_v7 }
  0x27   : > { %3663 = vmatprep.mubr.msk.bf16.mxu0 %vm340_vm0, %v4125_v8 }
  0x2e   : > { %3664 = vmatmul.mubr.msk.bf16.gmra.mrb[12].mxu0 %vm340_vm0, %v4126_v9 }
  0xe9   : > { %v3653_v10 = vpop.f32.mrb[0].mxu0 }
  0xea   : > { %v399_v12 = vpop.f32.mrb[1].mxu0  ;;  %v408_v14 = vadd.f32 %v3653_v10, %v3298_v11 }
  0xeb   : > { %v3654_v13 = vpop.f32.mrb[2].mxu0  ;;  %v400_v17 = vadd.f32 %v3298_v11, %v399_v12 }
  0xec   : > { %v411_v15 = vadd.f32 %v3654_v13, %v3298_v11  ;;  %v402_v16 = vpop.f32.mrb[3].mxu0 }
  0xed   : > { %v403_v18 = vadd.f32 %v3298_v11, %v402_v16  ;;  %v3484_v16 = vld [vmem:[%s5887_s3 + $0x8] sm:$0xff]  }
  0xee   : > { %v4473_v19 = vpack.c.bf16 %v411_v15, %v408_v14 }
  0xef   : > { %v4475_v20 = vpack.c.bf16 %v403_v18, %v400_v17  ;;  %v3421_v17 = vld [vmem:[%s5887_s3] sm:$0xff]   ;;  %v3426_v18 = vunpack.c.l.bf16 %v3484_v16 }
  0xf1   : > { %490 = vrot.lane.b32.xlu0 %v4475_v20, %s4393_s10  ;;  %3675 = vmatprep.mubr.msk.bf16.mxu1 %vm498_vm1, %v4475_v20  ;;  %v3657_v21 = vpop.f32.mrb[4].mxu0 }
  0xf2   : > { %v424_v22 = vadd.f32 %v3657_v21, %v3298_v11  ;;  %v415_v23 = vpop.f32.mrb[5].mxu0  ;;  %v3422_v21 = vunpack.c.l.bf16 %v3421_v17 }
  0xf3   : > { %v416_v24 = vadd.f32 %v3298_v11, %v415_v23  ;;  %v3658_v25 = vpop.f32.mrb[6].mxu0  ;;  %v3423_v23 = vunpack.c.h.bf16 %v3421_v17 }
  0xf4   : > { %v427_v26 = vadd.f32 %v3658_v25, %v3298_v11  ;;  %v418_v27 = vpop.f32.mrb[7].mxu0 }
  0xf5   : > { %492 = vrot.lane.b32.xlu0 %v4473_v19, %s4393_s10  ;;  %v419_v28 = vadd.f32 %v3298_v11, %v418_v27  ;;  %v3486_v27 = vld [vmem:[%s5887_s3 + $0x18] sm:$0xff]  }
  0xf6   : > { %v4483_v29 = vpack.c.bf16 %v427_v26, %v424_v22 }
  0xf7   : > { %v4485_v30 = vpack.c.bf16 %v419_v28, %v416_v24 }
  0xf9   : > { %v3661_v31 = vpop.f32.mrb[8].mxu0  ;;  %494 = vrot.lane.b32.xlu1 %v4485_v30, %s4393_s10  ;;  %496 = vrot.lane.b32.xlu0 %v4483_v29, %s4393_s10 }
  0xfa   : > { %v440_v32 = vadd.f32 %v3661_v31, %v3298_v11  ;;  %v431_v33 = vpop.f32.mrb[9].mxu0  ;;  %v3427_v31 = vunpack.c.h.bf16 %v3484_v16 }
  0xfb   : > { %v432_v34 = vadd.f32 %v3298_v11, %v431_v33  ;;  %v3662_v35 = vpop.f32.mrb[10].mxu0 }
  0xfc   : > { %v443_v36 = vadd.f32 %v3662_v35, %v3298_v11  ;;  %v434_v37 = vpop.f32.mrb[11].mxu0  ;;  %v3485_v35 = vld [vmem:[%s5887_s3 + $0x10] sm:$0xff]  }
  0xfd   : > { %v435_v38 = vadd.f32 %v3298_v11, %v434_v37 }
  0xfe   : > { %v4491_v39 = vpack.c.bf16 %v443_v36, %v440_v32  ;;  %v3434_v36 = vunpack.c.l.bf16 %v3486_v27 }
  0xff   : > { %v4493_v40 = vpack.c.bf16 %v435_v38, %v432_v34 }
 0x101   : > { %v3665_v41 = vpop.f32.mrb[12].mxu0  ;;  %592 = vrot.lane.b32.xlu1 %v4493_v40, %s4393_s10  ;;  %3691 = vmatprep.mubr.msk.bf16.mxu0 %vm498_vm1, %v4493_v40 }
 0x102   : > { %v456_v42 = vadd.f32 %v3665_v41, %v3298_v11  ;;  %v447_v43 = vpop.f32.mrb[13].mxu0 }
 0x103   : > { %v448_v44 = vadd.f32 %v3298_v11, %v447_v43  ;;  %v3666_v45 = vpop.f32.mrb[14].mxu0  ;;  %v3435_v43 = vunpack.c.h.bf16 %v3486_v27 }
 0x104   : > { %v459_v46 = vadd.f32 %v3666_v45, %v3298_v11  ;;  %v450_v47 = vpop.f32.mrb[15].mxu0 }
 0x105   : > { %v451_v48 = vadd.f32 %v3298_v11, %v450_v47  ;;  %594 = vrot.lane.b32.xlu1 %v4491_v39, %s4393_s10 }
 0x106   : > { %v4501_v49 = vpack.c.bf16 %v459_v46, %v456_v42  ;;  %v3430_v42 = vunpack.c.l.bf16 %v3485_v35 }
 0x107   : > { %v4503_v50 = vpack.c.bf16 %v451_v48, %v448_v44  ;;  %v3431_v48 = vunpack.c.h.bf16 %v3485_v35 }
 0x109   : > { %598 = vrot.lane.b32.xlu1 %v4501_v49, %s4393_s10  ;;  %596 = vrot.lane.b32.xlu0 %v4503_v50, %s4393_s10  ;;  %s4399_s10 = smov 112  }
 0x10d   : > { %874 = vrot.lane.b32.xlu1 %v4475_v20, %s4394_s11  ;;  %876 = vrot.lane.b32.xlu0 %v4473_v19, %s4394_s11 }
 0x111   : > { %878 = vrot.lane.b32.xlu1 %v4485_v30, %s4394_s11  ;;  %963 = vrot.lane.b32.xlu0 %v4493_v40, %s4394_s11 }
 0x115   : > { %880 = vrot.lane.b32.xlu1 %v4483_v29, %s4394_s11 }
 0x119   : > { %965 = vrot.lane.b32.xlu1 %v4491_v39, %s4394_s11 }
 0x11d   : > { %1077 = vrot.lane.b32.xlu1 %v4475_v20, %s4395_s12 }
 0x121   : > { %969 = vrot.lane.b32.xlu1 %v4501_v49, %s4394_s11 }
 0x125   : > { %1079 = vrot.lane.b32.xlu1 %v4473_v19, %s4395_s12 }
 0x129   : > { %1081 = vrot.lane.b32.xlu1 %v4485_v30, %s4395_s12 }
 0x12d   : > { %967 = vrot.lane.b32.xlu1 %v4503_v50, %s4394_s11 }
 0x163   : > { %v491_v51 = vpop.permute.xlu0 %490 }
 0x164   : > { %3943 = vmatprep.subr.msk.bf16.mxu1 %vm498_vm1, %v491_v51  ;;  %v512_v52 = vsel %vm498_vm1, %v491_v51, 0 }
 0x165   : > { %3668 = vmatpush3.bf16.xpose.msra.mxu1 %v512_v52 }
 0x167   : > { %v493_v53 = vpop.permute.xlu0 %492 }
 0x168   : > { %3944 = vmatprep.subr.msk.bf16.mxu1 %vm498_vm1, %v493_v53  ;;  %v515_v55 = vsel %vm498_vm1, %v493_v53, 0 }
 0x16b   : > { %v495_v54 = vpop.permute.xlu1 %494  ;;  %v497_v59 = vpop.permute.xlu0 %496 }
 0x16c   : > { %v518_v57 = vsel %vm498_vm1, %v495_v54, 0  ;;  %v521_v63 = vsel %vm498_vm1, %v497_v59, 0 }
 0x16d   : > { %3670 = vmatpush3.bf16.xpose.msra.mxu1 %v515_v55 }
 0x16e   : > { %3945 = vmatprep.subr.msk.bf16.mxu1 %vm498_vm1, %v495_v54 }
 0x173   : > { %v593_v56 = vpop.permute.xlu1 %592 }
 0x174   : > { %3947 = vmatprep.subr.msk.bf16.mxu0 %vm498_vm1, %v593_v56  ;;  %v613_v58 = vsel %vm498_vm1, %v593_v56, 0 }
 0x175   : > { %3672 = vmatpush3.bf16.xpose.msra.mxu1 %v518_v57  ;;  %3684 = vmatpush3.bf16.xpose.msra.mxu0 %v613_v58 }
 0x176   : > { %3946 = vmatprep.subr.msk.bf16.mxu1 %vm498_vm1, %v497_v59 }
 0x177   : > { %v595_v60 = vpop.permute.xlu1 %594 }
 0x178   : > { %3948 = vmatprep.subr.msk.bf16.mxu0 %vm498_vm1, %v595_v60  ;;  %v616_v61 = vsel %vm498_vm1, %v595_v60, 0 }
 0x17b   : > { %v599_v62 = vpop.permute.xlu1 %598  ;;  %v597_v0 = vpop.permute.xlu0 %596 }
 0x17c   : > { %v619_v2 = vsel %vm498_vm1, %v597_v0, 0  ;;  %v622_v5 = vsel %vm498_vm1, %v599_v62, 0 }
 0x17d   : > { %3674 = vmatpush3.bf16.xpose.msra.mxu1 %v521_v63  ;;  %3686 = vmatpush3.bf16.xpose.msra.mxu0 %v616_v61 }
 0x17e   : > { %3949 = vmatprep.subr.msk.bf16.mxu0 %vm498_vm1, %v597_v0 }
 0x17f   : > { %v875_v1 = vpop.permute.xlu1 %874  ;;  %v877_v10 = vpop.permute.xlu0 %876 }
 0x183   : > { %v879_v3 = vpop.permute.xlu1 %878  ;;  %v4561_v15 = vpop.permute.xlu0 %963 }
 0x184   : > { %3676 = vmatmul.mubr.msk.bf16.vlgmr.msra.gmra.mrb[0].mxu1 %vm498_vm1, %v4473_v19 }
 0x185   : > { %3679 = vmatprep.mubr.msk.bf16.mxu1 %vm498_vm1, %v4485_v30  ;;  %3688 = vmatpush3.bf16.xpose.msra.mxu0 %v619_v2 }
 0x186   : > { %3950 = vmatprep.subr.msk.bf16.mxu0 %vm498_vm1, %v599_v62 }
 0x187   : > { %v881_v4 = vpop.permute.xlu1 %880 }
 0x18b   : > { %v4543_v6 = vpop.permute.xlu1 %965 }
 0x18c   : > { %3680 = vmatmul.mubr.msk.bf16.gmra.mrb[4].mxu1 %vm498_vm1, %v4483_v29 }
 0x18d   : > { %3690 = vmatpush3.bf16.xpose.msra.mxu0 %v622_v5 }
 0x18e   : > { %3699 = vmatprep.subr.bf16.mxu0 %v875_v1 }
 0x18f   : > { %v1078_v7 = vpop.permute.xlu1 %1077 }
 0x190   : > { %3951 = vmatprep.subr.msk.bf16.mxu1 %vm498_vm1, %v1078_v7  ;;  %v1098_v8 = vsel %vm498_vm1, %v1078_v7, 0 }
 0x191   : > { %3732 = vmatpush3.bf16.xpose.msra.mxu1 %v1098_v8 }
 0x193   : > { %v4549_v9 = vpop.permute.xlu1 %969 }
 0x194   : > { %3692 = vmatmul.mubr.msk.bf16.vlgmr.msra.gmra.mrb[16].mxu0 %vm498_vm1, %v4491_v39 }
 0x195   : > { %3695 = vmatprep.mubr.msk.bf16.mxu0 %vm498_vm1, %v4503_v50  ;;  %3700 = vmatpush3.bf16.msra.mxu0 %v875_v1 }
 0x196   : > { %3701 = vmatprep.subr.bf16.mxu0 %v877_v10 }
 0x197   : > { %v1080_v11 = vpop.permute.xlu1 %1079 }
 0x198   : > { %3952 = vmatprep.subr.msk.bf16.mxu1 %vm498_vm1, %v1080_v11  ;;  %v1101_v12 = vsel %vm498_vm1, %v1080_v11, 0 }
 0x199   : > { %3702 = vmatpush3.bf16.msra.mxu0 %v877_v10  ;;  %3734 = vmatpush3.bf16.xpose.msra.mxu1 %v1101_v12 }
 0x19a   : > { %3703 = vmatprep.subr.bf16.mxu0 %v879_v3 }
 0x19b   : > { %v1082_v13 = vpop.permute.xlu1 %1081 }
 0x19c   : > { %3696 = vmatmul.mubr.msk.bf16.gmra.mrb[20].mxu0 %vm498_vm1, %v4501_v49  ;;  %3953 = vmatprep.subr.msk.bf16.mxu1 %vm498_vm1, %v1082_v13  ;;  %v1104_v14 = vsel %vm498_vm1, %v1082_v13, 0 }
 0x19d   : > { %3704 = vmatpush3.bf16.msra.mxu0 %v879_v3 }
 0x19e   : > { %3705 = vmatprep.subr.bf16.mxu0 %v881_v4 }
 0x1a1   : > { %3706 = vmatpush3.bf16.msra.mxu0 %v881_v4  ;;  %3736 = vmatpush3.bf16.xpose.msra.mxu1 %v1104_v14 }
 0x1a2   : > { %3715 = vmatprep.subr.bf16.mxu0 %v4561_v15 }
 0x257   : > { %v3677_v22 = vpop.f32.mrb[0].mxu1 }
 0x258   : > { %v4570_v24 = vadd.f32 %v3677_v22, %v3426_v18  ;;  %v557_v25 = vpop.f32.mrb[1].mxu1 }
 0x259   : > { %v3678_v26 = vpop.f32.mrb[2].mxu1  ;;  %v4575_v28 = vadd.f32 %v3422_v21, %v557_v25 }
 0x25a   : > { %v560_v32 = vpop.f32.mrb[3].mxu1  ;;  %v696_v33 = vsel %vm689_vm2, %v4570_v24, -inf  ;;  %v4586_v38 = vadd.f32 %v3678_v26, %v3427_v31  ;;  %v4646_v26 = vpop.permute.xlu1 %967 }
 0x25b   : > { %v4579_v34 = vadd.f32 %v3423_v23, %v560_v32  ;;  %697 = vmax.xlane.f32.xlu0 %v696_v33  ;;  %v690_v41 = vsel %vm689_vm2, %v4575_v28, -inf }
 0x25c   : > { %v699_v55 = vsel %vm689_vm2, %v4586_v38, -inf }
 0x25d   : > { %v693_v37 = vsel %vm689_vm2, %v4579_v34, -inf }
 0x25e   : > { %694 = vmax.xlane.f32.xlu1 %v693_v37 }
 0x25f   : > { %v3681_v44 = vpop.f32.mrb[4].mxu1  ;;  %691 = vmax.xlane.f32.xlu0 %v690_v41 }
 0x260   : > { %v4590_v45 = vadd.f32 %v3681_v44, %v3434_v36  ;;  %v573_v46 = vpop.f32.mrb[5].mxu1 }
 0x261   : > { %v3682_v47 = vpop.f32.mrb[6].mxu1  ;;  %v4592_v51 = vadd.f32 %v3430_v42, %v573_v46 }
 0x262   : > { %v4594_v52 = vadd.f32 %v3682_v47, %v3435_v43  ;;  %v576_v53 = vpop.f32.mrb[7].mxu1  ;;  %v708_v54 = vsel %vm689_vm2, %v4590_v45, -inf }
 0x263   : > { %709 = vmax.xlane.f32.xlu1 %v708_v54  ;;  %700 = vmax.xlane.f32.xlu0 %v699_v55  ;;  %v4600_v56 = vadd.f32 %v3431_v48, %v576_v53  ;;  %v702_v57 = vsel %vm689_vm2, %v4592_v51, -inf }
 0x264   : > { %v711_v58 = vsel %vm689_vm2, %v4594_v52, -inf }
 0x265   : > { %v705_v3 = vsel %vm689_vm2, %v4600_v56, -inf }
 0x267   : > { %v3693_v59 = vpop.f32.mrb[16].mxu0  ;;  %703 = vmax.xlane.f32.xlu1 %v702_v57  ;;  %712 = vmax.xlane.f32.xlu0 %v711_v58 }
 0x268   : > { %v4606_v60 = vadd.f32 %v3693_v59, %v3426_v18  ;;  %v658_v61 = vpop.f32.mrb[17].mxu0 }
 0x269   : > { %v3694_v62 = vpop.f32.mrb[18].mxu0  ;;  %v4608_v63 = vadd.f32 %v3422_v21, %v658_v61 }
 0x26a   : > { %v4610_v0 = vadd.f32 %v3694_v62, %v3427_v31  ;;  %v661_v1 = vpop.f32.mrb[19].mxu0  ;;  %v720_v2 = vsel %vm689_vm2, %v4606_v60, -inf }
 0x26b   : > { %721 = vmax.xlane.f32.xlu1 %v720_v2  ;;  %706 = vmax.xlane.f32.xlu0 %v705_v3  ;;  %v4616_v4 = vadd.f32 %v3423_v23, %v661_v1  ;;  %v714_v5 = vsel %vm689_vm2, %v4608_v63, -inf }
 0x26c   : > { %v723_v7 = vsel %vm689_vm2, %v4610_v0, -inf }
 0x26d   : > { %v717_v17 = vsel %vm689_vm2, %v4616_v4, -inf }
 0x26f   : > { %v3697_v8 = vpop.f32.mrb[20].mxu0  ;;  %715 = vmax.xlane.f32.xlu1 %v714_v5  ;;  %724 = vmax.xlane.f32.xlu0 %v723_v7 }
 0x270   : > { %v4622_v10 = vadd.f32 %v3697_v8, %v3434_v36  ;;  %v674_v11 = vpop.f32.mrb[21].mxu0 }
 0x271   : > { %v4624_v12 = vadd.f32 %v3430_v42, %v674_v11  ;;  %v3698_v13 = vpop.f32.mrb[22].mxu0 }
 0x272   : > { %v4626_v14 = vadd.f32 %v3698_v13, %v3435_v43  ;;  %v677_v16 = vpop.f32.mrb[23].mxu0  ;;  %v732_v21 = vsel %vm689_vm2, %v4622_v10, -inf }
 0x273   : > { %v4630_v18 = vadd.f32 %v3431_v48, %v677_v16  ;;  %718 = vmax.xlane.f32.xlu0 %v717_v17  ;;  %v726_v22 = vsel %vm689_vm2, %v4624_v12, -inf }
 0x274   : > { %v735_v23 = vsel %vm689_vm2, %v4626_v14, -inf }
 0x275   : > { %v729_v25 = vsel %vm689_vm2, %v4630_v18, -inf }
 0x280   : > { %1083 = vrot.lane.b32.xlu1 %v4483_v29, %s4395_s12 }
 0x289   : > { %1182 = vrot.lane.b32.xlu0 %v4493_v40, %s4395_s12 }
 0x2a4   : > { %733 = vmax.xlane.f32.xlu1 %v732_v21 }
 0x2a8   : > { %727 = vmax.xlane.f32.xlu1 %v726_v22  ;;  %736 = vmax.xlane.f32.xlu0 %v735_v23 }
 0x2ac   : > { %730 = vmax.xlane.f32.xlu0 %v729_v25 }
 0x2b9   : > { %1184 = vrot.lane.b32.xlu1 %v4491_v39, %s4395_s12 }
 0x2e8   : > { %v698_v27 = vpop.xlane.xlu0 %697 }
 0x2e9   : > { %v740_v31 = vsub.f32 %v4570_v24, %v698_v27 }
 0x2eb   : > { %v758_v32 = vmul.f32 1.442695, %v740_v31  ;;  %v695_v33 = vpop.xlane.xlu1 %694 }
 0x2ec   : > { %v692_v35 = vpop.xlane.xlu0 %691  ;;  %v739_v41 = vsub.f32 %v4579_v34, %v695_v33 }
 0x2ed   : > { %4129 = vpow2.f32 %v758_v32  ;;  %v738_v36 = vsub.f32 %v4575_v28, %v692_v35 }
 0x2ee   : > { %v756_v47 = vmul.f32 1.442695, %v739_v41 }
 0x2ef   : > { %v754_v37 = vmul.f32 1.442695, %v738_v36 }
 0x2f0   : > { %v710_v42 = vpop.xlane.xlu1 %709  ;;  %v701_v43 = vpop.xlane.xlu0 %700 }
 0x2f1   : > { %4131 = vpow2.f32 %v754_v37  ;;  %v741_v44 = vsub.f32 %v4586_v38, %v701_v43  ;;  %v744_v48 = vsub.f32 %v4590_v45, %v710_v42 }
 0x2f3   : > { %v760_v46 = vmul.f32 1.442695, %v741_v44  ;;  %v766_v57 = vmul.f32 1.442695, %v744_v48 }
 0x2f4   : > { %v704_v53 = vpop.xlane.xlu1 %703  ;;  %v713_v24 = vpop.xlane.xlu0 %712 }
 0x2f5   : > { %v742_v54 = vsub.f32 %v4592_v51, %v704_v53  ;;  %4133 = vpow2.f32 %v760_v46  ;;  %v745_v34 = vsub.f32 %v4594_v52, %v713_v24 }
 0x2f6   : > { %4135 = vpow2.f32 %v756_v47 }
 0x2f7   : > { %v4654_v55 = vpop.eup %4129  ;;  %v762_v28 = vmul.f32 1.442695, %v742_v54  ;;  %v768_v61 = vmul.f32 1.442695, %v745_v34 }
 0x2f8   : > { %v722_v58 = vpop.xlane.xlu1 %721  ;;  %v792_v38 = vsel %vm689_vm2, %v4654_v55, 0.0  ;;  %v707_v59 = vpop.xlane.xlu0 %706 }
 0x2f9   : > { %4137 = vpow2.f32 %v762_v28  ;;  %793 = vadd.xlane.f32.xlu1 %v792_v38  ;;  %v743_v51 = vsub.f32 %v4600_v56, %v707_v59  ;;  %v748_v7 = vsub.f32 %v4606_v60, %v722_v58 }
 0x2fa   : > { %4139 = vpow2.f32 %v766_v57 }
 0x2fb   : > { %v4659_v45 = vpop.eup %4131  ;;  %4141 = vpow2.f32 %v768_v61  ;;  %v764_v8 = vmul.f32 1.442695, %v743_v51  ;;  %v774_v17 = vmul.f32 1.442695, %v748_v7 }
 0x2fc   : > { %v716_v62 = vpop.xlane.xlu1 %715  ;;  %v786_v1 = vsel %vm689_vm2, %v4659_v45, 0.0  ;;  %v725_v3 = vpop.xlane.xlu0 %724 }
 0x2fd   : > { %v746_v2 = vsub.f32 %v4608_v63, %v716_v62  ;;  %787 = vadd.xlane.f32.xlu1 %v786_v1  ;;  %v749_v60 = vsub.f32 %v4610_v0, %v725_v3 }
 0x2ff   : > { %v770_v52 = vmul.f32 1.442695, %v746_v2  ;;  %v4665_v5 = vpop.eup %4133  ;;  %v776_v27 = vmul.f32 1.442695, %v749_v60 }
 0x300   : > { %v1084_v11 = vpop.permute.xlu1 %1083  ;;  %v795_v56 = vsel %vm689_vm2, %v4665_v5, 0.0  ;;  %v4672_v16 = vpop.eup %4135 }
 0x301   : > { %4143 = vpow2.f32 %v770_v52  ;;  %3954 = vmatprep.subr.msk.bf16.mxu1 %vm498_vm1, %v1084_v11  ;;  %v1107_v13 = vsel %vm498_vm1, %v1084_v11, 0  ;;  %796 = vadd.xlane.f32.xlu0 %v795_v56  ;;  %v719_v22 = vpop.xlane.xlu0 %718  ;;  %v789_v23 = vsel %vm689_vm2, %v4672_v16, 0.0 }
 0x302   : > { %3738 = vmatpush3.bf16.xpose.msra.mxu1 %v1107_v13  ;;  %4145 = vpow2.f32 %v764_v8  ;;  %v747_v31 = vsub.f32 %v4616_v4, %v719_v22 }
 0x303   : > { %v4674_v63 = vpop.eup %4137  ;;  %4147 = vpow2.f32 %v774_v17 }
 0x304   : > { %v798_v21 = vsel %vm689_vm2, %v4674_v63, 0.0  ;;  %v4681_v25 = vpop.eup %4139  ;;  %4149 = vpow2.f32 %v776_v27  ;;  %v772_v35 = vmul.f32 1.442695, %v747_v31 }
 0x305   : > { %799 = vadd.xlane.f32.xlu1 %v798_v21  ;;  %790 = vadd.xlane.f32.xlu0 %v789_v23  ;;  %v804_v32 = vsel %vm689_vm2, %v4681_v25, 0.0  ;;  %v4686_v33 = vpop.eup %4141  ;;  %v4712_v53 = vpop.permute.xlu0 %1182 }
 0x306   : > { %v807_v37 = vsel %vm689_vm2, %v4686_v33, 0.0  ;;  %4151 = vpow2.f32 %v772_v35 }
 0x309   : > { %805 = vadd.xlane.f32.xlu0 %v804_v32 }
 0x30b   : > { %v4688_v0 = vpop.eup %4143 }
 0x30c   : > { %v810_v36 = vsel %vm689_vm2, %v4688_v0, 0.0  ;;  %v4694_v41 = vpop.eup %4145 }
 0x30d   : > { %811 = vadd.xlane.f32.xlu1 %v810_v36  ;;  %808 = vadd.xlane.f32.xlu0 %v807_v37  ;;  %v801_v4 = vsel %vm689_vm2, %v4694_v41, 0.0  ;;  %v4698_v42 = vpop.eup %4147 }
 0x30e   : > { %v816_v43 = vsel %vm689_vm2, %v4698_v42, 0.0  ;;  %v4702_v44 = vpop.eup %4149 }
 0x30f   : > { %v819_v46 = vsel %vm689_vm2, %v4702_v44, 0.0 }
 0x310   : > { %v4706_v47 = vpop.eup %4151 }
 0x311   : > { %802 = vadd.xlane.f32.xlu0 %v801_v4  ;;  %v813_v48 = vsel %vm689_vm2, %v4706_v47, 0.0 }
 0x315   : > { %817 = vadd.xlane.f32.xlu0 %v816_v43 }
 0x319   : > { %820 = vadd.xlane.f32.xlu0 %v819_v46 }
 0x31d   : > { %814 = vadd.xlane.f32.xlu0 %v813_v48 }
 0x31e   : > { %1071 = vrot.lane.b32.xlu1 %v4473_v19, %s4396_s22 }
 0x331   : > { %v734_v54 = vpop.xlane.xlu1 %733 }
 0x332   : > { %v752_v58 = vsub.f32 %v4622_v10, %v734_v54 }
 0x333   : > { %1069 = vrot.lane.b32.xlu0 %v4475_v20, %s4396_s22 }
 0x334   : > { %v782_v59 = vmul.f32 1.442695, %v752_v58 }
 0x335   : > { %v737_v24 = vpop.xlane.xlu0 %736  ;;  %v728_v38 = vpop.xlane.xlu1 %727 }
 0x336   : > { %v750_v61 = vsub.f32 %v4624_v12, %v728_v38  ;;  %v753_v62 = vsub.f32 %v4626_v14, %v737_v24 }
 0x338   : > { %v778_v51 = vmul.f32 1.442695, %v750_v61  ;;  %v784_v2 = vmul.f32 1.442695, %v753_v62 }
 0x339   : > { %v731_v28 = vpop.xlane.xlu0 %730  ;;  %v4752_v8 = vpop.permute.xlu1 %1184 }
 0x33a   : > { %v751_v57 = vsub.f32 %v4630_v18, %v731_v28 }
 0x33c   : > { %v780_v34 = vmul.f32 1.442695, %v751_v57 }
 0x33e   : > { %4153 = vpow2.f32 %v780_v34 }
 0x33f   : > { %4155 = vpow2.f32 %v782_v59 }
 0x340   : > { %4157 = vpow2.f32 %v778_v51 }
 0x341   : > { %4159 = vpow2.f32 %v784_v2 }
 0x348   : > { %v4720_v1 = vpop.eup %4153 }
 0x349   : > { %v825_v52 = vsel %vm689_vm2, %v4720_v1, 0.0  ;;  %v4724_v18 = vpop.eup %4155 }
 0x34a   : > { %826 = vadd.xlane.f32.xlu1 %v825_v52  ;;  %v828_v10 = vsel %vm689_vm2, %v4724_v18, 0.0  ;;  %v4728_v3 = vpop.eup %4157 }
 0x34b   : > { %v822_v12 = vsel %vm689_vm2, %v4728_v3, 0.0  ;;  %v4732_v14 = vpop.eup %4159 }
 0x34c   : > { %v831_v7 = vsel %vm689_vm2, %v4732_v14, 0.0 }
 0x352   : > { %829 = vadd.xlane.f32.xlu0 %v828_v10 }
 0x356   : > { %823 = vadd.xlane.f32.xlu0 %v822_v12 }
 0x35a   : > { %832 = vadd.xlane.f32.xlu0 %v831_v7 }
 0x35b   : > { %1188 = vrot.lane.b32.xlu1 %v4501_v49, %s4395_s12 }
 0x35f   : > { %1176 = vrot.lane.b32.xlu1 %v4491_v39, %s4396_s22 }
 0x363   : > { %1075 = vrot.lane.b32.xlu1 %v4483_v29, %s4396_s22 }
 0x367   : > { %1180 = vrot.lane.b32.xlu1 %v4501_v49, %s4396_s22 }
 0x370   : > { %1186 = vrot.lane.b32.xlu0 %v4503_v50, %s4395_s12 }
 0x374   : > { %1174 = vrot.lane.b32.xlu0 %v4493_v40, %s4396_s22 }
 0x378   : > { %1073 = vrot.lane.b32.xlu0 %v4485_v30, %s4396_s22 }
 0x37c   : > { %1178 = vrot.lane.b32.xlu0 %v4503_v50, %s4396_s22  ;;  %s4402_s22 = smov 104  }
 0x386   : > { %v794_v11 = vpop.xlane.xlu1 %793 }
 0x38a   : > { %v788_v56 = vpop.xlane.xlu1 %787 }
 0x38e   : > { %v797_v13 = vpop.xlane.xlu0 %796 }
 0x38f   : > { %4161 = vrcp.f32 %v797_v13 }
 0x390   : > { %4163 = vrcp.f32 %v788_v56 }
 0x391   : > { %4165 = vrcp.f32 %v794_v11 }
 0x392   : > { %v791_v17 = vpop.xlane.xlu0 %790  ;;  %v800_v22 = vpop.xlane.xlu1 %799 }
 0x393   : > { %4167 = vrcp.f32 %v791_v17 }
 0x396   : > { %v806_v60 = vpop.xlane.xlu0 %805 }
 0x399   : > { %v4162_v21 = vpop.eup %4161 }
 0x39a   : > { %v809_v23 = vpop.xlane.xlu0 %808  ;;  %v4164_v27 = vpop.eup %4163  ;;  %v853_v35 = vmul.f32 %v4162_v21, %v4665_v5 }
 0x39b   : > { %v4166_v31 = vpop.eup %4165  ;;  %4169 = vrcp.f32 %v809_v23  ;;  %v850_v37 = vmul.f32 %v4164_v27, %v4659_v45  ;;  %v812_v54 = vpop.xlane.xlu1 %811 }
 0x39c   : > { %4171 = vrcp.f32 %v800_v22  ;;  %v852_v43 = vmul.f32 %v4166_v31, %v4654_v55 }
 0x39d   : > { %v4168_v32 = vpop.eup %4167  ;;  %4173 = vrcp.f32 %v806_v60 }
 0x39e   : > { %v803_v36 = vpop.xlane.xlu0 %802  ;;  %v851_v4 = vmul.f32 %v4168_v32, %v4672_v16  ;;  %v867_v48 = vpack.c.bf16 %v853_v35, %v852_v43 }
 0x39f   : > { %4175 = vrcp.f32 %v803_v36  ;;  %v1072_v51 = vpop.permute.xlu1 %1071 }
 0x3a0   : > { %v866_v46 = vpack.c.bf16 %v851_v4, %v850_v37 }
 0x3a2   : > { %3707 = vmatprep.mubr.msk.bf16.mxu0 %vm689_vm2, %v866_v46  ;;  %v818_v24 = vpop.xlane.xlu0 %817 }
 0x3a3   : > { %3708 = vmatmul.mubr.msk.bf16.vlgmr.msra.gmra.mrb[24].mxu0 %vm689_vm2, %v867_v48 }
 0x3a4   : > { %3716 = vmatpush3.bf16.msra.mxu0 %v4561_v15 }
 0x3a5   : > { %3717 = vmatprep.subr.bf16.mxu0 %v4543_v6  ;;  %v4170_v5 = vpop.eup %4169 }
 0x3a6   : > { %v821_v28 = vpop.xlane.xlu0 %820  ;;  %v4172_v45 = vpop.eup %4171  ;;  %v857_v16 = vmul.f32 %v4170_v5, %v4686_v33  ;;  %v4821_v5 = vld [vmem:[%s5887_s3 + $0x28] sm:$0xff]  }
 0x3a7   : > { %v4174_v57 = vpop.eup %4173  ;;  %4177 = vrcp.f32 %v821_v28  ;;  %v854_v15 = vmul.f32 %v4172_v45, %v4674_v63 }
 0x3a8   : > { %3718 = vmatpush3.bf16.msra.mxu0 %v4543_v6  ;;  %4179 = vrcp.f32 %v812_v54  ;;  %v856_v38 = vmul.f32 %v4174_v57, %v4681_v25  ;;  %v3442_v57 = vunpack.c.l.bf16 %v4821_v5 }
 0x3a9   : > { %v4176_v55 = vpop.eup %4175  ;;  %3719 = vmatprep.subr.bf16.mxu0 %v4646_v26  ;;  %4181 = vrcp.f32 %v818_v24  ;;  %v4816_v24 = vld [vmem:[%s5887_s3 + $0x20] sm:$0xff]  }
 0x3aa   : > { %v815_v34 = vpop.xlane.xlu0 %814  ;;  %v855_v58 = vmul.f32 %v4176_v55, %v4694_v41  ;;  %v869_v6 = vpack.c.bf16 %v857_v16, %v856_v38  ;;  %v3438_v54 = vunpack.c.l.bf16 %v4816_v24  ;;  %v3439_v16 = vunpack.c.h.bf16 %v4816_v24 }
 0x3ab   : > { %4183 = vrcp.f32 %v815_v34 }
 0x3ac   : > { %3720 = vmatpush3.bf16.msra.mxu0 %v4646_v26  ;;  %v868_v59 = vpack.c.bf16 %v855_v58, %v854_v15 }
 0x3ad   : > { %3721 = vmatprep.subr.bf16.mxu0 %v4549_v9 }
 0x3ae   : > { %3711 = vmatprep.mubr.msk.bf16.mxu0 %vm689_vm2, %v868_v59  ;;  %v1070_v61 = vpop.permute.xlu0 %1069 }
 0x3af   : > { %3712 = vmatmul.mubr.msk.bf16.gmra.mrb[28].mxu0 %vm689_vm2, %v869_v6  ;;  %3739 = vmatprep.mubr.msk.bf16.mxu1 %vm498_vm1, %v1070_v61 }
 0x3b0   : > { %3722 = vmatpush3.bf16.msra.mxu0 %v4549_v9  ;;  %3740 = vmatmul.mubr.msk.bf16.vlgmr.msra.gmra.mrb[8].mxu1 %vm498_vm1, %v1072_v51  ;;  %v1203_v9 = vsel %vm498_vm1, %v4712_v53, 0  ;;  %v3443_v51 = vunpack.c.h.bf16 %v4821_v5 }
 0x3b1   : > { %3955 = vmatprep.subr.msk.bf16.mxu0 %vm498_vm1, %v4712_v53  ;;  %v4178_v26 = vpop.eup %4177 }
 0x3b2   : > { %v4180_v63 = vpop.eup %4179  ;;  %v861_v41 = vmul.f32 %v4178_v26, %v4702_v44 }
 0x3b3   : > { %v4182_v25 = vpop.eup %4181  ;;  %v858_v62 = vmul.f32 %v4180_v63, %v4688_v0  ;;  %v1206_v0 = vsel %vm498_vm1, %v4752_v8, 0 }
 0x3b4   : > { %v860_v52 = vmul.f32 %v4182_v25, %v4698_v42 }
 0x3b5   : > { %v4184_v33 = vpop.eup %4183 }
 0x3b6   : > { %v859_v2 = vmul.f32 %v4184_v33, %v4706_v47  ;;  %v871_v12 = vpack.c.bf16 %v861_v41, %v860_v52 }
 0x3b8   : > { %v870_v10 = vpack.c.bf16 %v859_v2, %v858_v62 }
 0x3ba   : > { %3723 = vmatprep.mubr.msk.bf16.mxu0 %vm689_vm2, %v870_v10 }
 0x3bb   : > { %3724 = vmatmul.mubr.msk.bf16.vlgmr.msra.gmra.mrb[32].mxu0 %vm689_vm2, %v871_v12 }
 0x3bc   : > { %3748 = vmatpush3.bf16.xpose.msra.mxu0 %v1203_v9  ;;  %v3489_v9 = vld [vmem:[%s5887_s3 + $0x30] sm:$0xff]  }
 0x3bd   : > { %3956 = vmatprep.subr.msk.bf16.mxu0 %vm498_vm1, %v4752_v8 }
 0x3c4   : > { %3750 = vmatpush3.bf16.xpose.msra.mxu0 %v1206_v0  ;;  %v3490_v0 = vld [vmem:[%s5887_s3 + $0x38] sm:$0xff]  }
 0x3d7   : > { %v827_v44 = vpop.xlane.xlu1 %826 }
 0x3d8   : > { %4185 = vrcp.f32 %v827_v44  ;;  %v3446_v44 = vunpack.c.l.bf16 %v3489_v9 }
 0x3db   : > { %v1189_v11 = vpop.permute.xlu1 %1188 }
 0x3dc   : > { %v1212_v4 = vsel %vm498_vm1, %v1189_v11, 0 }
 0x3df   : > { %v830_v47 = vpop.xlane.xlu0 %829  ;;  %v1177_v60 = vpop.permute.xlu1 %1176 }
 0x3e2   : > { %v4186_v13 = vpop.eup %4185 }
 0x3e3   : > { %v824_v42 = vpop.xlane.xlu0 %823  ;;  %v863_v22 = vmul.f32 %v4186_v13, %v4720_v1  ;;  %v1076_v37 = vpop.permute.xlu1 %1075 }
 0x3e4   : > { %4187 = vrcp.f32 %v824_v42 }
 0x3e5   : > { %4189 = vrcp.f32 %v830_v47  ;;  %v3450_v47 = vunpack.c.l.bf16 %v3490_v0 }
 0x3e7   : > { %v833_v7 = vpop.xlane.xlu0 %832 }
 0x3e8   : > { %4191 = vrcp.f32 %v833_v7  ;;  %v3447_v7 = vunpack.c.h.bf16 %v3489_v9 }
 0x3eb   : > { %v1187_v56 = vpop.permute.xlu0 %1186 }
 0x3ec   : > { %3957 = vmatprep.subr.msk.bf16.mxu0 %vm498_vm1, %v1187_v56  ;;  %v1209_v53 = vsel %vm498_vm1, %v1187_v56, 0 }
 0x3ed   : > { %3752 = vmatpush3.bf16.xpose.msra.mxu0 %v1209_v53  ;;  %v3451_v53 = vunpack.c.h.bf16 %v3490_v0 }
 0x3ee   : > { %v4188_v17 = vpop.eup %4187  ;;  %3958 = vmatprep.subr.msk.bf16.mxu0 %vm498_vm1, %v1189_v11 }
 0x3ef   : > { %v1175_v8 = vpop.permute.xlu0 %1174  ;;  %v862_v21 = vmul.f32 %v4188_v17, %v4728_v3  ;;  %v4190_v23 = vpop.eup %4189 }
 0x3f0   : > { %v864_v35 = vmul.f32 %v4190_v23, %v4724_v18  ;;  %v1181_v18 = vpop.permute.xlu1 %1180 }
 0x3f1   : > { %v872_v27 = vpack.c.bf16 %v863_v22, %v862_v21 }
 0x3f2   : > { %v4192_v31 = vpop.eup %4191 }
 0x3f3   : > { %3727 = vmatprep.mubr.msk.bf16.mxu0 %vm689_vm2, %v872_v27  ;;  %v1074_v32 = vpop.permute.xlu0 %1073  ;;  %v865_v36 = vmul.f32 %v4192_v31, %v4732_v14 }
 0x3f4   : > { %3743 = vmatprep.mubr.msk.bf16.mxu1 %vm498_vm1, %v1074_v32 }
 0x3f5   : > { %3744 = vmatmul.mubr.msk.bf16.gmra.mrb[12].mxu1 %vm498_vm1, %v1076_v37  ;;  %3754 = vmatpush3.bf16.xpose.msra.mxu0 %v1212_v4  ;;  %v873_v3 = vpack.c.bf16 %v865_v36, %v864_v35 }
 0x3f7   : > { %3728 = vmatmul.mubr.msk.bf16.gmra.mrb[36].mxu0 %vm689_vm2, %v873_v3  ;;  %v1179_v1 = vpop.permute.xlu0 %1178 }
 0x3f8   : > { %3755 = vmatprep.mubr.msk.bf16.mxu0 %vm498_vm1, %v1175_v8 }
 0x3ff   : > { %3756 = vmatmul.mubr.msk.bf16.vlgmr.msra.gmra.mrb[40].mxu0 %vm498_vm1, %v1177_v60 }
 0x400   : > { %3759 = vmatprep.mubr.msk.bf16.mxu0 %vm498_vm1, %v1179_v1 }
 0x407   : > { %3760 = vmatmul.mubr.msk.bf16.gmra.mrb[44].mxu0 %vm498_vm1, %v1181_v18 }
 0x476   : > { %v4805_v14 = vpop.f32.mrb[24].mxu0 }
 0x477   : > { %5907 = vst [vmem:[#allocation2_spill] sm:$0xff] %v4805_v14  ;;  %v4807_v43 = vpop.f32.mrb[25].mxu0 }
 0x478   : > { %5908 = vst [vmem:[#allocation3_spill] sm:$0xff] %v4807_v43  ;;  %v4809_v46 = vpop.f32.mrb[26].mxu0 }
 0x479   : > { %5909 = vst [vmem:[#allocation4_spill] sm:$0xff] %v4809_v46  ;;  %v4811_v48 = vpop.f32.mrb[27].mxu0 }
 0x47a   : > { %5910 = vst [vmem:[#allocation5_spill] sm:$0xff] %v4811_v48 }
 0x482   : > { %v4824_v28 = vpop.f32.mrb[28].mxu0 }
 0x483   : > { %5911 = vst [vmem:[#allocation6_spill] sm:$0xff] %v4824_v28  ;;  %v4826_v45 = vpop.f32.mrb[29].mxu0  ;;  %v3741_v55 = vpop.f32.mrb[8].mxu1 }
 0x484   : > { %5912 = vst [vmem:[#allocation7_spill] sm:$0xff] %v4826_v45  ;;  %v4830_v34 = vpop.f32.mrb[30].mxu0  ;;  %v1143_v15 = vpop.f32.mrb[9].mxu1  ;;  %v4840_v61 = vadd.f32 %v3741_v55, %v3442_v57 }
 0x485   : > { %5913 = vst [vmem:[#allocation8_spill] sm:$0xff] %v4830_v34  ;;  %v4834_v58 = vadd.f32 %v3438_v54, %v1143_v15  ;;  %v4836_v38 = vpop.f32.mrb[31].mxu0  ;;  %v3742_v59 = vpop.f32.mrb[10].mxu1 }
 0x486   : > { %5914 = vst [vmem:[#allocation9_spill] sm:$0xff] %v4836_v38  ;;  %v1146_v6 = vpop.f32.mrb[11].mxu1  ;;  %v4853_v33 = vadd.f32 %v3742_v59, %v3443_v51  ;;  %v1285_v41 = vsel %vm689_vm2, %v4840_v61, -inf }
 0x487   : > { %v4845_v26 = vadd.f32 %v3439_v16, %v1146_v6  ;;  %v1279_v63 = vsel %vm689_vm2, %v4834_v58, -inf }
 0x488   : > { %1280 = vmax.xlane.f32.xlu0 %v1279_v63  ;;  %v1288_v52 = vsel %vm689_vm2, %v4853_v33, -inf }
 0x489   : > { %v1282_v25 = vsel %vm689_vm2, %v4845_v26, -inf }
 0x48a   : > { %1283 = vmax.xlane.f32.xlu1 %v1282_v25 }
 0x48c   : > { %1286 = vmax.xlane.f32.xlu0 %v1285_v41 }
 0x48e   : > { %v4857_v62 = vpop.f32.mrb[32].mxu0 }
 0x48f   : > { %5915 = vst [vmem:[#allocation10_spill] sm:$0xff] %v4857_v62  ;;  %v4859_v2 = vpop.f32.mrb[33].mxu0 }
 0x490   : > { %5916 = vst [vmem:[#allocation11_spill] sm:$0xff] %v4859_v2  ;;  %v4863_v10 = vpop.f32.mrb[34].mxu0  ;;  %1289 = vmax.xlane.f32.xlu0 %v1288_v52 }
 0x491   : > { %5917 = vst [vmem:[#allocation12_spill] sm:$0xff] %v4863_v10  ;;  %v4865_v12 = vpop.f32.mrb[35].mxu0 }
 0x492   : > { %5918 = vst [vmem:[#allocation13_spill] sm:$0xff] %v4865_v12 }
 0x4c8   : > { %v3745_v42 = vpop.f32.mrb[12].mxu1 }
 0x4c9   : > { %v1159_v11 = vpop.f32.mrb[13].mxu1  ;;  %v4879_v21 = vadd.f32 %v3745_v42, %v3450_v47 }
 0x4ca   : > { %v4873_v56 = vadd.f32 %v3446_v44, %v1159_v11  ;;  %v4875_v13 = vpop.f32.mrb[36].mxu0  ;;  %v3746_v17 = vpop.f32.mrb[14].mxu1 }
 0x4cb   : > { %5919 = vst [vmem:[#allocation14_spill] sm:$0xff] %v4875_v13  ;;  %v4877_v60 = vpop.f32.mrb[37].mxu0  ;;  %v1162_v8 = vpop.f32.mrb[15].mxu1  ;;  %v4889_v32 = vadd.f32 %v3746_v17, %v3451_v53  ;;  %v1297_v36 = vsel %vm689_vm2, %v4879_v21, -inf }
 0x4cc   : > { %5920 = vst [vmem:[#allocation15_spill] sm:$0xff] %v4877_v60  ;;  %v4881_v22 = vadd.f32 %v3447_v7, %v1162_v8  ;;  %v4883_v23 = vpop.f32.mrb[38].mxu0  ;;  %v1291_v27 = vsel %vm689_vm2, %v4873_v56, -inf }
 0x4cd   : > { %5921 = vst [vmem:[#allocation16_spill] sm:$0xff] %v4883_v23  ;;  %v4887_v31 = vpop.f32.mrb[39].mxu0  ;;  %1292 = vmax.xlane.f32.xlu1 %v1291_v27  ;;  %v1300_v4 = vsel %vm689_vm2, %v4889_v32, -inf }
 0x4ce   : > { %5922 = vst [vmem:[#allocation17_spill] sm:$0xff] %v4887_v31  ;;  %v1294_v35 = vsel %vm689_vm2, %v4881_v22, -inf }
 0x4cf   : > { %1295 = vmax.xlane.f32.xlu0 %v1294_v35 }
 0x4d1   : > { %1298 = vmax.xlane.f32.xlu1 %v1297_v36 }
 0x4d2   : > { %v4895_v37 = vpop.f32.mrb[40].mxu0 }
 0x4d3   : > { %v4899_v3 = vpop.f32.mrb[41].mxu0  ;;  %1301 = vmax.xlane.f32.xlu0 %v1300_v4 }
 0x4d4   : > { %v4901_v1 = vpop.f32.mrb[42].mxu0 }
 0x4d5   : > { %v4903_v18 = vpop.f32.mrb[43].mxu0 }
 0x4da   : > { %v3761_v55 = vpop.f32.mrb[44].mxu0 }
 0x4db   : > { %v4905_v15 = vadd.f32 %v3761_v55, %v3450_v47  ;;  %v1264_v59 = vpop.f32.mrb[45].mxu0 }
 0x4dc   : > { %v4907_v6 = vadd.f32 %v3446_v44, %v1264_v59  ;;  %v3762_v63 = vpop.f32.mrb[46].mxu0 }
 0x4dd   : > { %v4909_v25 = vadd.f32 %v3762_v63, %v3451_v53  ;;  %v1267_v41 = vpop.f32.mrb[47].mxu0 }
 0x4de   : > { %v4911_v52 = vadd.f32 %v3447_v7, %v1267_v41  ;;  %v1315_v24 = vsel %vm689_vm2, %v4907_v6, -inf }
 0x4e2   : > { %1463 = vrot.lane.b32.xlu1 %v4475_v20, %s4397_s8 }
 0x4e6   : > { %1467 = vrot.lane.b32.xlu1 %v4485_v30, %s4397_s8 }
 0x4e9   : > { %1465 = vrot.lane.b32.xlu0 %v4473_v19, %s4397_s8 }
 0x4ea   : > { %1552 = vrot.lane.b32.xlu1 %v4493_v40, %s4397_s8 }
 0x4ed   : > { %1469 = vrot.lane.b32.xlu0 %v4483_v29, %s4397_s8 }
 0x4ee   : > { %1666 = vrot.lane.b32.xlu1 %v4475_v20, %s4398_s9 }
 0x4f1   : > { %1554 = vrot.lane.b32.xlu0 %v4491_v39, %s4397_s8 }
 0x4f2   : > { %1556 = vrot.lane.b32.xlu1 %v4503_v50, %s4397_s8 }
 0x4f5   : > { %1558 = vrot.lane.b32.xlu0 %v4501_v49, %s4397_s8  ;;  %s4403_s8 = smov 40  }
 0x4f6   : > { %1668 = vrot.lane.b32.xlu1 %v4473_v19, %s4398_s9 }
 0x4fa   : > { %1670 = vrot.lane.b32.xlu1 %v4485_v30, %s4398_s9 }
 0x515   : > { %v1281_v9 = vpop.xlane.xlu0 %1280 }
 0x516   : > { %v1327_v0 = vsub.f32 %v4834_v58, %v1281_v9 }
 0x517   : > { %v1284_v44 = vpop.xlane.xlu1 %1283 }
 0x518   : > { %v1343_v7 = vmul.f32 1.442695, %v1327_v0  ;;  %v1328_v11 = vsub.f32 %v4845_v26, %v1284_v44 }
 0x519   : > { %v1287_v47 = vpop.xlane.xlu0 %1286 }
 0x51a   : > { %v1329_v42 = vsub.f32 %v4840_v61, %v1287_v47  ;;  %v1345_v27 = vmul.f32 1.442695, %v1328_v11 }
 0x51c   : > { %v1347_v53 = vmul.f32 1.442695, %v1329_v42 }
 0x51d   : > { %v1290_v17 = vpop.xlane.xlu0 %1289 }
 0x51e   : > { %4193 = vpow2.f32 %v1347_v53  ;;  %v1330_v8 = vsub.f32 %v4853_v33, %v1290_v17 }
 0x51f   : > { %4195 = vpow2.f32 %v1343_v7 }
 0x520   : > { %v1349_v35 = vmul.f32 1.442695, %v1330_v8 }
 0x522   : > { %4197 = vpow2.f32 %v1349_v35 }
 0x523   : > { %4199 = vpow2.f32 %v1345_v27 }
 0x528   : > { %v4931_v36 = vpop.eup %4193 }
 0x529   : > { %v1381_v58 = vsel %vm689_vm2, %v4931_v36, 0.0  ;;  %v4935_v4 = vpop.eup %4195 }
 0x52a   : > { %1382 = vadd.xlane.f32.xlu1 %v1381_v58  ;;  %v1375_v26 = vsel %vm689_vm2, %v4935_v4, 0.0 }
 0x52c   : > { %v4937_v61 = vpop.eup %4197 }
 0x52d   : > { %v1384_v33 = vsel %vm689_vm2, %v4937_v61, 0.0  ;;  %v4943_v55 = vpop.eup %4199 }
 0x52e   : > { %1376 = vadd.xlane.f32.xlu1 %v1375_v26  ;;  %1385 = vadd.xlane.f32.xlu0 %v1384_v33  ;;  %v1378_v59 = vsel %vm689_vm2, %v4943_v55, 0.0 }
 0x532   : > { %1379 = vadd.xlane.f32.xlu0 %v1378_v59 }
 0x55a   : > { %v1293_v63 = vpop.xlane.xlu1 %1292 }
 0x55b   : > { %v1331_v9 = vsub.f32 %v4873_v56, %v1293_v63 }
 0x55c   : > { %v1296_v41 = vpop.xlane.xlu0 %1295 }
 0x55d   : > { %v1332_v0 = vsub.f32 %v4881_v22, %v1296_v41  ;;  %v1351_v11 = vmul.f32 1.442695, %v1331_v9 }
 0x55e   : > { %v1299_v44 = vpop.xlane.xlu1 %1298 }
 0x55f   : > { %v1353_v47 = vmul.f32 1.442695, %v1332_v0  ;;  %v1333_v42 = vsub.f32 %v4879_v21, %v1299_v44 }
 0x560   : > { %v1302_v7 = vpop.xlane.xlu0 %1301 }
 0x561   : > { %4201 = vpow2.f32 %v1353_v47  ;;  %v1355_v53 = vmul.f32 1.442695, %v1333_v42  ;;  %v1334_v17 = vsub.f32 %v4889_v32, %v1302_v7  ;;  %v4956_v32 = vadd.f32 %v4901_v1, %v3443_v51 }
 0x562   : > { %v1464_v8 = vpop.permute.xlu1 %1463  ;;  %v4969_v51 = vadd.f32 %v3439_v16, %v4903_v18  ;;  %v4983_v18 = vadd.f32 %v4895_v37, %v3442_v57  ;;  %v1318_v57 = vsel %vm689_vm2, %v4911_v52, -inf }
 0x563   : > { %4203 = vpow2.f32 %v1355_v53  ;;  %3763 = vmatprep.subr.bf16.mxu1 %v1464_v8  ;;  %v1357_v35 = vmul.f32 1.442695, %v1334_v17  ;;  %v1312_v1 = vsel %vm689_vm2, %v4956_v32, -inf  ;;  %v4992_v53 = vadd.f32 %v3438_v54, %v4899_v3 }
 0x564   : > { %3764 = vmatpush3.bf16.msra.mxu1 %v1464_v8  ;;  %v1466_v27 = vpop.permute.xlu0 %1465  ;;  %4205 = vpow2.f32 %v1351_v11  ;;  %v1306_v16 = vsel %vm689_vm2, %v4969_v51, -inf  ;;  %v1324_v11 = vsel %vm689_vm2, %v4909_v25, -inf  ;;  %v1309_v5 = vsel %vm689_vm2, %v4983_v18, -inf }
 0x565   : > { %3765 = vmatprep.subr.bf16.mxu1 %v1466_v27  ;;  %4207 = vpow2.f32 %v1357_v35  ;;  %v1303_v37 = vsel %vm689_vm2, %v4992_v53, -inf  ;;  %v1321_v17 = vsel %vm689_vm2, %v4905_v15, -inf }
 0x566   : > { %v1468_v56 = vpop.permute.xlu1 %1467 }
 0x568   : > { %3766 = vmatpush3.bf16.msra.mxu1 %v1466_v27  ;;  %v1470_v22 = vpop.permute.xlu0 %1469 }
 0x569   : > { %3767 = vmatprep.subr.bf16.mxu1 %v1468_v56 }
 0x56a   : > { %v1553_v21 = vpop.permute.xlu1 %1552 }
 0x56b   : > { %v4951_v58 = vpop.eup %4201  ;;  %3779 = vmatprep.subr.bf16.mxu0 %v1553_v21 }
 0x56c   : > { %3768 = vmatpush3.bf16.msra.mxu1 %v1468_v56  ;;  %3780 = vmatpush3.bf16.msra.mxu0 %v1553_v21  ;;  %v1555_v26 = vpop.permute.xlu0 %1554  ;;  %v1390_v33 = vsel %vm689_vm2, %v4951_v58, 0.0 }
 0x56d   : > { %v4960_v59 = vpop.eup %4203  ;;  %1391 = vadd.xlane.f32.xlu0 %v1390_v33  ;;  %3769 = vmatprep.subr.bf16.mxu1 %v1470_v22 }
 0x56e   : > { %3781 = vmatprep.subr.bf16.mxu0 %v1555_v26  ;;  %v1667_v63 = vpop.permute.xlu1 %1666  ;;  %v1393_v41 = vsel %vm689_vm2, %v4960_v59, 0.0  ;;  %v4964_v9 = vpop.eup %4205 }
 0x56f   : > { %1394 = vadd.xlane.f32.xlu1 %v1393_v41  ;;  %v1387_v44 = vsel %vm689_vm2, %v4964_v9, 0.0  ;;  %v4976_v47 = vpop.eup %4207 }
 0x570   : > { %3770 = vmatpush3.bf16.msra.mxu1 %v1470_v22  ;;  %3782 = vmatpush3.bf16.msra.mxu0 %v1555_v26  ;;  %v1559_v42 = vpop.permute.xlu0 %1558  ;;  %v1396_v7 = vsel %vm689_vm2, %v4976_v47, 0.0 }
 0x571   : > { %1313 = vmax.xlane.f32.xlu0 %v1312_v1  ;;  %3959 = vmatprep.subr.msk.bf16.mxu1 %vm498_vm1, %v1667_v63 }
 0x572   : > { %v1557_v0 = vpop.permute.xlu1 %1556 }
 0x573   : > { %1388 = vadd.xlane.f32.xlu1 %v1387_v44  ;;  %3783 = vmatprep.subr.bf16.mxu0 %v1557_v0 }
 0x574   : > { %3784 = vmatpush3.bf16.msra.mxu0 %v1557_v0 }
 0x575   : > { %1307 = vmax.xlane.f32.xlu0 %v1306_v16  ;;  %3785 = vmatprep.subr.bf16.mxu0 %v1559_v42 }
 0x576   : > { %v1669_v54 = vpop.permute.xlu1 %1668 }
 0x577   : > { %1397 = vadd.xlane.f32.xlu1 %v1396_v7  ;;  %v1687_v7 = vsel %vm498_vm1, %v1667_v63, 0 }
 0x578   : > { %3786 = vmatpush3.bf16.msra.mxu0 %v1559_v42 }
 0x579   : > { %1325 = vmax.xlane.f32.xlu0 %v1324_v11  ;;  %v1690_v11 = vsel %vm498_vm1, %v1669_v54, 0 }
 0x57a   : > { %v1671_v3 = vpop.permute.xlu1 %1670 }
 0x57b   : > { %1310 = vmax.xlane.f32.xlu1 %v1309_v5 }
 0x57d   : > { %1319 = vmax.xlane.f32.xlu0 %v1318_v57 }
 0x57f   : > { %1304 = vmax.xlane.f32.xlu1 %v1303_v37 }
 0x583   : > { %1322 = vmax.xlane.f32.xlu1 %v1321_v17 }
 0x587   : > { %1316 = vmax.xlane.f32.xlu1 %v1315_v24 }
 0x593   : > { %1771 = vrot.lane.b32.xlu0 %v4493_v40, %s4398_s9 }
 0x598   : > { %1672 = vrot.lane.b32.xlu1 %v4483_v29, %s4398_s9 }
 0x59c   : > { %1773 = vrot.lane.b32.xlu1 %v4491_v39, %s4398_s9 }
 0x5b7   : > { %v1383_v8 = vpop.xlane.xlu1 %1382 }
 0x5bb   : > { %v1377_v27 = vpop.xlane.xlu1 %1376  ;;  %v1386_v35 = vpop.xlane.xlu0 %1385 }
 0x5bc   : > { %4209 = vrcp.f32 %v1386_v35 }
 0x5bd   : > { %4211 = vrcp.f32 %v1377_v27 }
 0x5be   : > { %4213 = vrcp.f32 %v1383_v8 }
 0x5bf   : > { %v1380_v56 = vpop.xlane.xlu0 %1379 }
 0x5c0   : > { %4215 = vrcp.f32 %v1380_v56 }
 0x5c6   : > { %v4210_v22 = vpop.eup %4209 }
 0x5c7   : > { %v4212_v21 = vpop.eup %4211  ;;  %v1442_v41 = vmul.f32 %v4210_v22, %v4937_v61 }
 0x5c8   : > { %v4214_v26 = vpop.eup %4213  ;;  %v1439_v1 = vmul.f32 %v4212_v21, %v4935_v4  ;;  %v1693_v4 = vsel %vm498_vm1, %v1671_v3, 0 }
 0x5c9   : > { %v1441_v44 = vmul.f32 %v4214_v26, %v4931_v36 }
 0x5ca   : > { %v4216_v33 = vpop.eup %4215 }
 0x5cb   : > { %v1440_v0 = vmul.f32 %v4216_v33, %v4943_v55  ;;  %v1456_v16 = vpack.c.bf16 %v1442_v41, %v1441_v44 }
 0x5cd   : > { %v1455_v42 = vpack.c.bf16 %v1440_v0, %v1439_v1 }
 0x5cf   : > { %3771 = vmatprep.mubr.msk.bf16.mxu1 %vm689_vm2, %v1455_v42 }
 0x5d0   : > { %3772 = vmatmul.mubr.msk.bf16.vlgmr.msra.gmra.mrb[16].mxu1 %vm689_vm2, %v1456_v16 }
 0x5d1   : > { %3796 = vmatpush3.bf16.xpose.msra.mxu1 %v1687_v7 }
 0x5d2   : > { %3960 = vmatprep.subr.msk.bf16.mxu1 %vm498_vm1, %v1669_v54 }
 0x5d9   : > { %3798 = vmatpush3.bf16.xpose.msra.mxu1 %v1690_v11 }
 0x5da   : > { %3961 = vmatprep.subr.msk.bf16.mxu1 %vm498_vm1, %v1671_v3 }
 0x5e1   : > { %3800 = vmatpush3.bf16.xpose.msra.mxu1 %v1693_v4 }
 0x5fa   : > { %v1392_v36 = vpop.xlane.xlu0 %1391 }
 0x5fb   : > { %4217 = vrcp.f32 %v1392_v36 }
 0x5fc   : > { %v1395_v61 = vpop.xlane.xlu1 %1394 }
 0x5fe   : > { %v1314_v55 = vpop.xlane.xlu0 %1313 }
 0x5ff   : > { %v1338_v17 = vsub.f32 %v4956_v32, %v1314_v55 }
 0x600   : > { %v1389_v5 = vpop.xlane.xlu1 %1388 }
 0x601   : > { %4219 = vrcp.f32 %v1389_v5  ;;  %v1365_v35 = vmul.f32 1.442695, %v1338_v17 }
 0x602   : > { %v1308_v57 = vpop.xlane.xlu0 %1307  ;;  %4221 = vrcp.f32 %v1395_v61 }
 0x603   : > { %v1336_v56 = vsub.f32 %v4969_v51, %v1308_v57 }
 0x604   : > { %v1398_v63 = vpop.xlane.xlu1 %1397 }
 0x605   : > { %4223 = vrcp.f32 %v1398_v63  ;;  %v4218_v54 = vpop.eup %4217 }
 0x606   : > { %v1326_v37 = vpop.xlane.xlu0 %1325  ;;  %v1444_v33 = vmul.f32 %v4218_v54, %v4951_v58 }
 0x608   : > { %v1311_v24 = vpop.xlane.xlu1 %1310 }
 0x609   : > { %v1337_v8 = vsub.f32 %v4983_v18, %v1311_v24  ;;  %v1361_v18 = vmul.f32 1.442695, %v1336_v56 }
 0x60a   : > { %v1320_v27 = vpop.xlane.xlu0 %1319 }
 0x60b   : > { %v4220_v3 = vpop.eup %4219  ;;  %v1363_v22 = vmul.f32 1.442695, %v1337_v8  ;;  %v1340_v63 = vsub.f32 %v4911_v52, %v1320_v27 }
 0x60c   : > { %v1305_v21 = vpop.xlane.xlu1 %1304  ;;  %v1443_v26 = vmul.f32 %v4220_v3, %v4964_v9  ;;  %v4222_v41 = vpop.eup %4221  ;;  %v1342_v3 = vsub.f32 %v4909_v25, %v1326_v37 }
 0x60d   : > { %4225 = vpow2.f32 %v1363_v22  ;;  %v1335_v1 = vsub.f32 %v4992_v53, %v1305_v21  ;;  %v1445_v9 = vmul.f32 %v4222_v41, %v4960_v59  ;;  %v1369_v17 = vmul.f32 1.442695, %v1340_v63 }
 0x60e   : > { %v5027_v32 = vpop.permute.xlu0 %1771  ;;  %v1457_v0 = vpack.c.bf16 %v1444_v33, %v1443_v26  ;;  %4227 = vpow2.f32 %v1365_v35  ;;  %v1373_v56 = vmul.f32 1.442695, %v1342_v3 }
 0x60f   : > { %v4224_v44 = vpop.eup %4223  ;;  %v1359_v42 = vmul.f32 1.442695, %v1335_v1  ;;  %3963 = vmatprep.subr.msk.bf16.mxu0 %vm498_vm1, %v5027_v32 }
 0x610   : > { %v1323_v51 = vpop.xlane.xlu1 %1322  ;;  %3775 = vmatprep.mubr.msk.bf16.mxu1 %vm689_vm2, %v1457_v0  ;;  %v1446_v58 = vmul.f32 %v4224_v44, %v4976_v47 }
 0x611   : > { %4229 = vpow2.f32 %v1359_v42  ;;  %v1341_v24 = vsub.f32 %v4905_v15, %v1323_v51 }
 0x612   : > { %v1458_v16 = vpack.c.bf16 %v1446_v58, %v1445_v9  ;;  %4231 = vpow2.f32 %v1361_v18 }
 0x613   : > { %4233 = vpow2.f32 %v1369_v17  ;;  %v1371_v54 = vmul.f32 1.442695, %v1341_v24 }
 0x614   : > { %v1317_v53 = vpop.xlane.xlu1 %1316  ;;  %3776 = vmatmul.mubr.msk.bf16.gmra.mrb[20].mxu1 %vm689_vm2, %v1458_v16 }
 0x615   : > { %v1339_v8 = vsub.f32 %v4907_v6, %v1317_v53  ;;  %4235 = vpow2.f32 %v1371_v54 }
 0x617   : > { %v5035_v7 = vpop.eup %4225  ;;  %v1367_v35 = vmul.f32 1.442695, %v1339_v8  ;;  %v1792_v8 = vsel %vm498_vm1, %v5027_v32, 0 }
 0x618   : > { %v1673_v11 = vpop.permute.xlu1 %1672  ;;  %v1405_v4 = vsel %vm689_vm2, %v5035_v7, 0.0  ;;  %v5039_v36 = vpop.eup %4227 }
 0x619   : > { %1406 = vadd.xlane.f32.xlu0 %v1405_v4  ;;  %3962 = vmatprep.subr.msk.bf16.mxu1 %vm498_vm1, %v1673_v11  ;;  %v1696_v59 = vsel %vm498_vm1, %v1673_v11, 0  ;;  %v1408_v55 = vsel %vm689_vm2, %v5039_v36, 0.0  ;;  %4237 = vpow2.f32 %v1367_v35 }
 0x61a   : > { %3802 = vmatpush3.bf16.xpose.msra.mxu1 %v1696_v59  ;;  %4239 = vpow2.f32 %v1373_v56 }
 0x61b   : > { %v5043_v47 = vpop.eup %4229 }
 0x61c   : > { %v1399_v61 = vsel %vm689_vm2, %v5043_v47, 0.0  ;;  %v5049_v5 = vpop.eup %4231  ;;  %v1774_v41 = vpop.permute.xlu1 %1773 }
 0x61d   : > { %1400 = vadd.xlane.f32.xlu1 %v1399_v61  ;;  %1409 = vadd.xlane.f32.xlu0 %v1408_v55  ;;  %v1402_v57 = vsel %vm689_vm2, %v5049_v5, 0.0  ;;  %v5061_v22 = vpop.eup %4233 }
 0x61e   : > { %v1414_v21 = vsel %vm689_vm2, %v5061_v22, 0.0 }
 0x61f   : > { %v5065_v52 = vpop.eup %4235 }
 0x620   : > { %v1417_v15 = vsel %vm689_vm2, %v5065_v52, 0.0 }
 0x621   : > { %1403 = vadd.xlane.f32.xlu0 %v1402_v57 }
 0x623   : > { %v5069_v27 = vpop.eup %4237 }
 0x624   : > { %v1411_v6 = vsel %vm689_vm2, %v5069_v27, 0.0  ;;  %v5073_v25 = vpop.eup %4239 }
 0x625   : > { %v1420_v37 = vsel %vm689_vm2, %v5073_v25, 0.0 }
 0x62e   : > { %1660 = vrot.lane.b32.xlu1 %v4473_v19, %s4399_s10 }
 0x637   : > { %1658 = vrot.lane.b32.xlu0 %v4475_v20, %s4399_s10 }
 0x652   : > { %1415 = vadd.xlane.f32.xlu1 %v1414_v21 }
 0x656   : > { %1418 = vadd.xlane.f32.xlu0 %v1417_v15 }
 0x65a   : > { %1412 = vadd.xlane.f32.xlu0 %v1411_v6 }
 0x65e   : > { %1421 = vadd.xlane.f32.xlu0 %v1420_v37 }
 0x663   : > { %1777 = vrot.lane.b32.xlu1 %v4501_v49, %s4398_s9 }
 0x667   : > { %1765 = vrot.lane.b32.xlu1 %v4491_v39, %s4399_s10 }
 0x66b   : > { %1664 = vrot.lane.b32.xlu1 %v4483_v29, %s4399_s10 }
 0x66f   : > { %1769 = vrot.lane.b32.xlu1 %v4501_v49, %s4399_s10 }
 0x674   : > { %1775 = vrot.lane.b32.xlu0 %v4503_v50, %s4398_s9  ;;  %s4404_s9 = smov 8  }
 0x678   : > { %1763 = vrot.lane.b32.xlu0 %v4493_v40, %s4399_s10 }
 0x67c   : > { %1662 = vrot.lane.b32.xlu0 %v4485_v30, %s4399_s10 }
 0x680   : > { %1767 = vrot.lane.b32.xlu0 %v4503_v50, %s4399_s10  ;;  %s4405_s10 = smov 16  }
 0x6a3   : > { %v5093_v26 = vpop.f32.mrb[16].mxu1 }
 0x6a4   : > { %v5095_v33 = vpop.f32.mrb[17].mxu1 }
 0x6a5   : > { %v5097_v1 = vpop.f32.mrb[18].mxu1 }
 0x6a6   : > { %v5101_v44 = vpop.f32.mrb[19].mxu1  ;;  %v1407_v18 = vpop.xlane.xlu0 %1406 }
 0x6aa   : > { %v1401_v51 = vpop.xlane.xlu1 %1400  ;;  %v1410_v9 = vpop.xlane.xlu0 %1409 }
 0x6ab   : > { %4241 = vrcp.f32 %v1410_v9 }
 0x6ac   : > { %4243 = vrcp.f32 %v1401_v51 }
 0x6ad   : > { %4245 = vrcp.f32 %v1407_v18 }
 0x6ae   : > { %v1404_v58 = vpop.xlane.xlu0 %1403  ;;  %v1661_v53 = vpop.permute.xlu1 %1660 }
 0x6af   : > { %4247 = vrcp.f32 %v1404_v58 }
 0x6b2   : > { %v1659_v16 = vpop.permute.xlu0 %1658 }
 0x6b3   : > { %3803 = vmatprep.mubr.msk.bf16.mxu1 %vm498_vm1, %v1659_v16 }
 0x6b4   : > { %3804 = vmatmul.mubr.msk.bf16.vlgmr.msra.gmra.mrb[24].mxu1 %vm498_vm1, %v1661_v53 }
 0x6b5   : > { %v4242_v11 = vpop.eup %4241 }
 0x6b6   : > { %v4244_v4 = vpop.eup %4243  ;;  %v1450_v55 = vmul.f32 %v4242_v11, %v5039_v36  ;;  %v1795_v36 = vsel %vm498_vm1, %v1774_v41, 0 }
 0x6b7   : > { %v4246_v59 = vpop.eup %4245  ;;  %v1447_v57 = vmul.f32 %v4244_v4, %v5043_v47 }
 0x6b8   : > { %v1449_v17 = vmul.f32 %v4246_v59, %v5035_v7 }
 0x6b9   : > { %v4248_v61 = vpop.eup %4247 }
 0x6ba   : > { %v1448_v63 = vmul.f32 %v4248_v61, %v5049_v5  ;;  %v1460_v54 = vpack.c.bf16 %v1450_v55, %v1449_v17 }
 0x6bc   : > { %v1459_v24 = vpack.c.bf16 %v1448_v63, %v1447_v57 }
 0x6be   : > { %3787 = vmatprep.mubr.msk.bf16.mxu0 %vm689_vm2, %v1459_v24 }
 0x6bf   : > { %3788 = vmatmul.mubr.msk.bf16.vlgmr.msra.gmra.mrb[48].mxu0 %vm689_vm2, %v1460_v54  ;;  %v5153_v54 = vld [vmem:[%s5887_s3 + $0x48] sm:$0xff]  }
 0x6c0   : > { %3812 = vmatpush3.bf16.xpose.msra.mxu0 %v1792_v8 }
 0x6c1   : > { %3964 = vmatprep.subr.msk.bf16.mxu0 %vm498_vm1, %v1774_v41 }
 0x6c8   : > { %3814 = vmatpush3.bf16.xpose.msra.mxu0 %v1795_v36  ;;  %v5892_v36 = vunpack.c.l.bf16 %v5153_v54 }
 0x6df   : > { %v1416_v3 = vpop.xlane.xlu1 %1415 }
 0x6e0   : > { %4249 = vrcp.f32 %v1416_v3 }
 0x6e3   : > { %v1419_v47 = vpop.xlane.xlu0 %1418  ;;  %v1778_v37 = vpop.permute.xlu1 %1777 }
 0x6e4   : > { %v1801_v24 = vsel %vm498_vm1, %v1778_v37, 0 }
 0x6e7   : > { %v5117_v5 = vpop.f32.mrb[20].mxu1  ;;  %v1413_v7 = vpop.xlane.xlu0 %1412 }
 0x6e8   : > { %v5119_v35 = vpop.f32.mrb[21].mxu1  ;;  %4251 = vrcp.f32 %v1413_v7  ;;  %v1766_v58 = vpop.permute.xlu1 %1765 }
 0x6e9   : > { %v5121_v56 = vpop.f32.mrb[22].mxu1  ;;  %4253 = vrcp.f32 %v1419_v47 }
 0x6ea   : > { %v5125_v21 = vpop.f32.mrb[23].mxu1  ;;  %v4250_v18 = vpop.eup %4249 }
 0x6eb   : > { %v1422_v6 = vpop.xlane.xlu0 %1421  ;;  %v1452_v11 = vmul.f32 %v4250_v18, %v5061_v22 }
 0x6ec   : > { %4255 = vrcp.f32 %v1422_v6  ;;  %v1665_v17 = vpop.permute.xlu1 %1664 }
 0x6ef   : > { %v1776_v41 = vpop.permute.xlu0 %1775 }
 0x6f0   : > { %3965 = vmatprep.subr.msk.bf16.mxu0 %vm498_vm1, %v1776_v41  ;;  %v1798_v51 = vsel %vm498_vm1, %v1776_v41, 0 }
 0x6f1   : > { %3816 = vmatpush3.bf16.xpose.msra.mxu0 %v1798_v51  ;;  %v5894_v51 = vunpack.c.h.bf16 %v5153_v54 }
 0x6f2   : > { %v4252_v9 = vpop.eup %4251  ;;  %3966 = vmatprep.subr.msk.bf16.mxu0 %vm498_vm1, %v1778_v37 }
 0x6f3   : > { %v1764_v16 = vpop.permute.xlu0 %1763  ;;  %v1451_v53 = vmul.f32 %v4252_v9, %v5069_v27  ;;  %v4254_v4 = vpop.eup %4253 }
 0x6f4   : > { %v1453_v57 = vmul.f32 %v4254_v4, %v5065_v52  ;;  %v1770_v52 = vpop.permute.xlu1 %1769 }
 0x6f5   : > { %v1461_v59 = vpack.c.bf16 %v1452_v11, %v1451_v53 }
 0x6f6   : > { %v4256_v61 = vpop.eup %4255 }
 0x6f7   : > { %3791 = vmatprep.mubr.msk.bf16.mxu0 %vm689_vm2, %v1461_v59  ;;  %v1663_v55 = vpop.permute.xlu0 %1662  ;;  %v1454_v63 = vmul.f32 %v4256_v61, %v5073_v25  ;;  %v5148_v25 = vld [vmem:[%s5887_s3 + $0x40] sm:$0xff]  }
 0x6f8   : > { %3807 = vmatprep.mubr.msk.bf16.mxu1 %vm498_vm1, %v1663_v55  ;;  %v5891_v8 = vunpack.c.l.bf16 %v5148_v25  ;;  %v5893_v3 = vunpack.c.h.bf16 %v5148_v25 }
 0x6f9   : > { %3808 = vmatmul.mubr.msk.bf16.gmra.mrb[28].mxu1 %vm498_vm1, %v1665_v17  ;;  %3818 = vmatpush3.bf16.xpose.msra.mxu0 %v1801_v24  ;;  %v1462_v27 = vpack.c.bf16 %v1454_v63, %v1453_v57  ;;  %v3493_v24 = vld [vmem:[%s5887_s3 + $0x50] sm:$0xff]  }
 0x6fb   : > { %3792 = vmatmul.mubr.msk.bf16.gmra.mrb[52].mxu0 %vm689_vm2, %v1462_v27  ;;  %v1768_v22 = vpop.permute.xlu0 %1767  ;;  %v3494_v27 = vld [vmem:[%s5887_s3 + $0x58] sm:$0xff]  }
 0x6fc   : > { %3819 = vmatprep.mubr.msk.bf16.mxu0 %vm498_vm1, %v1764_v16 }
 0x703   : > { %3820 = vmatmul.mubr.msk.bf16.vlgmr.msra.gmra.mrb[56].mxu0 %vm498_vm1, %v1766_v58 }
 0x704   : > { %3823 = vmatprep.mubr.msk.bf16.mxu0 %vm498_vm1, %v1768_v22  ;;  %v3462_v22 = vunpack.c.l.bf16 %v3493_v24 }
 0x70b   : > { %3824 = vmatmul.mubr.msk.bf16.gmra.mrb[60].mxu0 %vm498_vm1, %v1770_v52  ;;  %v3466_v52 = vunpack.c.l.bf16 %v3494_v27 }
 0x787   : > { %v3805_v47 = vpop.f32.mrb[24].mxu1 }
 0x788   : > { %v1732_v7 = vpop.f32.mrb[25].mxu1  ;;  %v5164_v18 = vadd.f32 %v3805_v47, %v5892_v36 }
 0x789   : > { %v5160_v6 = vadd.f32 %v5891_v8, %v1732_v7  ;;  %v3806_v37 = vpop.f32.mrb[26].mxu1  ;;  %v3463_v7 = vunpack.c.h.bf16 %v3493_v24 }
 0x78a   : > { %v1735_v41 = vpop.f32.mrb[27].mxu1  ;;  %v5177_v53 = vadd.f32 %v3806_v37, %v5894_v51  ;;  %v1874_v11 = vsel %vm689_vm2, %v5164_v18, -inf }
 0x78b   : > { %v5169_v9 = vadd.f32 %v5893_v3, %v1735_v41  ;;  %v1868_v58 = vsel %vm689_vm2, %v5160_v6, -inf }
 0x78c   : > { %1869 = vmax.xlane.f32.xlu0 %v1868_v58  ;;  %v1877_v61 = vsel %vm689_vm2, %v5177_v53, -inf }
 0x78d   : > { %v1871_v16 = vsel %vm689_vm2, %v5169_v9, -inf }
 0x78e   : > { %1872 = vmax.xlane.f32.xlu1 %v1871_v16  ;;  %v3467_v16 = vunpack.c.h.bf16 %v3494_v27 }
 0x790   : > { %1875 = vmax.xlane.f32.xlu0 %v1874_v11 }
 0x792   : > { %v5181_v4 = vpop.f32.mrb[48].mxu0 }
 0x793   : > { %v5183_v59 = vpop.f32.mrb[49].mxu0 }
 0x794   : > { %v5187_v55 = vpop.f32.mrb[50].mxu0  ;;  %1878 = vmax.xlane.f32.xlu0 %v1877_v61 }
 0x795   : > { %v5191_v63 = vpop.f32.mrb[51].mxu0 }
 0x7cc   : > { %v3809_v47 = vpop.f32.mrb[28].mxu1 }
 0x7cd   : > { %v1748_v37 = vpop.f32.mrb[29].mxu1  ;;  %v5207_v57 = vadd.f32 %v3809_v47, %v3466_v52 }
 0x7ce   : > { %v5201_v41 = vadd.f32 %v3462_v22, %v1748_v37  ;;  %v5203_v58 = vpop.f32.mrb[52].mxu0  ;;  %v3810_v11 = vpop.f32.mrb[30].mxu1 }
 0x7cf   : > { %5923 = vst [vmem:[#allocation18_spill] sm:$0xff] %v5203_v58  ;;  %v5205_v61 = vpop.f32.mrb[53].mxu0  ;;  %v1751_v17 = vpop.f32.mrb[31].mxu1  ;;  %v5219_v27 = vadd.f32 %v3810_v11, %v3467_v16  ;;  %v1886_v47 = vsel %vm689_vm2, %v5207_v57, -inf }
 0x7d0   : > { %5924 = vst [vmem:[#allocation19_spill] sm:$0xff] %v5205_v61  ;;  %v5209_v15 = vadd.f32 %v3463_v7, %v1751_v17  ;;  %v5211_v32 = vpop.f32.mrb[54].mxu0  ;;  %v1880_v0 = vsel %vm689_vm2, %v5201_v41, -inf }
 0x7d1   : > { %5925 = vst [vmem:[#allocation20_spill] sm:$0xff] %v5211_v32  ;;  %v5217_v37 = vpop.f32.mrb[55].mxu0  ;;  %1881 = vmax.xlane.f32.xlu1 %v1880_v0  ;;  %v1889_v24 = vsel %vm689_vm2, %v5219_v27, -inf }
 0x7d2   : > { %5926 = vst [vmem:[#allocation21_spill] sm:$0xff] %v5217_v37  ;;  %v1883_v17 = vsel %vm689_vm2, %v5209_v15, -inf }
 0x7d3   : > { %1884 = vmax.xlane.f32.xlu0 %v1883_v17 }
 0x7d5   : > { %1887 = vmax.xlane.f32.xlu1 %v1886_v47 }
 0x7d6   : > { %v5227_v8 = vpop.f32.mrb[56].mxu0 }
 0x7d7   : > { %v5231_v36 = vpop.f32.mrb[57].mxu0  ;;  %1890 = vmax.xlane.f32.xlu0 %v1889_v24 }
 0x7d8   : > { %v5233_v0 = vpop.f32.mrb[58].mxu0 }
 0x7d9   : > { %v5235_v11 = vpop.f32.mrb[59].mxu0 }
 0x7de   : > { %v3825_v42 = vpop.f32.mrb[60].mxu0 }
 0x7df   : > { %v5237_v3 = vadd.f32 %v3825_v42, %v3466_v52  ;;  %v1853_v17 = vpop.f32.mrb[61].mxu0 }
 0x7e0   : > { %v5239_v51 = vadd.f32 %v3462_v22, %v1853_v17  ;;  %v3826_v60 = vpop.f32.mrb[62].mxu0 }
 0x7e1   : > { %v5241_v47 = vadd.f32 %v3826_v60, %v3467_v16  ;;  %v1856_v31 = vpop.f32.mrb[63].mxu0 }
 0x7e2   : > { %v5243_v13 = vadd.f32 %v3463_v7, %v1856_v31 }
 0x7e6   : > { %2052 = vrot.lane.b32.xlu1 %v4475_v20, %s4400_s19 }
 0x7ea   : > { %2056 = vrot.lane.b32.xlu1 %v4485_v30, %s4400_s19 }
 0x7ed   : > { %2054 = vrot.lane.b32.xlu0 %v4473_v19, %s4400_s19 }
 0x7ee   : > { %2141 = vrot.lane.b32.xlu1 %v4493_v40, %s4400_s19 }
 0x7f1   : > { %2058 = vrot.lane.b32.xlu0 %v4483_v29, %s4400_s19 }
 0x7f2   : > { %2255 = vrot.lane.b32.xlu1 %v4475_v20, %s4401_s20 }
 0x7f5   : > { %2143 = vrot.lane.b32.xlu0 %v4491_v39, %s4400_s19 }
 0x7f6   : > { %2145 = vrot.lane.b32.xlu1 %v4503_v50, %s4400_s19 }
 0x7f9   : > { %2147 = vrot.lane.b32.xlu0 %v4501_v49, %s4400_s19 }
 0x7fa   : > { %2257 = vrot.lane.b32.xlu1 %v4473_v19, %s4401_s20 }
 0x7fd   : > { %2360 = vrot.lane.b32.xlu0 %v4493_v40, %s4401_s20 }
 0x7fe   : > { %2259 = vrot.lane.b32.xlu1 %v4485_v30, %s4401_s20 }
 0x802   : > { %2261 = vrot.lane.b32.xlu1 %v4483_v29, %s4401_s20 }
 0x806   : > { %2362 = vrot.lane.b32.xlu1 %v4491_v39, %s4401_s20 }
 0x819   : > { %v1870_v60 = vpop.xlane.xlu0 %1869 }
 0x81a   : > { %v1916_v31 = vsub.f32 %v5160_v6, %v1870_v60 }
 0x81b   : > { %v1873_v42 = vpop.xlane.xlu1 %1872 }
 0x81c   : > { %v1932_v7 = vmul.f32 1.442695, %v1916_v31  ;;  %v1917_v16 = vsub.f32 %v5169_v9, %v1873_v42 }
 0x81d   : > { %v1876_v22 = vpop.xlane.xlu0 %1875 }
 0x81e   : > { %v1918_v52 = vsub.f32 %v5164_v18, %v1876_v22  ;;  %v1934_v2 = vmul.f32 1.442695, %v1917_v16 }
 0x820   : > { %v1936_v24 = vmul.f32 1.442695, %v1918_v52 }
 0x821   : > { %v1879_v17 = vpop.xlane.xlu0 %1878 }
 0x822   : > { %4257 = vpow2.f32 %v1936_v24  ;;  %v1919_v23 = vsub.f32 %v5177_v53, %v1879_v17 }
 0x823   : > { %4259 = vpow2.f32 %v1932_v7 }
 0x824   : > { %v1938_v12 = vmul.f32 1.442695, %v1919_v23 }
 0x826   : > { %4261 = vpow2.f32 %v1938_v12 }
 0x827   : > { %4263 = vpow2.f32 %v1934_v2 }
 0x82c   : > { %v5269_v62 = vpop.eup %4257 }
 0x82d   : > { %v1970_v6 = vsel %vm689_vm2, %v5269_v62, 0.0  ;;  %v5273_v60 = vpop.eup %4259 }
 0x82e   : > { %1971 = vadd.xlane.f32.xlu1 %v1970_v6  ;;  %v1964_v9 = vsel %vm689_vm2, %v5273_v60, 0.0 }
 0x830   : > { %v5275_v18 = vpop.eup %4261 }
 0x831   : > { %v1973_v53 = vsel %vm689_vm2, %v5275_v18, 0.0  ;;  %v5281_v31 = vpop.eup %4263 }
 0x832   : > { %1965 = vadd.xlane.f32.xlu1 %v1964_v9  ;;  %1974 = vadd.xlane.f32.xlu0 %v1973_v53  ;;  %v1967_v2 = vsel %vm689_vm2, %v5281_v31, 0.0 }
 0x836   : > { %1968 = vadd.xlane.f32.xlu0 %v1967_v2 }
 0x85e   : > { %v1882_v12 = vpop.xlane.xlu1 %1881 }
 0x85f   : > { %v1920_v42 = vsub.f32 %v5201_v41, %v1882_v12 }
 0x860   : > { %v1885_v23 = vpop.xlane.xlu0 %1884 }
 0x861   : > { %v1921_v22 = vsub.f32 %v5209_v15, %v1885_v23  ;;  %v1940_v17 = vmul.f32 1.442695, %v1920_v42  ;;  %v5927_v23 = vunpack.c.h.bf16 %v5153_v54 }
 0x862   : > { %v1888_v52 = vpop.xlane.xlu1 %1887 }
 0x863   : > { %v1942_v7 = vmul.f32 1.442695, %v1921_v22  ;;  %v1922_v16 = vsub.f32 %v5207_v57, %v1888_v52 }
 0x864   : > { %v1891_v24 = vpop.xlane.xlu0 %1890 }
 0x865   : > { %4265 = vpow2.f32 %v1942_v7  ;;  %v1944_v6 = vmul.f32 1.442695, %v1922_v16  ;;  %v1923_v9 = vsub.f32 %v5219_v27, %v1891_v24  ;;  %v5294_v27 = vadd.f32 %v5233_v0, %v5927_v23 }
 0x866   : > { %v2053_v53 = vpop.permute.xlu1 %2052  ;;  %v5928_v0 = vunpack.c.h.bf16 %v5148_v25 }
 0x867   : > { %4267 = vpow2.f32 %v1944_v6  ;;  %3827 = vmatprep.subr.bf16.mxu1 %v2053_v53  ;;  %v1946_v10 = vmul.f32 1.442695, %v1923_v9 }
 0x868   : > { %3828 = vmatpush3.bf16.msra.mxu1 %v2053_v53  ;;  %v2055_v2 = vpop.permute.xlu0 %2054  ;;  %4269 = vpow2.f32 %v1940_v17  ;;  %v5309_v24 = vadd.f32 %v5928_v0, %v5235_v11  ;;  %v1901_v17 = vsel %vm689_vm2, %v5294_v27, -inf }
 0x869   : > { %3829 = vmatprep.subr.bf16.mxu1 %v2055_v2  ;;  %4271 = vpow2.f32 %v1946_v10 }
 0x86a   : > { %v2057_v41 = vpop.permute.xlu1 %2056  ;;  %v1895_v11 = vsel %vm689_vm2, %v5309_v24, -inf }
 0x86c   : > { %3830 = vmatpush3.bf16.msra.mxu1 %v2055_v2  ;;  %v2059_v15 = vpop.permute.xlu0 %2058 }
 0x86d   : > { %3831 = vmatprep.subr.bf16.mxu1 %v2057_v41 }
 0x86e   : > { %v2142_v57 = vpop.permute.xlu1 %2141 }
 0x86f   : > { %v5289_v12 = vpop.eup %4265  ;;  %3843 = vmatprep.subr.bf16.mxu0 %v2142_v57 }
 0x870   : > { %3832 = vmatpush3.bf16.msra.mxu1 %v2057_v41  ;;  %3844 = vmatpush3.bf16.msra.mxu0 %v2142_v57  ;;  %v2144_v42 = vpop.permute.xlu0 %2143  ;;  %v1979_v22 = vsel %vm689_vm2, %v5289_v12, 0.0  ;;  %v5929_v41 = vunpack.c.l.bf16 %v5153_v54  ;;  %v5930_v54 = vunpack.c.l.bf16 %v5148_v25  ;;  %v1904_v25 = vsel %vm689_vm2, %v5239_v51, -inf }
 0x871   : > { %v5298_v52 = vpop.eup %4267  ;;  %1980 = vadd.xlane.f32.xlu0 %v1979_v22  ;;  %3833 = vmatprep.subr.bf16.mxu1 %v2059_v15 }
 0x872   : > { %3845 = vmatprep.subr.bf16.mxu0 %v2144_v42  ;;  %v5300_v10 = vpop.permute.xlu1 %2255  ;;  %v1982_v7 = vsel %vm689_vm2, %v5298_v52, 0.0  ;;  %v5304_v16 = vpop.eup %4269  ;;  %v5337_v22 = vadd.f32 %v5930_v54, %v5231_v36 }
 0x873   : > { %1983 = vadd.xlane.f32.xlu1 %v1982_v7  ;;  %v1976_v53 = vsel %vm689_vm2, %v5304_v16, 0.0  ;;  %v5317_v2 = vpop.eup %4271  ;;  %v1907_v7 = vsel %vm689_vm2, %v5243_v13, -inf }
 0x874   : > { %3834 = vmatpush3.bf16.msra.mxu1 %v2059_v15  ;;  %3846 = vmatpush3.bf16.msra.mxu0 %v2144_v42  ;;  %v2148_v6 = vpop.permute.xlu0 %2147  ;;  %v5324_v15 = vadd.f32 %v5227_v8, %v5929_v41  ;;  %v1985_v57 = vsel %vm689_vm2, %v5317_v2, 0.0  ;;  %v1913_v42 = vsel %vm689_vm2, %v5241_v47, -inf  ;;  %v1892_v0 = vsel %vm689_vm2, %v5337_v22, -inf }
 0x875   : > { %1902 = vmax.xlane.f32.xlu0 %v1901_v17  ;;  %3967 = vmatprep.subr.msk.bf16.mxu1 %vm498_vm1, %v5300_v10  ;;  %v1910_v17 = vsel %vm689_vm2, %v5237_v3, -inf }
 0x876   : > { %v2146_v9 = vpop.permute.xlu1 %2145  ;;  %v1898_v8 = vsel %vm689_vm2, %v5324_v15, -inf }
 0x877   : > { %1977 = vadd.xlane.f32.xlu1 %v1976_v53  ;;  %3847 = vmatprep.subr.bf16.mxu0 %v2146_v9 }
 0x878   : > { %3848 = vmatpush3.bf16.msra.mxu0 %v2146_v9  ;;  %v5328_v23 = vpop.permute.xlu0 %2360 }
 0x879   : > { %1896 = vmax.xlane.f32.xlu0 %v1895_v11  ;;  %3849 = vmatprep.subr.bf16.mxu0 %v2148_v6 }
 0x87a   : > { %v2258_v36 = vpop.permute.xlu1 %2257 }
 0x87b   : > { %1986 = vadd.xlane.f32.xlu1 %v1985_v57 }
 0x87c   : > { %3850 = vmatpush3.bf16.msra.mxu0 %v2148_v6 }
 0x87d   : > { %1914 = vmax.xlane.f32.xlu0 %v1913_v42  ;;  %3971 = vmatprep.subr.msk.bf16.mxu0 %vm498_vm1, %v5328_v23 }
 0x87e   : > { %v2260_v6 = vpop.permute.xlu1 %2259 }
 0x87f   : > { %1899 = vmax.xlane.f32.xlu1 %v1898_v8 }
 0x881   : > { %1908 = vmax.xlane.f32.xlu0 %v1907_v7 }
 0x882   : > { %v2262_v9 = vpop.permute.xlu1 %2261 }
 0x883   : > { %1893 = vmax.xlane.f32.xlu1 %v1892_v0 }
 0x886   : > { %v5353_v53 = vpop.permute.xlu1 %2362 }
 0x887   : > { %1911 = vmax.xlane.f32.xlu1 %v1910_v17 }
 0x88b   : > { %1905 = vmax.xlane.f32.xlu1 %v1904_v25 }
 0x897   : > { %2247 = vrot.lane.b32.xlu0 %v4475_v20, %s4402_s22 }
 0x89c   : > { %2249 = vrot.lane.b32.xlu1 %v4473_v19, %s4402_s22 }
 0x8bb   : > { %v1972_v11 = vpop.xlane.xlu1 %1971 }
 0x8bf   : > { %v1966_v41 = vpop.xlane.xlu1 %1965  ;;  %v1975_v57 = vpop.xlane.xlu0 %1974 }
 0x8c0   : > { %4273 = vrcp.f32 %v1975_v57 }
 0x8c1   : > { %4275 = vrcp.f32 %v1966_v41 }
 0x8c2   : > { %4277 = vrcp.f32 %v1972_v11  ;;  %v2276_v11 = vsel %vm498_vm1, %v5300_v10, 0 }
 0x8c3   : > { %v1969_v42 = vpop.xlane.xlu0 %1968 }
 0x8c4   : > { %4279 = vrcp.f32 %v1969_v42 }
 0x8ca   : > { %v4274_v54 = vpop.eup %4273 }
 0x8cb   : > { %v4276_v8 = vpop.eup %4275  ;;  %v2031_v17 = vmul.f32 %v4274_v54, %v5275_v18  ;;  %v2279_v18 = vsel %vm498_vm1, %v2258_v36, 0 }
 0x8cc   : > { %v4278_v7 = vpop.eup %4277  ;;  %v2028_v25 = vmul.f32 %v4276_v8, %v5273_v60  ;;  %v2282_v60 = vsel %vm498_vm1, %v2260_v6, 0 }
 0x8cd   : > { %v2030_v38 = vmul.f32 %v4278_v7, %v5269_v62 }
 0x8ce   : > { %v4280_v0 = vpop.eup %4279 }
 0x8cf   : > { %v2029_v45 = vmul.f32 %v4280_v0, %v5281_v31  ;;  %v2045_v34 = vpack.c.bf16 %v2031_v17, %v2030_v38 }
 0x8d1   : > { %v2044_v28 = vpack.c.bf16 %v2029_v45, %v2028_v25 }
 0x8d3   : > { %3835 = vmatprep.mubr.msk.bf16.mxu1 %vm689_vm2, %v2044_v28  ;;  %v2285_v28 = vsel %vm498_vm1, %v2262_v9, 0 }
 0x8d4   : > { %3836 = vmatmul.mubr.msk.bf16.vlgmr.msra.gmra.mrb[32].mxu1 %vm689_vm2, %v2045_v34 }
 0x8d5   : > { %3860 = vmatpush3.bf16.xpose.msra.mxu1 %v2276_v11 }
 0x8d6   : > { %3968 = vmatprep.subr.msk.bf16.mxu1 %vm498_vm1, %v2258_v36 }
 0x8dd   : > { %3862 = vmatpush3.bf16.xpose.msra.mxu1 %v2279_v18 }
 0x8de   : > { %3969 = vmatprep.subr.msk.bf16.mxu1 %vm498_vm1, %v2260_v6 }
 0x8e5   : > { %3864 = vmatpush3.bf16.xpose.msra.mxu1 %v2282_v60 }
 0x8e6   : > { %3970 = vmatprep.subr.msk.bf16.mxu1 %vm498_vm1, %v2262_v9 }
 0x8ed   : > { %3866 = vmatpush3.bf16.xpose.msra.mxu1 %v2285_v28 }
 0x8fe   : > { %v1981_v45 = vpop.xlane.xlu0 %1980 }
 0x8ff   : > { %4281 = vrcp.f32 %v1981_v45 }
 0x900   : > { %v1984_v34 = vpop.xlane.xlu1 %1983 }
 0x902   : > { %v1903_v38 = vpop.xlane.xlu0 %1902 }
 0x903   : > { %v1927_v36 = vsub.f32 %v5294_v27, %v1903_v38 }
 0x904   : > { %v1978_v62 = vpop.xlane.xlu1 %1977 }
 0x905   : > { %4283 = vrcp.f32 %v1978_v62  ;;  %v1954_v9 = vmul.f32 1.442695, %v1927_v36 }
 0x906   : > { %v1897_v31 = vpop.xlane.xlu0 %1896  ;;  %4285 = vrcp.f32 %v1984_v34 }
 0x907   : > { %v1925_v8 = vsub.f32 %v5309_v24, %v1897_v31 }
 0x908   : > { %v1987_v10 = vpop.xlane.xlu1 %1986 }
 0x909   : > { %4287 = vrcp.f32 %v1987_v10  ;;  %v4282_v57 = vpop.eup %4281  ;;  %v1950_v45 = vmul.f32 1.442695, %v1925_v8 }
 0x90a   : > { %v1915_v41 = vpop.xlane.xlu0 %1914  ;;  %v2033_v25 = vmul.f32 %v4282_v57, %v5289_v12 }
 0x90c   : > { %v1900_v6 = vpop.xlane.xlu1 %1899 }
 0x90d   : > { %v1926_v42 = vsub.f32 %v5324_v15, %v1900_v6 }
 0x90e   : > { %v1909_v27 = vpop.xlane.xlu0 %1908 }
 0x90f   : > { %v4284_v54 = vpop.eup %4283  ;;  %v1952_v7 = vmul.f32 1.442695, %v1926_v42 }
 0x910   : > { %v1894_v0 = vpop.xlane.xlu1 %1893  ;;  %v2032_v17 = vmul.f32 %v4284_v54, %v5304_v16  ;;  %v4286_v11 = vpop.eup %4285  ;;  %v1929_v54 = vsub.f32 %v5243_v13, %v1909_v27 }
 0x911   : > { %4289 = vpow2.f32 %v1952_v7  ;;  %v1924_v18 = vsub.f32 %v5337_v22, %v1894_v0  ;;  %v2034_v24 = vmul.f32 %v4286_v11, %v5298_v52 }
 0x912   : > { %v2046_v60 = vpack.c.bf16 %v2033_v25, %v2032_v17  ;;  %4291 = vpow2.f32 %v1954_v9  ;;  %v2248_v12 = vpop.permute.xlu0 %2247  ;;  %v1958_v9 = vmul.f32 1.442695, %v1929_v54  ;;  %v1931_v17 = vsub.f32 %v5241_v47, %v1915_v41 }
 0x913   : > { %v4288_v28 = vpop.eup %4287  ;;  %v1948_v15 = vmul.f32 1.442695, %v1924_v18 }
 0x914   : > { %v1912_v34 = vpop.xlane.xlu1 %1911  ;;  %3839 = vmatprep.mubr.msk.bf16.mxu1 %vm689_vm2, %v2046_v60  ;;  %v2035_v38 = vmul.f32 %v4288_v28, %v5317_v2  ;;  %v1962_v11 = vmul.f32 1.442695, %v1931_v17 }
 0x915   : > { %4293 = vpow2.f32 %v1948_v15  ;;  %v1930_v8 = vsub.f32 %v5237_v3, %v1912_v34 }
 0x916   : > { %v2047_v16 = vpack.c.bf16 %v2035_v38, %v2034_v24  ;;  %4295 = vpow2.f32 %v1950_v45 }
 0x917   : > { %4297 = vpow2.f32 %v1958_v9  ;;  %v1960_v7 = vmul.f32 1.442695, %v1930_v8 }
 0x918   : > { %3840 = vmatmul.mubr.msk.bf16.gmra.mrb[36].mxu1 %vm689_vm2, %v2047_v16  ;;  %v1906_v22 = vpop.xlane.xlu1 %1905 }
 0x919   : > { %3867 = vmatprep.mubr.msk.bf16.mxu1 %vm498_vm1, %v2248_v12  ;;  %v1928_v0 = vsub.f32 %v5239_v51, %v1906_v22  ;;  %4299 = vpow2.f32 %v1960_v7 }
 0x91b   : > { %v5380_v62 = vpop.eup %4289  ;;  %v1956_v25 = vmul.f32 1.442695, %v1928_v0 }
 0x91c   : > { %v1994_v31 = vsel %vm689_vm2, %v5380_v62, 0.0  ;;  %v5384_v10 = vpop.eup %4291  ;;  %v2250_v2 = vpop.permute.xlu1 %2249 }
 0x91d   : > { %1995 = vadd.xlane.f32.xlu0 %v1994_v31  ;;  %v1997_v6 = vsel %vm689_vm2, %v5384_v10, 0.0  ;;  %4301 = vpow2.f32 %v1956_v25 }
 0x91e   : > { %4303 = vpow2.f32 %v1962_v11  ;;  %v2381_v11 = vsel %vm498_vm1, %v5328_v23, 0 }
 0x91f   : > { %v5386_v52 = vpop.eup %4293 }
 0x920   : > { %3868 = vmatmul.mubr.msk.bf16.vlgmr.msra.gmra.mrb[40].mxu1 %vm498_vm1, %v2250_v2  ;;  %v1988_v36 = vsel %vm689_vm2, %v5386_v52, 0.0  ;;  %v4296_v57 = vpop.eup %4295 }
 0x921   : > { %1989 = vadd.xlane.f32.xlu1 %v1988_v36  ;;  %1998 = vadd.xlane.f32.xlu0 %v1997_v6  ;;  %v1991_v42 = vsel %vm689_vm2, %v4296_v57, 0.0  ;;  %v5402_v18 = vpop.eup %4297 }
 0x922   : > { %v2003_v60 = vsel %vm689_vm2, %v5402_v18, 0.0 }
 0x923   : > { %v5406_v13 = vpop.eup %4299 }
 0x924   : > { %v2006_v3 = vsel %vm689_vm2, %v5406_v13, 0.0 }
 0x925   : > { %1992 = vadd.xlane.f32.xlu0 %v1991_v42 }
 0x927   : > { %v5410_v27 = vpop.eup %4301 }
 0x928   : > { %v2000_v51 = vsel %vm689_vm2, %v5410_v27, 0.0  ;;  %v5414_v47 = vpop.eup %4303 }
 0x929   : > { %v2009_v41 = vsel %vm689_vm2, %v5414_v47, 0.0 }
 0x932   : > { %2251 = vrot.lane.b32.xlu1 %v4485_v30, %s4402_s22 }
 0x93b   : > { %2364 = vrot.lane.b32.xlu0 %v4503_v50, %s4401_s20 }
 0x956   : > { %2004 = vadd.xlane.f32.xlu1 %v2003_v60 }
 0x95a   : > { %2007 = vadd.xlane.f32.xlu0 %v2006_v3 }
 0x95e   : > { %2001 = vadd.xlane.f32.xlu0 %v2000_v51 }
 0x962   : > { %2010 = vadd.xlane.f32.xlu0 %v2009_v41 }
 0x967   : > { %2366 = vrot.lane.b32.xlu1 %v4501_v49, %s4401_s20 }
 0x96b   : > { %2354 = vrot.lane.b32.xlu1 %v4491_v39, %s4402_s22 }
 0x96f   : > { %2358 = vrot.lane.b32.xlu1 %v4501_v49, %s4402_s22 }
 0x978   : > { %2253 = vrot.lane.b32.xlu0 %v4483_v29, %s4402_s22 }
 0x97c   : > { %2352 = vrot.lane.b32.xlu0 %v4493_v40, %s4402_s22 }
 0x980   : > { %2356 = vrot.lane.b32.xlu0 %v4503_v50, %s4402_s22  ;;  %s5847_s22 = scalar_lea.vmem %s5890_s6, %s3419_s16 }
 0x9a7   : > { %v5430_v28 = vpop.f32.mrb[32].mxu1 }
 0x9a8   : > { %v5432_v45 = vpop.f32.mrb[33].mxu1 }
 0x9a9   : > { %v5434_v15 = vpop.f32.mrb[34].mxu1 }
 0x9aa   : > { %v5438_v24 = vpop.f32.mrb[35].mxu1  ;;  %v1996_v16 = vpop.xlane.xlu0 %1995 }
 0x9ae   : > { %v1990_v12 = vpop.xlane.xlu1 %1989  ;;  %v1999_v22 = vpop.xlane.xlu0 %1998 }
 0x9af   : > { %4305 = vrcp.f32 %v1999_v22 }
 0x9b0   : > { %4307 = vrcp.f32 %v1990_v12 }
 0x9b1   : > { %4309 = vrcp.f32 %v1996_v16 }
 0x9b2   : > { %v2252_v31 = vpop.permute.xlu1 %2251  ;;  %v1993_v2 = vpop.xlane.xlu0 %1992 }
 0x9b3   : > { %4311 = vrcp.f32 %v1993_v2  ;;  %3871 = vmatprep.mubr.msk.bf16.mxu1 %vm498_vm1, %v2252_v31  ;;  %v5471_v31 = vld [vmem:[%s5887_s3 + $0x60] sm:$0xff]  }
 0x9b9   : > { %v4306_v36 = vpop.eup %4305 }
 0x9ba   : > { %v4308_v6 = vpop.eup %4307  ;;  %v2039_v9 = vmul.f32 %v4306_v36, %v5384_v10  ;;  %v2384_v10 = vsel %vm498_vm1, %v5353_v53, 0 }
 0x9bb   : > { %v4310_v42 = vpop.eup %4309  ;;  %v2036_v8 = vmul.f32 %v4308_v6, %v5386_v52  ;;  %v2365_v52 = vpop.permute.xlu0 %2364  ;;  %v5478_v6 = vld [vmem:[%s5887_s3 + $0x68] sm:$0xff]  }
 0x9bc   : > { %v2038_v0 = vmul.f32 %v4310_v42, %v5380_v62  ;;  %v2387_v62 = vsel %vm498_vm1, %v2365_v52, 0  ;;  %v5896_v42 = vunpack.c.l.bf16 %v5471_v31 }
 0x9bd   : > { %v4312_v54 = vpop.eup %4311 }
 0x9be   : > { %v2037_v7 = vmul.f32 %v4312_v54, %v4296_v57  ;;  %v2049_v25 = vpack.c.bf16 %v2039_v9, %v2038_v0  ;;  %v5898_v54 = vunpack.c.l.bf16 %v5478_v6 }
 0x9c0   : > { %v2048_v17 = vpack.c.bf16 %v2037_v7, %v2036_v8  ;;  %v5895_v8 = vunpack.c.h.bf16 %v5471_v31 }
 0x9c2   : > { %3851 = vmatprep.mubr.msk.bf16.mxu0 %vm689_vm2, %v2048_v17 }
 0x9c3   : > { %3852 = vmatmul.mubr.msk.bf16.vlgmr.msra.gmra.mrb[64].mxu0 %vm689_vm2, %v2049_v25 }
 0x9c4   : > { %3876 = vmatpush3.bf16.xpose.msra.mxu0 %v2381_v11 }
 0x9c5   : > { %3972 = vmatprep.subr.msk.bf16.mxu0 %vm498_vm1, %v5353_v53 }
 0x9cc   : > { %3878 = vmatpush3.bf16.xpose.msra.mxu0 %v2384_v10 }
 0x9cd   : > { %3973 = vmatprep.subr.msk.bf16.mxu0 %vm498_vm1, %v2365_v52 }
 0x9d4   : > { %3880 = vmatpush3.bf16.xpose.msra.mxu0 %v2387_v62 }
 0x9e3   : > { %v2005_v57 = vpop.xlane.xlu1 %2004 }
 0x9e4   : > { %4313 = vrcp.f32 %v2005_v57  ;;  %v5897_v57 = vunpack.c.h.bf16 %v5478_v6 }
 0x9e7   : > { %v2367_v60 = vpop.permute.xlu1 %2366  ;;  %v2008_v3 = vpop.xlane.xlu0 %2007 }
 0x9e8   : > { %v2390_v51 = vsel %vm498_vm1, %v2367_v60, 0  ;;  %3974 = vmatprep.subr.msk.bf16.mxu0 %vm498_vm1, %v2367_v60 }
 0x9e9   : > { %3882 = vmatpush3.bf16.xpose.msra.mxu0 %v2390_v51 }
 0x9eb   : > { %v5458_v23 = vpop.f32.mrb[36].mxu1  ;;  %v2002_v41 = vpop.xlane.xlu0 %2001 }
 0x9ec   : > { %v5460_v53 = vpop.f32.mrb[37].mxu1  ;;  %4315 = vrcp.f32 %v2002_v41 }
 0x9ed   : > { %v5462_v16 = vpop.f32.mrb[38].mxu1  ;;  %4317 = vrcp.f32 %v2008_v3 }
 0x9ee   : > { %v5466_v22 = vpop.f32.mrb[39].mxu1  ;;  %v4314_v17 = vpop.eup %4313 }
 0x9ef   : > { %v2011_v36 = vpop.xlane.xlu0 %2010  ;;  %v2041_v41 = vmul.f32 %v4314_v17, %v5402_v18 }
 0x9f0   : > { %4319 = vrcp.f32 %v2011_v36 }
 0x9f3   : > { %v3869_v9 = vpop.f32.mrb[40].mxu1  ;;  %v2254_v7 = vpop.permute.xlu0 %2253 }
 0x9f4   : > { %v2321_v0 = vpop.f32.mrb[41].mxu1  ;;  %3872 = vmatmul.mubr.msk.bf16.gmra.mrb[44].mxu1 %vm498_vm1, %v2254_v7  ;;  %v5490_v62 = vadd.f32 %v3869_v9, %v5898_v54 }
 0x9f5   : > { %v5485_v25 = vadd.f32 %v5896_v42, %v2321_v0  ;;  %v3870_v11 = vpop.f32.mrb[42].mxu1 }
 0x9f6   : > { %v2324_v10 = vpop.f32.mrb[43].mxu1  ;;  %v4316_v52 = vpop.eup %4315  ;;  %v2333_v2 = vadd.f32 %v3870_v11, %v5897_v57 }
 0x9f7   : > { %v2325_v60 = vadd.f32 %v5895_v8, %v2324_v10  ;;  %v2457_v3 = vsel %vm689_vm2, %v5485_v25, -inf  ;;  %v2040_v51 = vmul.f32 %v4316_v52, %v5410_v27  ;;  %v4318_v36 = vpop.eup %4317  ;;  %v2463_v10 = vsel %vm689_vm2, %v5490_v62, -inf  ;;  %v2353_v52 = vpop.permute.xlu0 %2352 }
 0x9f8   : > { %2458 = vmax.xlane.f32.xlu0 %v2457_v3  ;;  %v2042_v3 = vmul.f32 %v4318_v36, %v5406_v13  ;;  %v2466_v17 = vsel %vm689_vm2, %v2333_v2, -inf  ;;  %v2355_v11 = vpop.permute.xlu1 %2354 }
 0x9f9   : > { %v2460_v7 = vsel %vm689_vm2, %v2325_v60, -inf  ;;  %v2050_v0 = vpack.c.bf16 %v2041_v41, %v2040_v51 }
 0x9fa   : > { %2461 = vmax.xlane.f32.xlu1 %v2460_v7  ;;  %v4320_v9 = vpop.eup %4319 }
 0x9fb   : > { %3855 = vmatprep.mubr.msk.bf16.mxu0 %vm689_vm2, %v2050_v0  ;;  %v2043_v27 = vmul.f32 %v4320_v9, %v5414_v47  ;;  %v2357_v51 = vpop.permute.xlu0 %2356 }
 0x9fc   : > { %2464 = vmax.xlane.f32.xlu0 %v2463_v10  ;;  %v2359_v41 = vpop.permute.xlu1 %2358 }
 0x9fd   : > { %v2051_v18 = vpack.c.bf16 %v2043_v27, %v2042_v3 }
 0x9ff   : > { %3856 = vmatmul.mubr.msk.bf16.gmra.mrb[68].mxu0 %vm689_vm2, %v2051_v18 }
 0xa00   : > { %2467 = vmax.xlane.f32.xlu0 %v2466_v17  ;;  %3883 = vmatprep.mubr.msk.bf16.mxu0 %vm498_vm1, %v2353_v52  ;;  %v3497_v52 = vld [vmem:[%s5887_s3 + $0x70] sm:$0xff]  }
 0xa01   : > { %v3478_v7 = vunpack.c.l.bf16 %v3497_v52  ;;  %v3479_v38 = vunpack.c.h.bf16 %v3497_v52 }
 0xa07   : > { %3884 = vmatmul.mubr.msk.bf16.vlgmr.msra.gmra.mrb[72].mxu0 %vm498_vm1, %v2355_v11 }
 0xa08   : > { %3887 = vmatprep.mubr.msk.bf16.mxu0 %vm498_vm1, %v2357_v51 }
 0xa0f   : > { %3888 = vmatmul.mubr.msk.bf16.gmra.mrb[76].mxu0 %vm498_vm1, %v2359_v41  ;;  %v3498_v41 = vld [vmem:[%s5887_s3 + $0x78] sm:$0xff]  }
 0xa10   : > { %v3482_v12 = vunpack.c.l.bf16 %v3498_v41 }
 0xa85   : > { %v2459_v10 = vpop.xlane.xlu0 %2458 }
 0xa86   : > { %v2505_v37 = vsub.f32 %v5485_v25, %v2459_v10 }
 0xa87   : > { %v2462_v17 = vpop.xlane.xlu1 %2461 }
 0xa88   : > { %v2506_v11 = vsub.f32 %v2325_v60, %v2462_v17  ;;  %v2521_v32 = vmul.f32 1.442695, %v2505_v37 }
 0xa89   : > { %v2465_v3 = vpop.xlane.xlu0 %2464 }
 0xa8a   : > { %v2523_v9 = vmul.f32 1.442695, %v2506_v11 }
 0xa8d   : > { %v2468_v27 = vpop.xlane.xlu0 %2467 }
 0xa8e   : > { %v2508_v18 = vsub.f32 %v2333_v2, %v2468_v27  ;;  %v3483_v2 = vunpack.c.h.bf16 %v3498_v41 }
 0xa90   : > { %v2527_v51 = vmul.f32 1.442695, %v2508_v18 }
 0xa92   : > { %4321 = vpow2.f32 %v2527_v51 }
 0xa93   : > { %4323 = vpow2.f32 %v2523_v9 }
 0xa96   : > { %v5513_v13 = vpop.f32.mrb[64].mxu0 }
 0xa97   : > { %v5515_v47 = vpop.f32.mrb[65].mxu0 }
 0xa98   : > { %v5517_v36 = vpop.f32.mrb[66].mxu0 }
 0xa99   : > { %v5521_v0 = vpop.f32.mrb[67].mxu0 }
 0xa9c   : > { %v5535_v11 = vpop.eup %4321 }
 0xa9d   : > { %v2562_v41 = vsel %vm689_vm2, %v5535_v11, 0.0 }
 0xac7   : > { %v3873_v34 = vpop.f32.mrb[44].mxu1 }
 0xac8   : > { %v2337_v8 = vpop.f32.mrb[45].mxu1  ;;  %v2346_v54 = vadd.f32 %v3873_v34, %v3482_v12 }
 0xac9   : > { %v2338_v42 = vadd.f32 %v3478_v7, %v2337_v8  ;;  %v3874_v27 = vpop.f32.mrb[46].mxu1 }
 0xaca   : > { %v2340_v57 = vpop.f32.mrb[47].mxu1  ;;  %v2349_v18 = vadd.f32 %v3874_v27, %v3483_v2  ;;  %v2475_v46 = vsel %vm689_vm2, %v2346_v54, -inf }
 0xacb   : > { %v2341_v14 = vadd.f32 %v3479_v38, %v2340_v57  ;;  %v2469_v60 = vsel %vm689_vm2, %v2338_v42, -inf }
 0xacc   : > { %2470 = vmax.xlane.f32.xlu1 %v2469_v60  ;;  %v2478_v52 = vsel %vm689_vm2, %v2349_v18, -inf }
 0xacd   : > { %v2472_v17 = vsel %vm689_vm2, %v2341_v14, -inf }
 0xace   : > { %2473 = vmax.xlane.f32.xlu0 %v2472_v17 }
 0xad0   : > { %2476 = vmax.xlane.f32.xlu1 %v2475_v46  ;;  %v5549_v46 = vpop.eup %4323 }
 0xad1   : > { %v2556_v60 = vsel %vm689_vm2, %v5549_v46, 0.0 }
 0xad2   : > { %v5537_v8 = vpop.f32.mrb[68].mxu0  ;;  %2479 = vmax.xlane.f32.xlu0 %v2478_v52 }
 0xad3   : > { %5931 = vst [vmem:[#allocation22_spill] sm:$0xff] %v5537_v8  ;;  %v5539_v34 = vpop.f32.mrb[69].mxu0 }
 0xad4   : > { %5932 = vst [vmem:[#allocation23_spill] sm:$0xff] %v5539_v34  ;;  %v5541_v57 = vpop.f32.mrb[70].mxu0 }
 0xad5   : > { %5933 = vst [vmem:[#allocation24_spill] sm:$0xff] %v5541_v57  ;;  %v5545_v51 = vpop.f32.mrb[71].mxu0 }
 0xad6   : > { %5934 = vst [vmem:[#allocation25_spill] sm:$0xff] %v5545_v51  ;;  %2563 = vadd.xlane.f32.xlu0 %v2562_v41 }
 0xada   : > { %v3885_v17 = vpop.f32.mrb[72].mxu0  ;;  %2557 = vadd.xlane.f32.xlu0 %v2556_v60  ;;  %v2507_v60 = vsub.f32 %v5490_v62, %v2465_v3 }
 0xadb   : > { %v2426_v52 = vpop.f32.mrb[73].mxu0 }
 0xadc   : > { %v3886_v43 = vpop.f32.mrb[74].mxu0  ;;  %v2525_v58 = vmul.f32 1.442695, %v2507_v60 }
 0xadd   : > { %v2429_v48 = vpop.f32.mrb[75].mxu0 }
 0xade   : > { %4325 = vpow2.f32 %v2525_v58 }
 0xadf   : > { %4327 = vpow2.f32 %v2521_v32 }
 0xae1   : > { %2641 = vrot.lane.b32.xlu1 %v4475_v20, %s4403_s8 }
 0xae2   : > { %v3889_v9 = vpop.f32.mrb[76].mxu0 }
 0xae3   : > { %v5557_v8 = vadd.f32 %v3889_v9, %v3482_v12  ;;  %v2442_v57 = vpop.f32.mrb[77].mxu0 }
 0xae4   : > { %v5559_v61 = vadd.f32 %v3478_v7, %v2442_v57  ;;  %v3890_v27 = vpop.f32.mrb[78].mxu0 }
 0xae5   : > { %v5561_v41 = vadd.f32 %v3890_v27, %v3483_v2  ;;  %v2445_v34 = vpop.f32.mrb[79].mxu0 }
 0xae6   : > { %v5563_v51 = vadd.f32 %v3479_v38, %v2445_v34 }
 0xae8   : > { %v5567_v20 = vpop.eup %4325 }
 0xae9   : > { %v2559_v12 = vsel %vm689_vm2, %v5567_v20, 0.0  ;;  %v5571_v7 = vpop.eup %4327 }
 0xaea   : > { %v2553_v38 = vsel %vm689_vm2, %v5571_v7, 0.0 }
 0xb05   : > { %2560 = vadd.xlane.f32.xlu1 %v2559_v12 }
 0xb09   : > { %2554 = vadd.xlane.f32.xlu1 %v2553_v38 }
 0xb59   : > { %v2471_v2 = vpop.xlane.xlu1 %2470 }
 0xb5a   : > { %v2509_v62 = vsub.f32 %v2338_v42, %v2471_v2  ;;  %v5935_v2 = vunpack.c.l.bf16 %v5478_v6 }
 0xb5b   : > { %v2474_v3 = vpop.xlane.xlu0 %2473 }
 0xb5c   : > { %v2510_v10 = vsub.f32 %v2341_v14, %v2474_v3  ;;  %v2529_v58 = vmul.f32 1.442695, %v2509_v62  ;;  %v2435_v62 = vadd.f32 %v3885_v17, %v5935_v2 }
 0xb5d   : > { %v2477_v25 = vpop.xlane.xlu1 %2476 }
 0xb5e   : > { %v2511_v37 = vsub.f32 %v2346_v54, %v2477_v25  ;;  %v2531_v27 = vmul.f32 1.442695, %v2510_v10  ;;  %v5936_v25 = vunpack.c.h.bf16 %v5478_v6  ;;  %v2499_v6 = vsel %vm689_vm2, %v5557_v8, -inf }
 0xb5f   : > { %v2480_v32 = vpop.xlane.xlu0 %2479 }
 0xb60   : > { %v2533_v34 = vmul.f32 1.442695, %v2511_v37  ;;  %v2512_v57 = vsub.f32 %v2349_v18, %v2480_v32  ;;  %v2438_v10 = vadd.f32 %v3886_v43, %v5936_v25 }
 0xb61   : > { %v2642_v9 = vpop.permute.xlu1 %2641 }
 0xb62   : > { %4329 = vpow2.f32 %v2533_v34  ;;  %v2535_v60 = vmul.f32 1.442695, %v2512_v57  ;;  %3891 = vmatprep.subr.bf16.mxu1 %v2642_v9  ;;  %v2487_v34 = vsel %vm689_vm2, %v2435_v62, -inf  ;;  %v5938_v57 = vunpack.c.h.bf16 %v5471_v31 }
 0xb63   : > { %4331 = vpow2.f32 %v2529_v58  ;;  %3892 = vmatpush3.bf16.msra.mxu1 %v2642_v9  ;;  %v5937_v58 = vunpack.c.l.bf16 %v5471_v31  ;;  %v2490_v9 = vsel %vm689_vm2, %v2438_v10, -inf  ;;  %v2496_v31 = vsel %vm689_vm2, %v5563_v51, -inf }
 0xb64   : > { %4333 = vpow2.f32 %v2535_v60  ;;  %v2430_v17 = vadd.f32 %v5938_v57, %v2429_v48  ;;  %v2493_v48 = vsel %vm689_vm2, %v5559_v61, -inf  ;;  %v2564_v60 = vpop.xlane.xlu0 %2563 }
 0xb65   : > { %4335 = vpow2.f32 %v2531_v27  ;;  %v2427_v32 = vadd.f32 %v5937_v58, %v2426_v52  ;;  %v2502_v52 = vsel %vm689_vm2, %v5561_v41, -inf }
 0xb66   : > { %v2484_v43 = vsel %vm689_vm2, %v2430_v17, -inf  ;;  %4337 = vrcp.f32 %v2564_v60 }
 0xb67   : > { %v2481_v27 = vsel %vm689_vm2, %v2427_v32, -inf }
 0xb6c   : > { %v5575_v12 = vpop.eup %4329 }
 0xb6d   : > { %v5577_v42 = vpop.eup %4331  ;;  %v2571_v14 = vsel %vm689_vm2, %v5575_v12, 0.0 }
 0xb6e   : > { %v5581_v54 = vpop.eup %4333  ;;  %2572 = vadd.xlane.f32.xlu1 %v2571_v14  ;;  %v2565_v3 = vsel %vm689_vm2, %v5577_v42, 0.0  ;;  %v2558_v14 = vpop.xlane.xlu0 %2557 }
 0xb6f   : > { %v2574_v18 = vsel %vm689_vm2, %v5581_v54, 0.0  ;;  %v5585_v38 = vpop.eup %4335 }
 0xb70   : > { %2575 = vadd.xlane.f32.xlu0 %v2574_v18  ;;  %v2568_v37 = vsel %vm689_vm2, %v5585_v38, 0.0 }
 0xb72   : > { %2566 = vadd.xlane.f32.xlu1 %v2565_v3  ;;  %v4338_v3 = vpop.eup %4337 }
 0xb74   : > { %2569 = vadd.xlane.f32.xlu0 %v2568_v37  ;;  %v5618_v37 = vmul.f32 %v4338_v3, %v5535_v11 }
 0xb76   : > { %2488 = vmax.xlane.f32.xlu1 %v2487_v34 }
 0xb78   : > { %2491 = vmax.xlane.f32.xlu0 %v2490_v9 }
 0xb7a   : > { %2482 = vmax.xlane.f32.xlu1 %v2481_v27 }
 0xb7c   : > { %2485 = vmax.xlane.f32.xlu0 %v2484_v43 }
 0xb7e   : > { %2500 = vmax.xlane.f32.xlu1 %v2499_v6 }
 0xb80   : > { %2503 = vmax.xlane.f32.xlu0 %v2502_v52 }
 0xb82   : > { %2494 = vmax.xlane.f32.xlu1 %v2493_v48 }
 0xb84   : > { %2497 = vmax.xlane.f32.xlu0 %v2496_v31 }
 0xb92   : > { %v2561_v18 = vpop.xlane.xlu1 %2560 }
 0xb93   : > { %4339 = vrcp.f32 %v2561_v18  ;;  %2643 = vrot.lane.b32.xlu1 %v4473_v19, %s4403_s8 }
 0xb94   : > { %4341 = vrcp.f32 %v2558_v14 }
 0xb96   : > { %v2555_v2 = vpop.xlane.xlu1 %2554 }
 0xb97   : > { %4343 = vrcp.f32 %v2555_v2  ;;  %2647 = vrot.lane.b32.xlu1 %v4483_v29, %s4403_s8 }
 0xb9a   : > { %2645 = vrot.lane.b32.xlu0 %v4485_v30, %s4403_s8 }
 0xb9d   : > { %v4340_v25 = vpop.eup %4339 }
 0xb9e   : > { %v5621_v58 = vmul.f32 %v4340_v25, %v5567_v20  ;;  %v4342_v34 = vpop.eup %4341 }
 0xb9f   : > { %v2618_v29 = vmul.f32 %v4342_v34, %v5549_v46 }
 0xba0   : > { %v2634_v19 = vpack.c.bf16 %v5618_v37, %v5621_v58 }
 0xba1   : > { %v4344_v57 = vpop.eup %4343 }
 0xba2   : > { %v2617_v9 = vmul.f32 %v4344_v57, %v5571_v7 }
 0xba4   : > { %v2633_v27 = vpack.c.bf16 %v2618_v29, %v2617_v9 }
 0xba6   : > { %3899 = vmatprep.mubr.msk.bf16.mxu1 %vm689_vm2, %v2633_v27 }
 0xbfb   : > { %v2573_v30 = vpop.xlane.xlu1 %2572 }
 0xbfd   : > { %v2576_v43 = vpop.xlane.xlu0 %2575 }
 0xbff   : > { %v2567_v6 = vpop.xlane.xlu1 %2566 }
 0xc01   : > { %v2570_v11 = vpop.xlane.xlu0 %2569 }
 0xc03   : > { %v2489_v52 = vpop.xlane.xlu1 %2488 }
 0xc04   : > { %v2515_v48 = vsub.f32 %v2435_v62, %v2489_v52 }
 0xc05   : > { %v2492_v20 = vpop.xlane.xlu0 %2491 }
 0xc06   : > { %v2541_v31 = vmul.f32 1.442695, %v2515_v48  ;;  %v2516_v60 = vsub.f32 %v2438_v10, %v2492_v20 }
 0xc07   : > { %v2483_v14 = vpop.xlane.xlu1 %2482 }
 0xc08   : > { %4345 = vpow2.f32 %v2541_v31  ;;  %v2513_v18 = vsub.f32 %v2427_v32, %v2483_v14  ;;  %v2543_v3 = vmul.f32 1.442695, %v2516_v60 }
 0xc09   : > { %v2486_v2 = vpop.xlane.xlu0 %2485 }
 0xc0a   : > { %v2537_v7 = vmul.f32 1.442695, %v2513_v18  ;;  %v2514_v25 = vsub.f32 %v2430_v17, %v2486_v2 }
 0xc0b   : > { %v2501_v46 = vpop.xlane.xlu1 %2500 }
 0xc0c   : > { %4347 = vpow2.f32 %v2537_v7  ;;  %v2519_v34 = vsub.f32 %v5557_v8, %v2501_v46  ;;  %v2539_v9 = vmul.f32 1.442695, %v2514_v25 }
 0xc0d   : > { %v2504_v57 = vpop.xlane.xlu0 %2503  ;;  %4349 = vpow2.f32 %v2543_v3 }
 0xc0e   : > { %v2549_v29 = vmul.f32 1.442695, %v2519_v34  ;;  %v2520_v62 = vsub.f32 %v5561_v41, %v2504_v57  ;;  %4351 = vrcp.f32 %v2570_v11 }
 0xc0f   : > { %v2495_v27 = vpop.xlane.xlu1 %2494 }
 0xc10   : > { %4353 = vpow2.f32 %v2549_v29  ;;  %v2517_v10 = vsub.f32 %v5559_v61, %v2495_v27  ;;  %v2551_v32 = vmul.f32 1.442695, %v2520_v62 }
 0xc11   : > { %4355 = vrcp.f32 %v2567_v6  ;;  %v2498_v52 = vpop.xlane.xlu0 %2497 }
 0xc12   : > { %v5631_v48 = vpop.eup %4345  ;;  %4357 = vpow2.f32 %v2539_v9  ;;  %v2545_v17 = vmul.f32 1.442695, %v2517_v10  ;;  %v2518_v8 = vsub.f32 %v5563_v51, %v2498_v52 }
 0xc13   : > { %4359 = vrcp.f32 %v2576_v43  ;;  %v2644_v20 = vpop.permute.xlu1 %2643  ;;  %v2583_v31 = vsel %vm689_vm2, %v5631_v48, 0.0 }
 0xc14   : > { %4361 = vpow2.f32 %v2545_v17  ;;  %v2547_v41 = vmul.f32 1.442695, %v2518_v8  ;;  %3893 = vmatprep.subr.bf16.mxu1 %v2644_v20  ;;  %2584 = vadd.xlane.f32.xlu0 %v2583_v31 }
 0xc15   : > { %4363 = vpow2.f32 %v2551_v32  ;;  %3894 = vmatpush3.bf16.msra.mxu1 %v2644_v20  ;;  %v2646_v61 = vpop.permute.xlu0 %2645 }
 0xc16   : > { %v5636_v6 = vpop.eup %4347  ;;  %4365 = vpow2.f32 %v2547_v41  ;;  %3895 = vmatprep.subr.bf16.mxu1 %v2646_v61 }
 0xc17   : > { %v2577_v11 = vsel %vm689_vm2, %v5636_v6, 0.0  ;;  %v5640_v51 = vpop.eup %4349  ;;  %4367 = vrcp.f32 %v2573_v30  ;;  %v2648_v60 = vpop.permute.xlu1 %2647 }
 0xc18   : > { %2578 = vadd.xlane.f32.xlu0 %v2577_v11  ;;  %v4352_v43 = vpop.eup %4351  ;;  %v2586_v3 = vsel %vm689_vm2, %v5640_v51, 0.0 }
 0xc19   : > { %3896 = vmatpush3.bf16.msra.mxu1 %v2646_v61  ;;  %v2622_v25 = vmul.f32 %v4352_v43, %v5585_v38 }
 0xc1a   : > { %v5642_v14 = vpop.eup %4353  ;;  %3897 = vmatprep.subr.bf16.mxu1 %v2648_v60 }
 0xc1b   : > { %v4356_v18 = vpop.eup %4355  ;;  %v2595_v2 = vsel %vm689_vm2, %v5642_v14, 0.0 }
 0xc1c   : > { %v4358_v7 = vpop.eup %4357  ;;  %2596 = vadd.xlane.f32.xlu1 %v2595_v2  ;;  %2587 = vadd.xlane.f32.xlu0 %v2586_v3  ;;  %v2621_v34 = vmul.f32 %v4356_v18, %v5577_v42 }
 0xc1d   : > { %v4360_v30 = vpop.eup %4359  ;;  %3898 = vmatpush3.bf16.msra.mxu1 %v2648_v60  ;;  %v2580_v29 = vsel %vm689_vm2, %v4358_v7, 0.0 }
 0xc1e   : > { %v5649_v46 = vpop.eup %4361  ;;  %v2635_v27 = vpack.c.bf16 %v2622_v25, %v2621_v34  ;;  %v2624_v32 = vmul.f32 %v4360_v30, %v5581_v54  ;;  %v5940_v54 = vpack.i.bf16 %v5097_v1, %v5093_v26 }
 0xc1f   : > { %v5652_v57 = vpop.eup %4363  ;;  %v2589_v9 = vsel %vm689_vm2, %v5649_v46, 0.0 }
 0xc20   : > { %v5657_v62 = vpop.eup %4365  ;;  %2590 = vadd.xlane.f32.xlu1 %v2589_v9  ;;  %2581 = vadd.xlane.f32.xlu0 %v2580_v29  ;;  %v2598_v42 = vsel %vm689_vm2, %v5652_v57, 0.0 }
 0xc21   : > { %3900 = vmatmul.mubr.msk.bf16.vlgmr.msra.gmra.mrb[48].mxu1 %vm689_vm2, %v2634_v19  ;;  %v4368_v38 = vpop.eup %4367  ;;  %v2592_v10 = vsel %vm689_vm2, %v5657_v62, 0.0 }
 0xc22   : > { %3903 = vmatprep.mubr.msk.bf16.mxu1 %vm689_vm2, %v2635_v27  ;;  %v2623_v52 = vmul.f32 %v4368_v38, %v5575_v12  ;;  %v5939_v12 = vpack.i.bf16 %v5101_v44, %v5095_v33 }
 0xc24   : > { %2599 = vadd.xlane.f32.xlu1 %v2598_v42  ;;  %2593 = vadd.xlane.f32.xlu0 %v2592_v10  ;;  %v2636_v17 = vpack.c.bf16 %v2624_v32, %v2623_v52 }
 0xc29   : > { %3904 = vmatmul.mubr.msk.bf16.gmra.mrb[52].mxu1 %vm689_vm2, %v2636_v17  ;;  %v5944_v17 = vpack.i.bf16 %v5125_v21, %v5119_v35  ;;  %v5947_v35 = vpack.i.bf16 %v5187_v55, %v5181_v4  ;;  %v5949_v21 = vpack.i.bf16 %v5517_v36, %v5513_v13  ;;  %v5954_v55 = vld [vmem:[#allocation21_spill] sm:$0xff] }
 0xc35   : > { %2732 = vrot.lane.b32.xlu1 %v4491_v39, %s4403_s8  ;;  %v5941_v39 = vpack.i.bf16 %v5438_v24, %v5432_v45 }
 0xc39   : > { %2734 = vrot.lane.b32.xlu1 %v4503_v50, %s4403_s8 }
 0xc3a   : > { %2730 = vrot.lane.b32.xlu0 %v4493_v40, %s4403_s8  ;;  %v5942_v40 = vpack.i.bf16 %v5434_v15, %v5430_v28 }
 0xc3d   : > { %2736 = vrot.lane.b32.xlu1 %v4501_v49, %s4403_s8  ;;  %v4127_v49 = vld [vmem:[%s5888_s4] sm:$0xff]  }
 0xc3e   : > { %3998 = vrot.lane.b32.xlu0 %v5939_v12, %s4404_s9  ;;  %3923 = vmatprep.subr.bf16.mxu1 %v4127_v49 }
 0xc3f   : > { %3924 = vmatpush3.bf16.msra.mxu1 %v4127_v49  ;;  %v5945_v49 = vpack.i.bf16 %v5462_v16, %v5458_v23  ;;  %v5950_v23 = vpack.i.bf16 %v5521_v0, %v5515_v47  ;;  %v5952_v16 = vld [vmem:[#allocation18_spill] sm:$0xff] }
 0xc41   : > { %4003 = vrot.lane.b32.xlu1 %v5940_v54, %s4404_s9 }
 0xc42   : > { %4008 = vrot.lane.b32.xlu0 %v5941_v39, %s4405_s10 }
 0xc45   : > { %4013 = vrot.lane.b32.xlu1 %v5942_v40, %s4405_s10 }
 0xca1   : > { %v2585_v50 = vpop.xlane.xlu0 %2584 }
 0xca5   : > { %v2579_v26 = vpop.xlane.xlu0 %2578 }
 0xca6   : > { %4369 = vrcp.f32 %v2579_v26 }
 0xca9   : > { %v2597_v33 = vpop.xlane.xlu1 %2596  ;;  %v2588_v1 = vpop.xlane.xlu0 %2587 }
 0xcad   : > { %v2591_v44 = vpop.xlane.xlu1 %2590  ;;  %v2582_v37 = vpop.xlane.xlu0 %2581 }
 0xcae   : > { %4371 = vrcp.f32 %v2582_v37 }
 0xcaf   : > { %4373 = vrcp.f32 %v2588_v1 }
 0xcb0   : > { %v4370_v58 = vpop.eup %4369 }
 0xcb1   : > { %v2600_v45 = vpop.xlane.xlu1 %2599  ;;  %v2594_v24 = vpop.xlane.xlu0 %2593  ;;  %v2625_v20 = vmul.f32 %v4370_v58, %v5636_v6 }
 0xcb2   : > { %4375 = vrcp.f32 %v2594_v24  ;;  %v5957_v24 = vld [vmem:[#allocation5_spill] sm:$0xff] }
 0xcb3   : > { %4377 = vrcp.f32 %v2585_v50 }
 0xcb4   : > { %4379 = vrcp.f32 %v2591_v44 }
 0xcb5   : > { %v2733_v28 = vpop.permute.xlu1 %2732  ;;  %v2731_v15 = vpop.permute.xlu0 %2730  ;;  %4381 = vrcp.f32 %v2600_v45 }
 0xcb6   : > { %3907 = vmatprep.subr.bf16.mxu0 %v2731_v15  ;;  %4383 = vrcp.f32 %v2597_v33 }
 0xcb7   : > { %3908 = vmatpush3.bf16.msra.mxu0 %v2731_v15  ;;  %v5958_v15 = vld [vmem:[#allocation3_spill] sm:$0xff] }
 0xcb8   : > { %3909 = vmatprep.subr.bf16.mxu0 %v2733_v28  ;;  %v4372_v19 = vpop.eup %4371 }
 0xcb9   : > { %v2735_v8 = vpop.permute.xlu1 %2734  ;;  %v2626_v31 = vmul.f32 %v4372_v19, %v4358_v7  ;;  %v4374_v61 = vpop.eup %4373 }
 0xcba   : > { %v2628_v2 = vmul.f32 %v4374_v61, %v5640_v51  ;;  %v3999_v50 = vpop.permute.xlu0 %3998 }
 0xcbb   : > { %3910 = vmatpush3.bf16.msra.mxu0 %v2733_v28  ;;  %v2637_v41 = vpack.c.bf16 %v2626_v31, %v2625_v20  ;;  %v4001_v13 = vunpack.i.h.bf16 %v3999_v50  ;;  %v4000_v36 = vunpack.i.l.bf16 %v3999_v50  ;;  %v5960_v31 = vld [vmem:[#allocation2_spill] sm:$0xff] }
 0xcbc   : > { %3911 = vmatprep.subr.bf16.mxu0 %v2735_v8  ;;  %v4376_v11 = vpop.eup %4375 }
 0xcbd   : > { %3915 = vmatprep.mubr.msk.bf16.mxu0 %vm689_vm2, %v2637_v41  ;;  %v4378_v43 = vpop.eup %4377  ;;  %v2737_v60 = vpop.permute.xlu1 %2736  ;;  %v2630_v3 = vmul.f32 %v4376_v11, %v5657_v62  ;;  %v3012_v28 = vsel %vm498_vm1, %v5957_v24, %v4001_v13  ;;  %v3011_v58 = vsel %vm498_vm1, %v5958_v15, %v4000_v36 }
 0xcbe   : > { %v4380_v18 = vpop.eup %4379  ;;  %v2627_v6 = vmul.f32 %v4378_v43, %v5631_v48  ;;  %v4128_v48 = vld [vmem:[%s5888_s4 + $0x8] sm:$0xff]   ;;  %v4009_v33 = vpop.permute.xlu0 %4008 }
 0xcbf   : > { %3912 = vmatpush3.bf16.msra.mxu0 %v2735_v8  ;;  %v2629_v7 = vmul.f32 %v4380_v18, %v5649_v46  ;;  %v4382_v30 = vpop.eup %4381  ;;  %3925 = vmatprep.subr.bf16.mxu1 %v4128_v48  ;;  %v4011_v37 = vunpack.i.h.bf16 %v4009_v33  ;;  %v4010_v45 = vunpack.i.l.bf16 %v4009_v33  ;;  %v5959_v8 = vld [vmem:[#allocation4_spill] sm:$0xff] }
 0xcc0   : > { %3913 = vmatprep.subr.bf16.mxu0 %v2737_v60  ;;  %v2638_v25 = vpack.c.bf16 %v2628_v2, %v2627_v6  ;;  %v4384_v9 = vpop.eup %4383  ;;  %v2632_v29 = vmul.f32 %v4382_v30, %v5652_v57  ;;  %3926 = vmatpush3.bf16.msra.mxu1 %v4128_v48  ;;  %v5943_v57 = vpack.i.bf16 %v5121_v56, %v5117_v5 }
 0xcc1   : > { %v2639_v34 = vpack.c.bf16 %v2630_v3, %v2629_v7  ;;  %v2631_v51 = vmul.f32 %v4384_v9, %v5642_v14  ;;  %v5946_v5 = vpack.i.bf16 %v5466_v22, %v5460_v53  ;;  %v5948_v56 = vpack.i.bf16 %v5191_v63, %v5183_v59  ;;  %v5951_v53 = vld [vmem:[#allocation20_spill] sm:$0xff]  ;;  %v5955_v22 = vld [vmem:[#allocation19_spill] sm:$0xff]  ;;  %v4004_v63 = vpop.permute.xlu1 %4003 }
 0xcc2   : > { %v5953_v4 = vpack.i.bf16 %v5951_v53, %v5952_v16  ;;  %v5956_v59 = vpack.i.bf16 %v5954_v55, %v5955_v22  ;;  %v4006_v1 = vunpack.i.h.bf16 %v4004_v63  ;;  %v4005_v44 = vunpack.i.l.bf16 %v4004_v63 }
 0xcc3   : > { %3914 = vmatpush3.bf16.msra.mxu0 %v2737_v60  ;;  %v2640_v27 = vpack.c.bf16 %v2632_v29, %v2631_v51  ;;  %v3028_v6 = vsel %vm3027_vm3, %v3011_v58, %v4010_v45  ;;  %v3029_v7 = vsel %vm3027_vm3, %v3012_v28, %v4011_v37  ;;  %v5965_v58 = vld [vmem:[#allocation24_spill] sm:$0xff] }
 0xcc4   : > { %v3014_v20 = vsel %vm498_vm1, %v5959_v8, %v4006_v1  ;;  %v3013_v41 = vsel %vm498_vm1, %v5960_v31, %v4005_v44  ;;  %v5968_v31 = vld [vmem:[#allocation25_spill] sm:$0xff] }
 0xcc5   : > { %v4014_v26 = vpop.permute.xlu1 %4013 }
 0xcc6   : > { %3916 = vmatmul.mubr.msk.bf16.vlgmr.msra.gmra.mrb[80].mxu0 %vm689_vm2, %v2638_v25  ;;  %v4016_v47 = vunpack.i.h.bf16 %v4014_v26  ;;  %v4015_v0 = vunpack.i.l.bf16 %v4014_v26 }
 0xcc7   : > { %3919 = vmatprep.mubr.msk.bf16.mxu0 %vm689_vm2, %v2639_v34 }
 0xcc8   : > { %v3030_v60 = vsel %vm3027_vm3, %v3013_v41, %v4015_v0  ;;  %v3031_v18 = vsel %vm3027_vm3, %v3014_v20, %v4016_v47  ;;  %v5969_v41 = vld [vmem:[#allocation23_spill] sm:$0xff] }
 0xcce   : > { %3920 = vmatmul.mubr.msk.bf16.gmra.mrb[84].mxu0 %vm689_vm2, %v2640_v27 }
 0xcf4   : > { %v3901_v46 = vpop.f32.mrb[48].mxu1 }
 0xcf5   : > { %v2699_v62 = vpop.f32.mrb[49].mxu1 }
 0xcf6   : > { %v3902_v38 = vpop.f32.mrb[50].mxu1 }
 0xcf7   : > { %v4022_v42 = vpack.i.bf16 %v3902_v38, %v3901_v46  ;;  %v2702_v10 = vpop.f32.mrb[51].mxu1 }
 0xcf8   : > { %v4017_v32 = vpack.i.bf16 %v2702_v10, %v2699_v62 }
 0xcf9   : > { %4023 = vrot.lane.b32.xlu1 %v4022_v42, %s4406_s15 }
 0xcfa   : > { %4018 = vrot.lane.b32.xlu0 %v4017_v32, %s4406_s15 }
 0xcfc   : > { %v3905_v14 = vpop.f32.mrb[52].mxu1 }
 0xcfd   : > { %4033 = vrot.lane.b32.xlu1 %v5943_v57, %s4404_s9  ;;  %v2715_v52 = vpop.f32.mrb[53].mxu1 }
 0xcfe   : > { %4028 = vrot.lane.b32.xlu0 %v5944_v17, %s4404_s9  ;;  %v3906_v12 = vpop.f32.mrb[54].mxu1 }
 0xcff   : > { %v4052_v54 = vpack.i.bf16 %v3906_v12, %v3905_v14  ;;  %v2718_v39 = vpop.f32.mrb[55].mxu1  ;;  %v5961_v12 = vld [vmem:[#allocation8_spill] sm:$0xff] }
 0xd00   : > { %v4047_v40 = vpack.i.bf16 %v2718_v39, %v2715_v52  ;;  %v5962_v39 = vld [vmem:[#allocation6_spill] sm:$0xff] }
 0xd01   : > { %4043 = vrot.lane.b32.xlu1 %v5945_v49, %s4405_s10 }
 0xd02   : > { %4038 = vrot.lane.b32.xlu0 %v5946_v5, %s4405_s10  ;;  %v5963_v5 = vld [vmem:[#allocation9_spill] sm:$0xff] }
 0xd05   : > { %4053 = vrot.lane.b32.xlu1 %v4052_v54, %s4406_s15 }
 0xd06   : > { %4048 = vrot.lane.b32.xlu0 %v4047_v40, %s4406_s15 }
 0xd09   : > { %4063 = vrot.lane.b32.xlu1 %v5947_v35, %s4404_s9 }
 0xd0a   : > { %4058 = vrot.lane.b32.xlu0 %v5948_v56, %s4404_s9  ;;  %v5964_v56 = vld [vmem:[#allocation7_spill] sm:$0xff] }
 0xd0d   : > { %4073 = vrot.lane.b32.xlu1 %v5949_v21, %s4405_s10 }
 0xd0e   : > { %4068 = vrot.lane.b32.xlu0 %v5950_v23, %s4405_s10 }
 0xd11   : > { %4083 = vrot.lane.b32.xlu1 %v5953_v4, %s4404_s9 }
 0xd12   : > { %4078 = vrot.lane.b32.xlu0 %v5956_v59, %s4404_s9 }
 0xd6b   : > { %v4024_v19 = vpop.permute.xlu1 %4023 }
 0xd6c   : > { %v4026_v61 = vunpack.i.h.bf16 %v4024_v19  ;;  %v4025_v11 = vunpack.i.l.bf16 %v4024_v19  ;;  %v4019_v43 = vpop.permute.xlu0 %4018  ;;  %v5966_v19 = vld [vmem:[#allocation22_spill] sm:$0xff] }
 0xd6d   : > { %v4021_v2 = vunpack.i.h.bf16 %v4019_v43  ;;  %v4020_v3 = vunpack.i.l.bf16 %v4019_v43  ;;  %v5967_v8 = vpack.i.bf16 %v5965_v58, %v5966_v19  ;;  %v5977_v58 = vld [vmem:[#allocation17_spill] sm:$0xff] }
 0xd6e   : > { %v3048_v25 = vsel %vm3044_vm4, %v3031_v18, %v4026_v61  ;;  %v3047_v30 = vsel %vm3044_vm4, %v3030_v60, %v4025_v11  ;;  %v5970_v61 = vpack.i.bf16 %v5968_v31, %v5969_v41 }
 0xd6f   : > { %v3062_v34 = vpack.c.bf16 %v3048_v25, %v3047_v30  ;;  %v3045_v9 = vsel %vm3044_vm4, %v3028_v6, %v4020_v3  ;;  %v3046_v29 = vsel %vm3044_vm4, %v3029_v7, %v4021_v2  ;;  %v4034_v51 = vpop.permute.xlu1 %4033 }
 0xd70   : > { %v3061_v27 = vpack.c.bf16 %v3046_v29, %v3045_v9  ;;  %v4029_v48 = vpop.permute.xlu0 %4028  ;;  %v4036_v46 = vunpack.i.h.bf16 %v4034_v51  ;;  %v4035_v62 = vunpack.i.l.bf16 %v4034_v51 }
 0xd71   : > { %v4031_v42 = vunpack.i.h.bf16 %v4029_v48  ;;  %v4030_v10 = vunpack.i.l.bf16 %v4029_v48 }
 0xd72   : > { %3927 = vmatprep.mubr.msk.bf16.mxu1 %vm340_vm0, %v3061_v27  ;;  %v3018_v54 = vsel %vm498_vm1, %v5961_v12, %v4036_v46  ;;  %v3017_v40 = vsel %vm498_vm1, %v5962_v39, %v4035_v62 }
 0xd73   : > { %v4044_v38 = vpop.permute.xlu1 %4043  ;;  %3928 = vmatmul.mubr.msk.bf16.vlgmr.msra.gmra.mrb[56].mxu1 %vm340_vm0, %v3062_v34  ;;  %v3016_v35 = vsel %vm498_vm1, %v5963_v5, %v4031_v42  ;;  %v3015_v21 = vsel %vm498_vm1, %v5964_v56, %v4030_v10  ;;  %v5972_v10 = vld [vmem:[#allocation10_spill] sm:$0xff] }
 0xd74   : > { %v4039_v32 = vpop.permute.xlu0 %4038  ;;  %v4046_v14 = vunpack.i.h.bf16 %v4044_v38  ;;  %v4045_v57 = vunpack.i.l.bf16 %v4044_v38  ;;  %v5971_v38 = vld [vmem:[#allocation12_spill] sm:$0xff] }
 0xd75   : > { %v4041_v52 = vunpack.i.h.bf16 %v4039_v32  ;;  %v4040_v17 = vunpack.i.l.bf16 %v4039_v32 }
 0xd76   : > { %v3034_v4 = vsel %vm3027_vm3, %v3017_v40, %v4045_v57  ;;  %v3035_v55 = vsel %vm3027_vm3, %v3018_v54, %v4046_v14  ;;  %v5973_v14 = vld [vmem:[#allocation13_spill] sm:$0xff] }
 0xd77   : > { %v4054_v49 = vpop.permute.xlu1 %4053  ;;  %v3032_v63 = vsel %vm3027_vm3, %v3015_v21, %v4040_v17  ;;  %v3033_v50 = vsel %vm3027_vm3, %v3016_v35, %v4041_v52  ;;  %v5974_v17 = vld [vmem:[#allocation11_spill] sm:$0xff] }
 0xd78   : > { %v4056_v23 = vunpack.i.h.bf16 %v4054_v49  ;;  %v4055_v53 = vunpack.i.l.bf16 %v4054_v49  ;;  %v4049_v16 = vpop.permute.xlu0 %4048 }
 0xd79   : > { %v4051_v22 = vunpack.i.h.bf16 %v4049_v16  ;;  %v4050_v59 = vunpack.i.l.bf16 %v4049_v16 }
 0xd7a   : > { %v3052_v26 = vsel %vm3044_vm4, %v3035_v55, %v4056_v23  ;;  %v3051_v13 = vsel %vm3044_vm4, %v3034_v4, %v4055_v53 }
 0xd7b   : > { %v3064_v36 = vpack.c.bf16 %v3052_v26, %v3051_v13  ;;  %v3049_v33 = vsel %vm3044_vm4, %v3032_v63, %v4050_v59  ;;  %v3050_v1 = vsel %vm3044_vm4, %v3033_v50, %v4051_v22  ;;  %v4064_v2 = vpop.permute.xlu1 %4063 }
 0xd7c   : > { %v3063_v44 = vpack.c.bf16 %v3050_v1, %v3049_v33  ;;  %v4059_v3 = vpop.permute.xlu0 %4058  ;;  %v4066_v25 = vunpack.i.h.bf16 %v4064_v2  ;;  %v4065_v30 = vunpack.i.l.bf16 %v4064_v2 }
 0xd7d   : > { %v4061_v34 = vunpack.i.h.bf16 %v4059_v3  ;;  %v4060_v29 = vunpack.i.l.bf16 %v4059_v3 }
 0xd7e   : > { %3931 = vmatprep.mubr.msk.bf16.mxu1 %vm340_vm0, %v3063_v44  ;;  %v3022_v42 = vsel %vm498_vm1, %v5971_v38, %v4066_v25  ;;  %v3021_v32 = vsel %vm498_vm1, %v5972_v10, %v4065_v30 }
 0xd7f   : > { %3932 = vmatmul.mubr.msk.bf16.gmra.mrb[60].mxu1 %vm340_vm0, %v3064_v36  ;;  %v4074_v6 = vpop.permute.xlu1 %4073  ;;  %v3020_v57 = vsel %vm498_vm1, %v5973_v14, %v4061_v34  ;;  %v3019_v12 = vsel %vm498_vm1, %v5974_v17, %v4060_v29  ;;  %v3405_v29 = vld [vmem:[%s5889_s5] ss:$0 sm:$0xff] }
 0xd80   : > { %v4069_v7 = vpop.permute.xlu0 %4068  ;;  %v4075_v51 = vunpack.i.l.bf16 %v4074_v6  ;;  %v4076_v48 = vunpack.i.h.bf16 %v4074_v6 }
 0xd81   : > { %v4070_v46 = vunpack.i.l.bf16 %v4069_v7  ;;  %v4071_v62 = vunpack.i.h.bf16 %v4069_v7 }
 0xd82   : > { %v3038_v54 = vsel %vm3027_vm3, %v3021_v32, %v4075_v51  ;;  %v3039_v5 = vsel %vm3027_vm3, %v3022_v42, %v4076_v48 }
 0xd83   : > { %v4084_v9 = vpop.permute.xlu1 %4083  ;;  %v3036_v35 = vsel %vm3027_vm3, %v3019_v12, %v4070_v46  ;;  %v3037_v23 = vsel %vm3027_vm3, %v3020_v57, %v4071_v62 }
 0xd84   : > { %v4079_v27 = vpop.permute.xlu0 %4078  ;;  %v4086_v53 = vunpack.i.h.bf16 %v4084_v9  ;;  %v4085_v55 = vunpack.i.l.bf16 %v4084_v9 }
 0xd85   : > { %v4081_v26 = vunpack.i.h.bf16 %v4079_v27  ;;  %v4080_v13 = vunpack.i.l.bf16 %v4079_v27 }
 0xd87   : > { %v3024_v19 = vsel %vm498_vm1, %v5977_v58, %v4081_v26 }
 0xd99   : > { %v3917_v47 = vpop.f32.mrb[80].mxu0 }
 0xd9a   : > { %v2788_v0 = vpop.f32.mrb[81].mxu0 }
 0xd9b   : > { %v3918_v37 = vpop.f32.mrb[82].mxu0 }
 0xd9c   : > { %v4087_v45 = vpack.i.bf16 %v3918_v37, %v3917_v47  ;;  %v2791_v24 = vpop.f32.mrb[83].mxu0  ;;  %v5975_v37 = vld [vmem:[#allocation16_spill] sm:$0xff] }
 0xd9d   : > { %v4092_v28 = vpack.i.bf16 %v2791_v24, %v2788_v0  ;;  %v5976_v24 = vld [vmem:[#allocation14_spill] sm:$0xff] }
 0xd9e   : > { %4088 = vrot.lane.b32.xlu1 %v4087_v45, %s4406_s15  ;;  %v3026_v45 = vsel %vm498_vm1, %v5975_v37, %v4086_v53 }
 0xd9f   : > { %4093 = vrot.lane.b32.xlu0 %v4092_v28, %s4406_s15  ;;  %v3025_v28 = vsel %vm498_vm1, %v5976_v24, %v4085_v55 }
 0xda1   : > { %v3921_v15 = vpop.f32.mrb[84].mxu0 }
 0xda2   : > { %4103 = vrot.lane.b32.xlu1 %v5967_v8, %s4405_s10  ;;  %v2804_v20 = vpop.f32.mrb[85].mxu0  ;;  %v5978_v8 = vld [vmem:[#allocation15_spill] sm:$0xff] }
 0xda3   : > { %4098 = vrot.lane.b32.xlu0 %v5970_v61, %s4405_s10  ;;  %v3922_v11 = vpop.f32.mrb[86].mxu0 }
 0xda4   : > { %v4112_v43 = vpack.i.bf16 %v3922_v11, %v3921_v15  ;;  %v2807_v60 = vpop.f32.mrb[87].mxu0 }
 0xda5   : > { %v4107_v18 = vpack.i.bf16 %v2807_v60, %v2804_v20  ;;  %v3023_v20 = vsel %vm498_vm1, %v5978_v8, %v4080_v13 }
 0xda6   : > { %4113 = vrot.lane.b32.xlu1 %v4112_v43, %s4406_s15 }
 0xda7   : > { %4108 = vrot.lane.b32.xlu0 %v4107_v18, %s4406_s15 }
 0xe10   : > { %v4089_v52 = vpop.permute.xlu1 %4088 }
 0xe11   : > { %v4091_v39 = vunpack.i.h.bf16 %v4089_v52  ;;  %v4090_v40 = vunpack.i.l.bf16 %v4089_v52  ;;  %v4094_v49 = vpop.permute.xlu0 %4093 }
 0xe12   : > { %v4096_v56 = vunpack.i.h.bf16 %v4094_v49  ;;  %v4095_v21 = vunpack.i.l.bf16 %v4094_v49 }
 0xe13   : > { %v3056_v16 = vsel %vm3044_vm4, %v3039_v5, %v4091_v39  ;;  %v3055_v4 = vsel %vm3044_vm4, %v3038_v54, %v4090_v40 }
 0xe14   : > { %v3066_v22 = vpack.c.bf16 %v3056_v16, %v3055_v4  ;;  %v3053_v59 = vsel %vm3044_vm4, %v3036_v35, %v4095_v21  ;;  %v3054_v63 = vsel %vm3044_vm4, %v3037_v23, %v4096_v56  ;;  %v4104_v50 = vpop.permute.xlu1 %4103 }
 0xe15   : > { %v3065_v36 = vpack.c.bf16 %v3054_v63, %v3053_v59  ;;  %v4099_v33 = vpop.permute.xlu0 %4098  ;;  %v4106_v1 = vunpack.i.h.bf16 %v4104_v50  ;;  %v4105_v44 = vunpack.i.l.bf16 %v4104_v50 }
 0xe16   : > { %v4101_v47 = vunpack.i.h.bf16 %v4099_v33  ;;  %v4100_v0 = vunpack.i.l.bf16 %v4099_v33 }
 0xe17   : > { %3935 = vmatprep.mubr.msk.bf16.mxu1 %vm340_vm0, %v3065_v36  ;;  %v3043_v11 = vsel %vm3027_vm3, %v3026_v45, %v4106_v1  ;;  %v3042_v43 = vsel %vm3027_vm3, %v3025_v28, %v4105_v44 }
 0xe18   : > { %v4114_v15 = vpop.permute.xlu1 %4113  ;;  %3936 = vmatmul.mubr.msk.bf16.gmra.mrb[64].mxu1 %vm340_vm0, %v3066_v22  ;;  %v3040_v2 = vsel %vm3027_vm3, %v3023_v20, %v4100_v0  ;;  %v3041_v3 = vsel %vm3027_vm3, %v3024_v19, %v4101_v47 }
 0xe19   : > { %v4116_v31 = vunpack.i.h.bf16 %v4114_v15  ;;  %v4115_v41 = vunpack.i.l.bf16 %v4114_v15  ;;  %v4109_v61 = vpop.permute.xlu0 %4108 }
 0xe1a   : > { %v4111_v60 = vunpack.i.h.bf16 %v4109_v61  ;;  %v4110_v18 = vunpack.i.l.bf16 %v4109_v61 }
 0xe1b   : > { %v3060_v6 = vsel %vm3044_vm4, %v3043_v11, %v4116_v31  ;;  %v3059_v7 = vsel %vm3044_vm4, %v3042_v43, %v4115_v41 }
 0xe1c   : > { %v3068_v25 = vpack.c.bf16 %v3060_v6, %v3059_v7  ;;  %v3057_v30 = vsel %vm3044_vm4, %v3040_v2, %v4110_v18  ;;  %v3058_v34 = vsel %vm3044_vm4, %v3041_v3, %v4111_v60 }
 0xe1d   : > { %v3067_v9 = vpack.c.bf16 %v3058_v34, %v3057_v30 }
 0xe1f   : > { %3939 = vmatprep.mubr.msk.bf16.mxu1 %vm340_vm0, %v3067_v9 }
 0xe20   : > { %3940 = vmatmul.mubr.msk.bf16.gmra.mrb[68].mxu1 %vm340_vm0, %v3068_v25 }
 0xe46   : > { %v3929_v51 = vpop.f32.mrb[56].mxu1 }
 0xe47   : > { %v3159_v27 = vadd.f32 %v3929_v51, %v3405_v29  ;;  %v3150_v48 = vpop.f32.mrb[57].mxu1 }
 0xe48   : > { %v3151_v46 = vadd.f32 %v3405_v29, %v3150_v48  ;;  %v3930_v62 = vpop.f32.mrb[58].mxu1 }
 0xe49   : > { %3215 = vst.msk [vmem:[%s5847_s22 + $0x10] sm:$0xff] %vm340_vm0, %v3159_v27  ;;  %v3162_v38 = vadd.f32 %v3930_v62, %v3405_v29  ;;  %v3153_v42 = vpop.f32.mrb[59].mxu1 }
 0xe4a   : > { %3213 = vst.msk [vmem:[%s5847_s22] sm:$0xff] %vm340_vm0, %v3151_v46  ;;  %v3154_v10 = vadd.f32 %v3405_v29, %v3153_v42 }
 0xe4b   : > { %3216 = vst.msk [vmem:[%s5847_s22 + $0x18] sm:$0xff] %vm340_vm0, %v3162_v38 }
 0xe4c   : > { %3214 = vst.msk [vmem:[%s5847_s22 + $0x8] sm:$0xff] %vm340_vm0, %v3154_v10 }
 0xe52   : > { %v3933_v32 = vpop.f32.mrb[60].mxu1 }
 0xe53   : > { %v3175_v14 = vadd.f32 %v3933_v32, %v3405_v29  ;;  %v3166_v57 = vpop.f32.mrb[61].mxu1 }
 0xe54   : > { %v3167_v52 = vadd.f32 %v3405_v29, %v3166_v57  ;;  %v3934_v17 = vpop.f32.mrb[62].mxu1 }
 0xe55   : > { %3219 = vst.msk [vmem:[%s5847_s22 + $0x30] sm:$0xff] %vm340_vm0, %v3175_v14  ;;  %v3178_v12 = vadd.f32 %v3934_v17, %v3405_v29  ;;  %v3169_v54 = vpop.f32.mrb[63].mxu1 }
 0xe56   : > { %3217 = vst.msk [vmem:[%s5847_s22 + $0x20] sm:$0xff] %vm340_vm0, %v3167_v52  ;;  %v3170_v39 = vadd.f32 %v3405_v29, %v3169_v54 }
 0xe57   : > { %3220 = vst.msk [vmem:[%s5847_s22 + $0x38] sm:$0xff] %vm340_vm0, %v3178_v12 }
 0xe58   : > { %3218 = vst.msk [vmem:[%s5847_s22 + $0x28] sm:$0xff] %vm340_vm0, %v3170_v39 }
 0xeeb   : > { %v3937_v40 = vpop.f32.mrb[64].mxu1 }
 0xeec   : > { %v3191_v49 = vadd.f32 %v3937_v40, %v3405_v29  ;;  %v3182_v5 = vpop.f32.mrb[65].mxu1 }
 0xeed   : > { %v3183_v35 = vadd.f32 %v3405_v29, %v3182_v5  ;;  %v3938_v56 = vpop.f32.mrb[66].mxu1 }
 0xeee   : > { %3223 = vst.msk [vmem:[%s5847_s22 + $0x50] sm:$0xff] %vm340_vm0, %v3191_v49  ;;  %v3194_v21 = vadd.f32 %v3938_v56, %v3405_v29  ;;  %v3185_v23 = vpop.f32.mrb[67].mxu1 }
 0xeef   : > { %3221 = vst.msk [vmem:[%s5847_s22 + $0x40] sm:$0xff] %vm340_vm0, %v3183_v35  ;;  %v3186_v53 = vadd.f32 %v3405_v29, %v3185_v23 }
 0xef0   : > { %3224 = vst.msk [vmem:[%s5847_s22 + $0x58] sm:$0xff] %vm340_vm0, %v3194_v21 }
 0xef1   : > { %3222 = vst.msk [vmem:[%s5847_s22 + $0x48] sm:$0xff] %vm340_vm0, %v3186_v53 }
 0xef3   : > { %v3941_v16 = vpop.f32.mrb[68].mxu1 }
 0xef4   : > { %v3207_v4 = vadd.f32 %v3941_v16, %v3405_v29  ;;  %v3198_v55 = vpop.f32.mrb[69].mxu1 }
 0xef5   : > { %v3199_v22 = vadd.f32 %v3405_v29, %v3198_v55  ;;  %v3942_v59 = vpop.f32.mrb[70].mxu1 }
 0xef6   : > { %3227 = vst.msk [vmem:[%s5847_s22 + $0x70] sm:$0xff] %vm340_vm0, %v3207_v4  ;;  %v3210_v63 = vadd.f32 %v3942_v59, %v3405_v29  ;;  %v3201_v50 = vpop.f32.mrb[71].mxu1 }
 0xef7   : > { %3225 = vst.msk [vmem:[%s5847_s22 + $0x60] sm:$0xff] %vm340_vm0, %v3199_v22  ;;  %v3202_v26 = vadd.f32 %v3405_v29, %v3201_v50 }
 0xef8   : > { %3228 = vst.msk [vmem:[%s5847_s22 + $0x78] sm:$0xff] %vm340_vm0, %v3210_v63 }
 0xef9   : > { %3226 = vst.msk [vmem:[%s5847_s22 + $0x68] sm:$0xff] %vm340_vm0, %v3202_v26 }
 0xefa PF: > { %s16_s21 = sadd.s32 1, %s4391_s21  }
 0xefb   : > { %p13_p4 = scmp.ge.s32.totalorder %s16_s21, 4  }
 0xefd   :  { %15 = sbr.rel (!%p13_p4) target bundleno = 1 (0x1), region = 77 }

</bundles_post_ra>
